<compile_context>
chip_gen: v7x
topology: tpu7x:2x2x1
jax: 0.10.0
libtpu: 0.0.40
codegen_flags: <defaults>
</compile_context>

<pallas_src>
import jax
import jax.numpy as jnp
from jax.experimental import pallas as pl
from jax.experimental.pallas import tpu as pltpu

LN_EPS = 1e-5  # nn.LayerNorm default


def ffn_kernel(x_ref, w1_ref, b1_ref, w2_ref, p_ref, o_ref):
    """x: (tm, D), w1: (D, H), b1: (1, H) f32, w2: (H, D), p: (3, D) f32 = [b2; gamma; beta]."""
    x = x_ref[...]                                   # native (compute) dtype — no upcast

    # fc1 on the MXU (f32 accumulation), bias + ReLU in f32.
    h = jnp.dot(x, w1_ref[...], preferred_element_type=jnp.float32)
    h = jnp.maximum(h + b1_ref[...], 0.0)

    # fc2: feed the MXU in the weights' dtype (bf16 fast path), accumulate in f32.
    y = jnp.dot(h.astype(w2_ref.dtype), w2_ref[...],
                preferred_element_type=jnp.float32)

    params = p_ref[...]                              # (3, D) f32
    y = y + params[0:1, :]                           # b2

    # dropout(p=0.0) is the identity -> elided.
    # TODO(synk): training-mode dropout (p>0) would need pltpu.prng_seed /
    # pltpu.stateful_bernoulli; the module is exercised with p effectively 0.

    # residual (f32)
    y = y + x.astype(jnp.float32)

    # LayerNorm over dim_model (f32), affine with f32 gamma/beta.
    mean = jnp.mean(y, axis=-1, keepdims=True)
    diff = y - mean
    var = jnp.mean(diff * diff, axis=-1, keepdims=True)
    y = diff * jax.lax.rsqrt(var + LN_EPS)
    out = y * params[1:2, :] + params[2:3, :]        # gamma, beta

    o_ref[...] = out.astype(o_ref.dtype)


def position_wise_feed_forward(x, w1, b1, w2, b2, gamma, beta, *,
                               tm=256, compute_dtype=None,
                               vmem_limit_bytes=64 * 1024 * 1024):
    """x: (B, S, D). Params: w1 (D,H), b1 (H,), w2 (H,D), b2/gamma/beta (D,)."""
    B, S, D = x.shape
    H = w1.shape[1]
    M = B * S
    out_dtype = x.dtype

    if compute_dtype is not None:
        # bf16 fast path: MXU operands in bf16, accumulation stays f32 in-kernel.
        x = x.astype(compute_dtype)
        w1 = w1.astype(compute_dtype)
        w2 = w2.astype(compute_dtype)

    # Row tile: as large as requested (amortizes per-grid-step overhead, fills the MXU's
    # systolic height), clamped to a multiple of 8 that divides M.
    assert M % 8 == 0, "token count must be a multiple of 8 (sublane height)"
    tm = max(8, (min(tm, M) // 8) * 8)
    while M % tm:
        tm -= 8
    grid = (M // tm,)

    x2 = x.reshape(M, D)
    b1_2 = b1.reshape(1, H).astype(jnp.float32)
    # b2 / gamma / beta in one (3, D) f32 block: fewer DMA descriptors per step,
    # gamma/beta stay f32 for the affine step.
    ln_params = jnp.stack([b2.astype(jnp.float32),
                           gamma.astype(jnp.float32),
                           beta.astype(jnp.float32)], axis=0)

    itemsize = jnp.dtype(x.dtype).itemsize
    cost = pl.CostEstimate(
        flops=4 * M * D * H + 10 * M * D,
        transcendentals=M,                                   # one rsqrt per row
        bytes_accessed=(2 * M * D * itemsize                 # x in + out
                        + (D * H + H * D) * itemsize         # weights
                        + (H + 3 * D) * 4))                  # biases / LN params

    out = pl.pallas_call(
        ffn_kernel,
        out_shape=jax.ShapeDtypeStruct((M, D), out_dtype),
        grid_spec=pltpu.PrefetchScalarGridSpec(
            num_scalar_prefetch=0,
            grid=grid,
            in_specs=[
                pl.BlockSpec((tm, D), lambda i: (i, 0)),   # x rows
                pl.BlockSpec((D, H), lambda i: (0, 0)),    # w1 (resident, constant index)
                pl.BlockSpec((1, H), lambda i: (0, 0)),    # b1
                pl.BlockSpec((H, D), lambda i: (0, 0)),    # w2 (resident, constant index)
                pl.BlockSpec((3, D), lambda i: (0, 0)),    # [b2; gamma; beta]
            ],
            out_specs=pl.BlockSpec((tm, D), lambda i: (i, 0)),
        ),
        compiler_params=pltpu.CompilerParams(
            dimension_semantics=("parallel",),    # token rows shard across v7x's 2 TCs
            vmem_limit_bytes=vmem_limit_bytes),
        cost_estimate=cost,
    )(x2, w1, b1_2, w2, ln_params)

    return out.reshape(B, S, D)


def reference(x, w1, b1, w2, b2, gamma, beta, compute_dtype=None):
    """Pure-JAX mirror of the PyTorch forward (dropout p=0). When compute_dtype is set,
    mirrors the kernel's low-precision-matmul / f32-accumulate strategy."""
    cd = compute_dtype if compute_dtype is not None else x.dtype
    xc = x.astype(cd)
    h = jnp.dot(xc, w1.astype(cd), preferred_element_type=jnp.float32) + b1
    h = jnp.maximum(h, 0.0)
    y = jnp.dot(h.astype(cd), w2.astype(cd), preferred_element_type=jnp.float32) + b2
    y = y + xc.astype(jnp.float32)
    mean = jnp.mean(y, axis=-1, keepdims=True)
    var = jnp.mean((y - mean) ** 2, axis=-1, keepdims=True)
    out = (y - mean) / jnp.sqrt(var + LN_EPS) * gamma + beta
    return out.astype(x.dtype)


if __name__ == "__main__":
    # Small but lane-dense shapes consistent with the encoder FFN
    # (real config: dim_model=340, hidden=1024, pad_size=340).
    B, S, D, H = 2, 256, 256, 512

    key = jax.random.PRNGKey(0)
    kx, k1, k2, k3, k4 = jax.random.split(key, 5)

    x = jax.random.normal(kx, (B, S, D), dtype=jnp.float32)

    # Deterministic parameter init (PyTorch-Linear-style uniform bounds).
    lim1 = 1.0 / (D ** 0.5)
    lim2 = 1.0 / (H ** 0.5)
    w1 = jax.random.uniform(k1, (D, H), minval=-lim1, maxval=lim1, dtype=jnp.float32)
    b1 = jax.random.uniform(k2, (H,), minval=-lim1, maxval=lim1, dtype=jnp.float32)
    w2 = jax.random.uniform(k3, (H, D), minval=-lim2, maxval=lim2, dtype=jnp.float32)
    b2 = jax.random.uniform(k4, (D,), minval=-lim2, maxval=lim2, dtype=jnp.float32)
    gamma = jnp.ones((D,), dtype=jnp.float32)   # nn.LayerNorm default weight
    beta = jnp.zeros((D,), dtype=jnp.float32)   # nn.LayerNorm default bias

    # 1) exact-semantics f32 path (matches the PyTorch module numerics).
    out_f32 = position_wise_feed_forward(x, w1, b1, w2, b2, gamma, beta,
                                         tm=256, compute_dtype=None)
    out_f32 = jax.block_until_ready(out_f32)
    ref_f32 = reference(x, w1, b1, w2, b2, gamma, beta)
    assert out_f32.shape == (B, S, D)
    assert jnp.allclose(out_f32, ref_f32, atol=2e-3, rtol=2e-3), (
        float(jnp.max(jnp.abs(out_f32 - ref_f32))))

    # 2) bf16 fast path (MXU-native operands, f32 accumulation + f32 LayerNorm).
    out_bf16 = position_wise_feed_forward(x, w1, b1, w2, b2, gamma, beta,
                                          tm=256, compute_dtype=jnp.bfloat16)
    out_bf16 = jax.block_until_ready(out_bf16)
    ref_bf16 = reference(x, w1, b1, w2, b2, gamma, beta, compute_dtype=jnp.bfloat16)
    assert out_bf16.shape == (B, S, D)
    assert jnp.allclose(out_bf16, ref_bf16, atol=3e-2, rtol=3e-2), (
        float(jnp.max(jnp.abs(out_bf16 - ref_bf16))))

    print("KERNEL_OK")
</pallas_src>

<mosaic_0001>
module attributes {stable_mosaic.version = 11 : i64} {
  func.func @ffn_kernel(%arg0: i32, %arg1: memref<256x256xf32, #tpu.memory_space<vmem>>, %arg2: memref<256x512xf32, #tpu.memory_space<vmem>>, %arg3: memref<1x512xf32, #tpu.memory_space<vmem>>, %arg4: memref<512x256xf32, #tpu.memory_space<vmem>>, %arg5: memref<3x256xf32, #tpu.memory_space<vmem>>, %arg6: memref<256x256xf32, #tpu.memory_space<vmem>>) attributes {dimension_semantics = [#tpu.dimension_semantics<parallel>], iteration_bounds = array<i64: 2>, scalar_prefetch = 0 : i64, scratch_operands = 0 : i64, tpu.core_type = #tpu.core_type<tc>, window_params = [{transform_indices = @transform_0, window_bounds = array<i64: 256, 256>}, {pipeline_mode = #tpu.pipeline_mode<synchronous>, transform_indices = @transform_1, window_bounds = array<i64: 256, 512>}, {pipeline_mode = #tpu.pipeline_mode<synchronous>, transform_indices = @transform_2, window_bounds = array<i64: 1, 512>}, {pipeline_mode = #tpu.pipeline_mode<synchronous>, transform_indices = @transform_3, window_bounds = array<i64: 512, 256>}, {pipeline_mode = #tpu.pipeline_mode<synchronous>, transform_indices = @transform_4, window_bounds = array<i64: 3, 256>}, {transform_indices = @transform_5, window_bounds = array<i64: 256, 256>}]} {
    %c0 = arith.constant 0 : index
    %c0_0 = arith.constant 0 : index
    %0 = vector.load %arg1[%c0, %c0_0] : memref<256x256xf32, #tpu.memory_space<vmem>>, vector<256x256xf32>
    %c0_1 = arith.constant 0 : index
    %c0_2 = arith.constant 0 : index
    %1 = vector.load %arg2[%c0_1, %c0_2] : memref<256x512xf32, #tpu.memory_space<vmem>>, vector<256x512xf32>
    %cst = arith.constant dense<0.000000e+00> : vector<256x512xf32>
    %2 = tpu.matmul %0, %1, %cst {dimension_numbers = #tpu.dot_dimension_numbers<[1], [0], [0], [1], [0, 0, 1, 1], [], []>} : vector<256x256xf32>, vector<256x512xf32>, vector<256x512xf32> -> vector<256x512xf32>
    %c0_3 = arith.constant 0 : index
    %c0_4 = arith.constant 0 : index
    %3 = vector.load %arg3[%c0_3, %c0_4] : memref<1x512xf32, #tpu.memory_space<vmem>>, vector<1x512xf32>
    %4 = vector.broadcast %3 : vector<1x512xf32> to vector<256x512xf32>
    %5 = arith.addf %2, %4 : vector<256x512xf32>
    %cst_5 = arith.constant 0.000000e+00 : f32
    %6 = vector.broadcast %cst_5 : f32 to vector<256x512xf32>
    %7 = arith.maximumf %5, %6 : vector<256x512xf32>
    %c0_6 = arith.constant 0 : index
    %c0_7 = arith.constant 0 : index
    %8 = vector.load %arg4[%c0_6, %c0_7] : memref<512x256xf32, #tpu.memory_space<vmem>>, vector<512x256xf32>
    %cst_8 = arith.constant dense<0.000000e+00> : vector<256x256xf32>
    %9 = tpu.matmul %7, %8, %cst_8 {dimension_numbers = #tpu.dot_dimension_numbers<[1], [0], [0], [1], [0, 0, 1, 1], [], []>} : vector<256x512xf32>, vector<512x256xf32>, vector<256x256xf32> -> vector<256x256xf32>
    %c0_9 = arith.constant 0 : index
    %c0_10 = arith.constant 0 : index
    %10 = vector.load %arg5[%c0_9, %c0_10] : memref<3x256xf32, #tpu.memory_space<vmem>>, vector<3x256xf32>
    %11 = vector.extract_strided_slice %10 {offsets = [0, 0], sizes = [1, 256], strides = [1, 1]} : vector<3x256xf32> to vector<1x256xf32>
    %12 = vector.broadcast %11 : vector<1x256xf32> to vector<256x256xf32>
    %13 = arith.addf %9, %12 : vector<256x256xf32>
    %14 = arith.addf %13, %0 : vector<256x256xf32>
    %cst_11 = arith.constant dense<0.000000e+00> : vector<256xf32>
    %15 = vector.multi_reduction <add>, %14, %cst_11 [1] : vector<256x256xf32> to vector<256xf32>
    %16 = vector.shape_cast %15 : vector<256xf32> to vector<256x1xf32>
    %cst_12 = arith.constant 2.560000e+02 : f32
    %17 = vector.broadcast %cst_12 : f32 to vector<256x1xf32>
    %18 = arith.divf %16, %17 : vector<256x1xf32>
    %19 = vector.broadcast %18 : vector<256x1xf32> to vector<256x256xf32>
    %20 = arith.subf %14, %19 : vector<256x256xf32>
    %21 = arith.mulf %20, %20 : vector<256x256xf32>
    %cst_13 = arith.constant dense<0.000000e+00> : vector<256xf32>
    %22 = vector.multi_reduction <add>, %21, %cst_13 [1] : vector<256x256xf32> to vector<256xf32>
    %23 = vector.shape_cast %22 : vector<256xf32> to vector<256x1xf32>
    %cst_14 = arith.constant 2.560000e+02 : f32
    %24 = vector.broadcast %cst_14 : f32 to vector<256x1xf32>
    %25 = arith.divf %23, %24 : vector<256x1xf32>
    %cst_15 = arith.constant 9.99999974E-6 : f32
    %26 = vector.broadcast %cst_15 : f32 to vector<256x1xf32>
    %27 = arith.addf %25, %26 : vector<256x1xf32>
    %28 = math.rsqrt %27 : vector<256x1xf32>
    %29 = vector.broadcast %28 : vector<256x1xf32> to vector<256x256xf32>
    %30 = arith.mulf %20, %29 : vector<256x256xf32>
    %31 = vector.extract_strided_slice %10 {offsets = [1, 0], sizes = [1, 256], strides = [1, 1]} : vector<3x256xf32> to vector<1x256xf32>
    %32 = vector.broadcast %31 : vector<1x256xf32> to vector<256x256xf32>
    %33 = arith.mulf %30, %32 : vector<256x256xf32>
    %34 = vector.extract_strided_slice %10 {offsets = [2, 0], sizes = [1, 256], strides = [1, 1]} : vector<3x256xf32> to vector<1x256xf32>
    %35 = vector.broadcast %34 : vector<1x256xf32> to vector<256x256xf32>
    %36 = arith.addf %33, %35 : vector<256x256xf32>
    %c0_16 = arith.constant 0 : index
    %c0_17 = arith.constant 0 : index
    %37 = vector.load %arg6[%c0_16, %c0_17] : memref<256x256xf32, #tpu.memory_space<vmem>>, vector<256x256xf32>
    tpu.vector_store %arg6[%c0_16, %c0_17], %36 {strides = array<i32>} : memref<256x256xf32, #tpu.memory_space<vmem>>, vector<256x256xf32>,
    return
  }
  func.func @transform_0(%arg0: i32) -> (i32, i32) {
    %c0_i32 = arith.constant 0 : i32
    %c0_i32_0 = arith.constant 0 : i32
    return %arg0, %c0_i32 : i32, i32
  }
  func.func @transform_1(%arg0: i32) -> (i32, i32) {
    %c0_i32 = arith.constant 0 : i32
    %c0_i32_0 = arith.constant 0 : i32
    %c0_i32_1 = arith.constant 0 : i32
    return %c0_i32, %c0_i32_0 : i32, i32
  }
  func.func @transform_2(%arg0: i32) -> (i32, i32) {
    %c0_i32 = arith.constant 0 : i32
    %c0_i32_0 = arith.constant 0 : i32
    %c0_i32_1 = arith.constant 0 : i32
    return %c0_i32, %c0_i32_0 : i32, i32
  }
  func.func @transform_3(%arg0: i32) -> (i32, i32) {
    %c0_i32 = arith.constant 0 : i32
    %c0_i32_0 = arith.constant 0 : i32
    %c0_i32_1 = arith.constant 0 : i32
    return %c0_i32, %c0_i32_0 : i32, i32
  }
  func.func @transform_4(%arg0: i32) -> (i32, i32) {
    %c0_i32 = arith.constant 0 : i32
    %c0_i32_0 = arith.constant 0 : i32
    %c0_i32_1 = arith.constant 0 : i32
    return %c0_i32, %c0_i32_0 : i32, i32
  }
  func.func @transform_5(%arg0: i32) -> (i32, i32) {
    %c0_i32 = arith.constant 0 : i32
    %c0_i32_0 = arith.constant 0 : i32
    return %arg0, %c0_i32 : i32, i32
  }
}

</mosaic_0001>

<bundles_post_ra>
// kernel: tpu_custom_call.1
= control target key start
LH: loop header
LB: loop body
LE: loop exit
PB: predicated region body
PF: predicated region fallthrough
CT: control target
= control target key end

     0   :  { %10 = vsyncpa [#allocation3], 0  ;;  %s5336_s0 = inlined_call_operand.hbm [shape: f32[512,256], index: 0, kind: input, shape index: {}]   ;;  %s5337_s1 = inlined_call_operand.hbm [shape: f32[256,512], index: 1, kind: input, shape index: {}]   ;;  %s5338_s2 = inlined_call_operand.hbm [shape: f32[1,512], index: 2, kind: input, shape index: {}]   ;;  %s5339_s3 = inlined_call_operand.hbm [shape: f32[512,256], index: 3, kind: input, shape index: {}]   ;;  %s5340_s4 = inlined_call_operand.hbm [shape: f32[3,256], index: 4, kind: input, shape index: {}]   ;;  %s5341_s5 = inlined_call_operand.hbm [shape: f32[512,256], index: 5, kind: output, shape index: {}]  }
   0x1   :  { %12 = vsyncpa [#allocation3 + $0x1], 0 }
   0x2   :  { %13 = vsyncpa [#allocation6], 0 }
   0x3   :  { %14 = vsyncpa [#allocation9], 0 }
   0x4   :  { %15 = vsyncpa [#allocation4], 0 }
   0x5   :  { %17 = vsyncpa [#allocation4 + $0x1], 0  ;;  %s3643_s18 = smov 0   ;;  %s3645_s19 = smov 0  }
   0x6   :  { %s3647_s20 = smov 0   ;;  %s3649_s21 = smov 0  }
   0x7 LB: > { %s3664_s22 = sadd.s32 4294967295, %s3599_s21   ;;  %s2749_s23 = sadd.s32 4294967294, %s3599_s21   ;;  %s3599_s21 = sphi %s3649_s21, %s5472_s21   ;;  %s3595_s20 = sphi %s3647_s20, %s5471_s20   ;;  %s3591_s19 = sphi %s3645_s19, %s5470_s19   ;;  %s3587_s18 = sphi %s3643_s18, %s5469_s18  }
   0x8   : > { %p43_p0 = scmp.ne.s32.totalorder %s3591_s19, %s3587_s18  ;;  %p5342_p1 = scmp.eq.s32.totalorder %s3664_s22, 0 }
   0x9   : > { %p157_p3 = scmp.eq.s32.totalorder %s2749_s23, 1  ;;  %p2750_p5 = scmp.ge.s32.totalorder %s3599_s21, 1 }
   0xa   : > { %p3673_p4 = por %p5342_p1, %p43_p0  ;;  %p164_p7 = scmp.lt.s32.totalorder %s3599_s21, 3 }
   0xb   : > { %p3678_p6 = por %p157_p3, %p43_p0  ;;  %s3601_s27 = smov [#allocation5]  }
   0xc   : > { %s5383_s24 = scalar_select %p3673_p4, 1, 0 }
   0xd   : > { %s5384_s25 = scalar_select %p3678_p6, 1, 0 }
   0xe   : > { %p3683_p8 = pnand %p2750_p5, %p164_p7  ;;  %s176_s28 = sshll.u32 %s3601_s27, 4  ;;  %s3687_s28 = int_to_ptr.vmem [resolvable:$true] %s176_s28 }
   0xf   : > { %s3602_s30 = smov [#allocation8]   ;;  %s3383_s9 = scalar_lea.hbm %s5337_s1, 16384 }
  0x10   : > { %s5385_s26 = scalar_select %p3683_p8, 1, 0 }
  0x11   : > { %p3181_p9 = pneg %p3683_p8  ;;  %s200_s6 = sshll.u32 %s3602_s30, 4  ;;  %s3698_s6 = int_to_ptr.vmem [resolvable:$true] %s200_s6 }
  0x12   : > { %p3384_p12 = scmp.ne.s32.totalorder %s5337_s1, %s3383_s9  ;;  %p3390_p5 = scmp.lt.u32.totalorder %s3383_s9, %s5337_s1 }
  0x13   : > { %p3694_p11 = pnand %p3181_p9, %p5342_p1 }
  0x15   : > { %p3708_p13 = pneg %p3694_p11 }
  0x17   : > { %p3386_p0 = pnand %p3708_p13, %p3384_p12 }
  0x19   : > { %p3387_p3 = pneg %p3386_p0 }
  0x1b   : > { %p3392_p7 = pnand %p3390_p5, %p3387_p3 }
  0x1d   : > { %3395 = shalt.err (!%p3392_p7)
}
  0x1e   : > { %s3396_s15 = scalar_lea.vmem %s3687_s28, 16384  ;;  %p3404_p2 = scmp.lt.s32.totalorder %s3687_s28, %s3687_s28 }
  0x1f   : > { %p3397_p9 = scmp.ne.s32.totalorder %s3687_s28, %s3396_s15  ;;  %p3405_p6 = scmp.lt.s32.totalorder %s3396_s15, %s3396_s15 }
  0x21   : > { %p3399_p10 = pnand %p3397_p9, %p3708_p13  ;;  %p3406_p12 = por %p3405_p6, %p3404_p2 }
  0x23   : > { %p3400_p1 = pneg %p3399_p10 }
  0x25   : > { %p3407_p0 = pnand %p3406_p12, %p3400_p1 }
  0x27   : > { %3410 = shalt.err (!%p3407_p0)
}
  0x28   : > { %s3603_s16 = smov 512   ;;  %s3604_s17 = smov 32  }
  0x29   : > { %3184 = dma.hbm_to_vmem [thread:$0]  (!%p3694_p11), %s5337_s1, 16384, %s3687_s28, [#allocation6], %s3603_s16, %s3603_s16, %s3604_s17  }
  0x2a   : > { %s3411_s8 = scalar_lea.hbm %s5339_s3, 16384 }
  0x2b   : > { %p3412_p2 = scmp.ne.s32.totalorder %s5339_s3, %s3411_s8  ;;  %p3418_p10 = scmp.lt.u32.totalorder %s3411_s8, %s5339_s3 }
  0x2d   : > { %p3414_p1 = pnand %p3412_p2, %p3708_p13 }
  0x2f   : > { %p3415_p6 = pneg %p3414_p1 }
  0x31   : > { %p3420_p3 = pnand %p3418_p10, %p3415_p6 }
  0x33   : > { %3423 = shalt.err (!%p3420_p3)
}
  0x34   : > { %s3424_s28 = scalar_lea.vmem %s3698_s6, 16384  ;;  %p3432_p12 = scmp.lt.s32.totalorder %s3698_s6, %s3698_s6 }
  0x35   : > { %p3425_p5 = scmp.ne.s32.totalorder %s3698_s6, %s3424_s28  ;;  %p3433_p0 = scmp.lt.s32.totalorder %s3424_s28, %s3424_s28 }
  0x37   : > { %p3427_p7 = pnand %p3425_p5, %p3708_p13  ;;  %p3434_p2 = por %p3433_p0, %p3432_p12 }
  0x39   : > { %p3428_p9 = pneg %p3427_p7 }
  0x3b   : > { %p3435_p1 = pnand %p3434_p2, %p3428_p9 }
  0x3d   : > { %3438 = shalt.err (!%p3435_p1)
}
  0x3e   : > { %s3605_s14 = smov 256   ;;  %s3606_s15 = smov 16  }
  0x3f   : > { %3190 = dma.hbm_to_vmem [thread:$0]  (!%p3694_p11), %s5339_s3, 16384, %s3698_s6, [#allocation9], %s3605_s14, %s3605_s14, %s3606_s15  }
  0x40   : > { %s3607_s23 = smov [#allocation7]   ;;  %s3608_s30 = smov [#allocation10]  }
  0x41   : > { %s190_s27 = sshll.u32 %s3607_s23, 4  ;;  %s214_s7 = sshll.u32 %s3608_s30, 4  ;;  %s191_s27 = int_to_ptr.vmem [resolvable:$true] %s190_s27  ;;  %s3755_s7 = int_to_ptr.vmem [resolvable:$true] %s214_s7 }
  0x42   : > { %s3439_s10 = scalar_lea.hbm %s5338_s2, 64 }
  0x43   : > { %p3440_p6 = scmp.ne.s32.totalorder %s5338_s2, %s3439_s10  ;;  %p3446_p5 = scmp.lt.u32.totalorder %s3439_s10, %s5338_s2 }
  0x45   : > { %p3442_p10 = pnand %p3440_p6, %p3708_p13 }
  0x47   : > { %p3443_p3 = pneg %p3442_p10 }
  0x49   : > { %p3448_p7 = pnand %p3446_p5, %p3443_p3 }
  0x4b   : > { %3451 = shalt.err (!%p3448_p7)
}
  0x4c   : > { %s3452_s16 = scalar_lea.vmem %s191_s27, 64  ;;  %p3460_p2 = scmp.lt.s32.totalorder %s191_s27, %s191_s27 }
  0x4d   : > { %p3453_p9 = scmp.ne.s32.totalorder %s191_s27, %s3452_s16  ;;  %p3461_p1 = scmp.lt.s32.totalorder %s3452_s16, %s3452_s16 }
  0x4f   : > { %p3455_p12 = pnand %p3453_p9, %p3708_p13  ;;  %p3462_p4 = por %p3461_p1, %p3460_p2 }
  0x51   : > { %p3456_p0 = pneg %p3455_p12 }
  0x53   : > { %p3463_p8 = pnand %p3462_p4, %p3456_p0 }
  0x55   : > { %3466 = shalt.err (!%p3463_p8)
}
  0x56   : > { %3187 = dma.hbm_to_vmem [thread:$0]  (!%p3694_p11), %s5338_s2, 64, %s191_s27, [#allocation6]  }
  0x57   : > { %s3467_s9 = scalar_lea.hbm %s5340_s4, 128 }
  0x58   : > { %p3468_p6 = scmp.ne.s32.totalorder %s5340_s4, %s3467_s9  ;;  %p3474_p4 = scmp.lt.u32.totalorder %s3467_s9, %s5340_s4 }
  0x5a   : > { %p3470_p10 = pnand %p3468_p6, %p3708_p13 }
  0x5c   : > { %p3471_p3 = pneg %p3470_p10 }
  0x5e   : > { %p3476_p8 = pnand %p3474_p4, %p3471_p3 }
  0x60   : > { %3479 = shalt.err (!%p3476_p8)
}
  0x61   : > { %s3480_s27 = scalar_lea.vmem %s3755_s7, 128  ;;  %p3488_p12 = scmp.lt.s32.totalorder %s3755_s7, %s3755_s7 }
  0x62   : > { %p3481_p5 = scmp.ne.s32.totalorder %s3755_s7, %s3480_s27  ;;  %p3489_p0 = scmp.lt.s32.totalorder %s3480_s27, %s3480_s27 }
  0x64   : > { %p3483_p7 = pnand %p3481_p5, %p3708_p13  ;;  %p3490_p2 = por %p3489_p0, %p3488_p12 }
  0x66   : > { %p3484_p9 = pneg %p3483_p7 }
  0x68   : > { %p3491_p1 = pnand %p3490_p2, %p3484_p9 }
  0x6a   : > { %3494 = shalt.err (!%p3491_p1)
}
  0x6b   : > { %3193 = dma.hbm_to_vmem [thread:$0]  (!%p3694_p11), %s5340_s4, 128, %s3755_s7, [#allocation9]  }
  0x6c   : > { %s3799_s12 = sadd.s32 1, %s3599_s21   ;;  %s30_s17 = sadd.s32 1, %s3595_s20 }
  0x6d   : > { %s27_s29 = ssub.s32 %s3599_s21, %s3799_s12  ;;  %p37_p6 = scmp.ne.s32.totalorder %s3595_s20, %s3591_s19 }
  0x6e   : > { %p28_p13 = scmp.eq.s32.totalorder %s27_s29, 0  ;;  %p38_p10 = scmp.eq.s32.totalorder %s3599_s21, 0 }
  0x6f   : > { %p5388_p4 = scmp.eq.s32.totalorder %s3664_s22, 1  ;;  %p3206_p5 = scmp.lt.s32.totalorder %s3599_s21, 2 }
  0x70   : > { %s3808_s23 = scalar_select %p28_p13, %s3595_s20, %s30_s17  }
  0x71   : > { %p39_p3 = por %p38_p10, %p37_p6  ;;  %p3812_p8 = por %p5388_p4, %p37_p6 }
  0x72   : > { %s225_s8 = sand.u32 1, %s3595_s20   ;;  %s2774_s7 = sshll.u32 %s3599_s21, 13 }
  0x73   : > { %s2756_s9 = sshll.u32 %s225_s8, 9  ;;  %s3822_s13 = scalar_lea.hbm %s5336_s0, %s2774_s7 }
  0x74   : > { %s229_s28 = scalar_lea.vmem [#allocation2], %s2756_s9  ;;  %p3826_p11 = pnand %p3206_p5, %p39_p3 }
  0x75   : > { %s237_s27 = sshll.u32 %s229_s28, 4  ;;  %s3830_s16 = scalar_lea.sflag [#allocation3], %s225_s8  ;;  %s3824_s27 = int_to_ptr.vmem [resolvable:$true] %s237_s27 }
  0x76   : > { %s3495_s29 = scalar_lea.hbm %s3822_s13, 8192  ;;  %p3497_p9 = pneg %p3826_p11 }
  0x77   : > { %p3496_p7 = scmp.ne.s32.totalorder %s3822_s13, %s3495_s29  ;;  %s3500_s7 = scalar_lea.hbm %s5336_s0, 16384 }
  0x78   : > { %p3501_p2 = scmp.lt.u32.totalorder %s3822_s13, %s5336_s0  ;;  %p3502_p1 = scmp.lt.u32.totalorder %s3500_s7, %s3495_s29 }
  0x79   : > { %p3498_p12 = pnand %p3497_p9, %p3496_p7  ;;  %p3504_p6 = scmp.lt.u32.totalorder %s3495_s29, %s3822_s13 }
  0x7a   : > { %p3503_p13 = por %p3502_p1, %p3501_p2 }
  0x7b   : > { %p3499_p0 = pneg %p3498_p12 }
  0x7c   : > { %p3505_p10 = por %p3504_p6, %p3503_p13 }
  0x7e   : > { %p3506_p3 = pnand %p3505_p10, %p3499_p0 }
  0x80   : > { %3509 = shalt.err (!%p3506_p3)
}
  0x81   : > { %s3510_s8 = scalar_lea.vmem %s3824_s27, 8192  ;;  %s3609_s28 = smov [#allocation2]  }
  0x82   : > { %p3511_p4 = scmp.ne.s32.totalorder %s3824_s27, %s3510_s8  ;;  %s3515_s17 = sshll.u32 %s3609_s28, 4  ;;  %s3516_s17 = int_to_ptr.vmem [resolvable:$false] %s3515_s17 }
  0x83   : > { %s3517_s9 = scalar_lea.vmem %s3516_s17, 16384  ;;  %p3518_p12 = scmp.lt.s32.totalorder %s3824_s27, %s3516_s17 }
  0x84   : > { %p3513_p5 = pnand %p3511_p4, %p3497_p9  ;;  %p3519_p2 = scmp.lt.s32.totalorder %s3517_s9, %s3510_s8 }
  0x86   : > { %p3514_p7 = pneg %p3513_p5  ;;  %p3520_p1 = por %p3519_p2, %p3518_p12 }
  0x88   : > { %p3521_p13 = pnand %p3520_p1, %p3514_p7 }
  0x8a   : > { %3524 = shalt.err (!%p3521_p13)
}
  0x8b   : > { %3197 = dma.hbm_to_vmem [thread:$0]  (!%p3826_p11), %s3822_s13, 8192, %s3824_s27, %s3830_s16, %s3605_s14, %s3605_s14, %s3606_s15  }
  0x8c   : > { %p5391_p9 = scmp.ne.s32.totalorder %s5385_s26, 0 }
  0x8e   : > { %249 = sbr.rel (%p5391_p9) target bundleno = 1245 (0x4dd), region = 40 }
  0x95   : > { %s3864_s29 = sand.u32 1, %s3591_s19   ;;  %p5392_p0 = scmp.ne.s32.totalorder %s5383_s24, 0 }
  0x96   : > { %s2761_s7 = sshll.u32 %s3864_s29, 9  ;;  %s252_s10 = scalar_lea.sflag [#allocation3], %s3864_s29 }
  0x97   : > { %s3870_s6 = scalar_lea.vmem [#allocation2], %s2761_s7 }
  0x98   : > { %3570 = dma.done.wait (%p5392_p0), %s252_s10, 8192  }
  0x99   : > { %3572 = vsyncadd (%p5392_p0), %s252_s10, 4294959104  ;;  %p5393_p11 = scmp.eq.s32.totalorder %s3664_s22, 0 }
  0x9b   : > { %3574 = dma.done.wait (%p5393_p11), [#allocation6], 16448   ;;  %p5394_p6 = pmov %p5393_p11 }
  0x9d   : > { %3576 = vsyncadd (%p5394_p6), [#allocation6], 4294950848  ;;  %p5395_p10 = pmov %p5394_p6 }
  0x9e   : > { %p5396_p3 = pmov %p5394_p6 }
  0x9f   : > { %3578 = dma.done.wait (%p5395_p10), [#allocation9], 16512  }
  0xa0   : > { %3580 = vsyncadd (%p5396_p3), [#allocation9], 4294950784  ;;  %v365_v0 = vld [vmem:[#allocation5 + $0x8] sm:$0xff]  ;;  %v364_v2 = vld [vmem:[#allocation5] sm:$0xff]  ;;  %s5035_s24 = scalar_lea.vmem [#allocation11], %s2761_s7  ;;  %s2776_s26 = sshll.u32 %s3664_s22, 13 }
  0xa1   : > { %v369_v1 = vld [vmem:[#allocation5 + $0x28] sm:$0xff]  ;;  %v368_v4 = vld [vmem:[#allocation5 + $0x20] sm:$0xff]  ;;  %s2638_s14 = sshll.u32 %s5035_s24, 4  ;;  %s5286_s27 = scalar_lea.hbm %s5341_s5, %s2776_s26  ;;  %s5288_s14 = int_to_ptr.vmem [resolvable:$true] %s2638_s14 }
  0xa2   : > { %v2777_v3 = vpack.c.bf16 %v369_v1, %v365_v0  ;;  %v373_v5 = vld [vmem:[#allocation5 + $0x48] sm:$0xff]  ;;  %v2779_v7 = vpack.c.bf16 %v368_v4, %v364_v2  ;;  %v372_v9 = vld [vmem:[#allocation5 + $0x40] sm:$0xff]  ;;  %s2624_s22 = scalar_lea.sflag [#allocation4], %s3864_s29  ;;  %s3525_s16 = scalar_lea.vmem %s5288_s14, 8192 }
  0xa3   : > { %v377_v6 = vld [vmem:[#allocation5 + $0x68] sm:$0xff]  ;;  %v376_v10 = vld [vmem:[#allocation5 + $0x60] sm:$0xff]  ;;  %p3526_p4 = scmp.ne.s32.totalorder %s5288_s14, %s3525_s16  ;;  %s3610_s11 = smov [#allocation11]  }
  0xa4   : > { %v2781_v8 = vpack.c.bf16 %v377_v6, %v373_v5  ;;  %v381_v11 = vld [vmem:[#allocation5 + $0x88] sm:$0xff]  ;;  %2778 = vmatprep.subr.bf16.mxu1 %v2777_v3  ;;  %v2783_v13 = vpack.c.bf16 %v376_v10, %v372_v9  ;;  %v380_v15 = vld [vmem:[#allocation5 + $0x80] sm:$0xff]  ;;  %s3529_s8 = sshll.u32 %s3610_s11, 4  ;;  %s3530_s8 = int_to_ptr.vmem [resolvable:$false] %s3529_s8 }
  0xa5   : > { %v385_v12 = vld [vmem:[#allocation5 + $0xa8] sm:$0xff]  ;;  %2780 = vmatpush1.bf16.msra.mxu1 %v2779_v7  ;;  %v384_v16 = vld [vmem:[#allocation5 + $0xa0] sm:$0xff]  ;;  %p3527_p5 = pnand %p3526_p4, %p3812_p8  ;;  %s3531_s28 = scalar_lea.vmem %s3530_s8, 16384 }
  0xa6   : > { %2782 = vmatprep.subr.bf16.mxu1 %v2781_v8  ;;  %v2785_v14 = vpack.c.bf16 %v385_v12, %v381_v11  ;;  %v389_v17 = vld [vmem:[#allocation5 + $0xc8] sm:$0xff]  ;;  %v2787_v19 = vpack.c.bf16 %v384_v16, %v380_v15  ;;  %v388_v21 = vld [vmem:[#allocation5 + $0xc0] sm:$0xff]  ;;  %p3532_p12 = scmp.lt.s32.totalorder %s5288_s14, %s3530_s8  ;;  %p3533_p2 = scmp.lt.s32.totalorder %s3531_s28, %s3525_s16 }
  0xa7   : > { %v393_v18 = vld [vmem:[#allocation5 + $0xe8] sm:$0xff]  ;;  %v392_v22 = vld [vmem:[#allocation5 + $0xe0] sm:$0xff]  ;;  %p3528_p7 = pneg %p3527_p5 }
  0xa8   : > { %v2789_v20 = vpack.c.bf16 %v393_v18, %v389_v17  ;;  %v397_v23 = vld [vmem:[#allocation5 + $0x108] sm:$0xff]  ;;  %v2791_v25 = vpack.c.bf16 %v392_v22, %v388_v21  ;;  %v396_v27 = vld [vmem:[#allocation5 + $0x100] sm:$0xff]  ;;  %p3534_p1 = por %p3533_p2, %p3532_p12 }
  0xa9   : > { %2784 = vmatpush1.bf16.msra.mxu1 %v2783_v13  ;;  %v401_v24 = vld [vmem:[#allocation5 + $0x128] sm:$0xff]  ;;  %v400_v28 = vld [vmem:[#allocation5 + $0x120] sm:$0xff] }
  0xaa   : > { %2786 = vmatprep.subr.bf16.mxu1 %v2785_v14  ;;  %v2793_v26 = vpack.c.bf16 %v401_v24, %v397_v23  ;;  %v405_v29 = vld [vmem:[#allocation5 + $0x148] sm:$0xff]  ;;  %v2795_v31 = vpack.c.bf16 %v400_v28, %v396_v27  ;;  %v404_v33 = vld [vmem:[#allocation5 + $0x140] sm:$0xff]  ;;  %p3535_p13 = pnand %p3534_p1, %p3528_p7 }
  0xab   : > { %v409_v30 = vld [vmem:[#allocation5 + $0x168] sm:$0xff]  ;;  %v408_v34 = vld [vmem:[#allocation5 + $0x160] sm:$0xff] }
  0xac   : > { %v2797_v32 = vpack.c.bf16 %v409_v30, %v405_v29  ;;  %v413_v35 = vld [vmem:[#allocation5 + $0x188] sm:$0xff]  ;;  %v2799_v37 = vpack.c.bf16 %v408_v34, %v404_v33  ;;  %v412_v39 = vld [vmem:[#allocation5 + $0x180] sm:$0xff]  ;;  %v371_v33 = vld [vmem:[#allocation5 + $0x38] sm:$0xff] }
  0xad   : > { %2788 = vmatpush1.bf16.msra.mxu1 %v2787_v19  ;;  %v417_v36 = vld [vmem:[#allocation5 + $0x1a8] sm:$0xff]  ;;  %v416_v40 = vld [vmem:[#allocation5 + $0x1a0] sm:$0xff] }
  0xae   : > { %2790 = vmatprep.subr.bf16.mxu1 %v2789_v20  ;;  %v2801_v38 = vpack.c.bf16 %v417_v36, %v413_v35  ;;  %v3885_v41 = vld [vmem:[%s3870_s6 + $0x8] sm:$0xff]  ;;  %v2803_v44 = vpack.c.bf16 %v416_v40, %v412_v39  ;;  %v420_v46 = vld [vmem:[#allocation5 + $0x1c0] sm:$0xff]  ;;  %v366_v36 = vld [vmem:[#allocation5 + $0x10] sm:$0xff] }
  0xaf   : > { %v421_v42 = vld [vmem:[#allocation5 + $0x1c8] sm:$0xff]  ;;  %578 = vmatprep.mubr.f32.mxu1 %v3885_v41  ;;  %v424_v47 = vld [vmem:[#allocation5 + $0x1e0] sm:$0xff]  ;;  %v379_v39 = vld [vmem:[#allocation5 + $0x78] sm:$0xff] }
  0xb0   : > { %v425_v43 = vld [vmem:[#allocation5 + $0x1e8] sm:$0xff]  ;;  %v2807_v50 = vpack.c.bf16 %v424_v47, %v420_v46  ;;  %v428_v52 = vld [vmem:[#allocation5 + $0x200] sm:$0xff]  ;;  %v378_v46 = vld [vmem:[#allocation5 + $0x70] sm:$0xff] }
  0xb1   : > { %2792 = vmatpush1.bf16.msra.mxu1 %v2791_v25  ;;  %v2805_v45 = vpack.c.bf16 %v425_v43, %v421_v42  ;;  %v429_v48 = vld [vmem:[#allocation5 + $0x208] sm:$0xff]  ;;  %v432_v53 = vld [vmem:[#allocation5 + $0x220] sm:$0xff]  ;;  %v3892_v43 = vld [vmem:[%s3870_s6 + $0x18] sm:$0xff] }
  0xb2   : > { %2794 = vmatprep.subr.bf16.mxu1 %v2793_v26  ;;  %v433_v49 = vld [vmem:[#allocation5 + $0x228] sm:$0xff]  ;;  %v2811_v56 = vpack.c.bf16 %v432_v53, %v428_v52  ;;  %v436_v58 = vld [vmem:[#allocation5 + $0x240] sm:$0xff]  ;;  %v383_v47 = vld [vmem:[#allocation5 + $0x98] sm:$0xff] }
  0xb3   : > { %v2809_v51 = vpack.c.bf16 %v433_v49, %v429_v48  ;;  %v437_v54 = vld [vmem:[#allocation5 + $0x248] sm:$0xff]  ;;  %v440_v59 = vld [vmem:[#allocation5 + $0x260] sm:$0xff]  ;;  %v387_v48 = vld [vmem:[#allocation5 + $0xb8] sm:$0xff] }
  0xb4   : > { %v441_v55 = vld [vmem:[#allocation5 + $0x268] sm:$0xff]  ;;  %v2815_v62 = vpack.c.bf16 %v440_v59, %v436_v58  ;;  %v444_v0 = vld [vmem:[#allocation5 + $0x280] sm:$0xff]  ;;  %v3897_v49 = vld [vmem:[%s3870_s6 + $0x10] sm:$0xff]  ;;  %v2849_v52 = vpack.c.bf16 %v387_v48, %v383_v47 }
  0xb5   : > { %2796 = vmatpush1.bf16.msra.mxu1 %v2795_v31  ;;  %v2813_v57 = vpack.c.bf16 %v441_v55, %v437_v54  ;;  %v445_v60 = vld [vmem:[#allocation5 + $0x288] sm:$0xff]  ;;  %v448_v1 = vld [vmem:[#allocation5 + $0x2a0] sm:$0xff]  ;;  %v382_v53 = vld [vmem:[#allocation5 + $0x90] sm:$0xff] }
  0xb6   : > { %2798 = vmatprep.subr.bf16.mxu1 %v2797_v32  ;;  %v449_v61 = vld [vmem:[#allocation5 + $0x2a8] sm:$0xff]  ;;  %v2819_v4 = vpack.c.bf16 %v448_v1, %v444_v0  ;;  %v452_v6 = vld [vmem:[#allocation5 + $0x2c0] sm:$0xff]  ;;  %v367_v32 = vld [vmem:[#allocation5 + $0x18] sm:$0xff] }
  0xb7   : > { %v2817_v63 = vpack.c.bf16 %v449_v61, %v445_v60  ;;  %v453_v2 = vld [vmem:[#allocation5 + $0x2c8] sm:$0xff]  ;;  %v456_v7 = vld [vmem:[#allocation5 + $0x2e0] sm:$0xff]  ;;  %v2841_v35 = vpack.c.bf16 %v371_v33, %v367_v32  ;;  %v386_v54 = vld [vmem:[#allocation5 + $0xb0] sm:$0xff] }
  0xb8   : > { %v457_v3 = vld [vmem:[#allocation5 + $0x2e8] sm:$0xff]  ;;  %v2823_v10 = vpack.c.bf16 %v456_v7, %v452_v6  ;;  %v460_v12 = vld [vmem:[#allocation5 + $0x300] sm:$0xff]  ;;  %v391_v55 = vld [vmem:[#allocation5 + $0xd8] sm:$0xff]  ;;  %v2851_v58 = vpack.c.bf16 %v386_v54, %v382_v53 }
  0xb9   : > { %2800 = vmatpush1.bf16.msra.mxu1 %v2799_v37  ;;  %v2821_v5 = vpack.c.bf16 %v457_v3, %v453_v2  ;;  %v461_v8 = vld [vmem:[#allocation5 + $0x308] sm:$0xff]  ;;  %v464_v13 = vld [vmem:[#allocation5 + $0x320] sm:$0xff]  ;;  %v370_v37 = vld [vmem:[#allocation5 + $0x30] sm:$0xff] }
  0xba   : > { %2802 = vmatprep.subr.bf16.mxu1 %v2801_v38  ;;  %v465_v9 = vld [vmem:[#allocation5 + $0x328] sm:$0xff]  ;;  %v2827_v16 = vpack.c.bf16 %v464_v13, %v460_v12  ;;  %v468_v18 = vld [vmem:[#allocation5 + $0x340] sm:$0xff]  ;;  %v375_v38 = vld [vmem:[#allocation5 + $0x58] sm:$0xff]  ;;  %v2843_v42 = vpack.c.bf16 %v370_v37, %v366_v36 }
  0xbb   : > { %v2825_v11 = vpack.c.bf16 %v465_v9, %v461_v8  ;;  %v469_v14 = vld [vmem:[#allocation5 + $0x348] sm:$0xff]  ;;  %v472_v19 = vld [vmem:[#allocation5 + $0x360] sm:$0xff]  ;;  %v3908_v59 = vld [vmem:[%s3870_s6 + $0x38] sm:$0xff] }
  0xbc   : > { %v473_v15 = vld [vmem:[#allocation5 + $0x368] sm:$0xff]  ;;  %v2831_v22 = vpack.c.bf16 %v472_v19, %v468_v18  ;;  %v476_v24 = vld [vmem:[#allocation5 + $0x380] sm:$0xff]  ;;  %v390_v61 = vld [vmem:[#allocation5 + $0xd0] sm:$0xff] }
  0xbd   : > { %2804 = vmatpush1.bf16.msra.mxu1 %v2803_v44  ;;  %v2829_v17 = vpack.c.bf16 %v473_v15, %v469_v14  ;;  %v477_v20 = vld [vmem:[#allocation5 + $0x388] sm:$0xff]  ;;  %v480_v25 = vld [vmem:[#allocation5 + $0x3a0] sm:$0xff]  ;;  %v2845_v44 = vpack.c.bf16 %v379_v39, %v375_v38  ;;  %v403_v0 = vld [vmem:[#allocation5 + $0x138] sm:$0xff] }
  0xbe   : > { %2806 = vmatprep.subr.bf16.mxu1 %v2805_v45  ;;  %v481_v21 = vld [vmem:[#allocation5 + $0x3a8] sm:$0xff]  ;;  %v2835_v28 = vpack.c.bf16 %v480_v25, %v476_v24  ;;  %v484_v30 = vld [vmem:[#allocation5 + $0x3c0] sm:$0xff]  ;;  %v374_v45 = vld [vmem:[#allocation5 + $0x50] sm:$0xff] }
  0xbf   : > { %v2833_v23 = vpack.c.bf16 %v481_v21, %v477_v20  ;;  %v485_v26 = vld [vmem:[#allocation5 + $0x3c8] sm:$0xff]  ;;  %v488_v31 = vld [vmem:[#allocation5 + $0x3e0] sm:$0xff]  ;;  %v3913_v1 = vld [vmem:[%s3870_s6 + $0x30] sm:$0xff] }
  0xc0   : > { %v489_v27 = vld [vmem:[#allocation5 + $0x3e8] sm:$0xff]  ;;  %v2839_v34 = vpack.c.bf16 %v488_v31, %v484_v30  ;;  %v3889_v40 = vld [vmem:[%s3870_s6] sm:$0xff]  ;;  %v402_v6 = vld [vmem:[#allocation5 + $0x130] sm:$0xff] }
  0xc1   : > { %2808 = vmatpush1.bf16.msra.mxu1 %v2807_v50  ;;  %v2837_v29 = vpack.c.bf16 %v489_v27, %v485_v26  ;;  %v2847_v50 = vpack.c.bf16 %v378_v46, %v374_v45  ;;  %v3916_v3 = vld [vmem:[%s3870_s6 + $0x48] sm:$0xff]  ;;  %v407_v7 = vld [vmem:[#allocation5 + $0x158] sm:$0xff]  ;;  %v3921_v9 = vld [vmem:[%s3870_s6 + $0x40] sm:$0xff] }
  0xc2   : > { %2810 = vmatprep.subr.bf16.mxu1 %v2809_v51  ;;  %v3900_v51 = vld [vmem:[%s3870_s6 + $0x28] sm:$0xff]  ;;  %v411_v8 = vld [vmem:[#allocation5 + $0x178] sm:$0xff]  ;;  %v406_v13 = vld [vmem:[#allocation5 + $0x150] sm:$0xff] }
  0xc3   : > { %v2861_v12 = vpack.c.bf16 %v411_v8, %v407_v7  ;;  %v410_v14 = vld [vmem:[#allocation5 + $0x170] sm:$0xff]  ;;  %v415_v15 = vld [vmem:[#allocation5 + $0x198] sm:$0xff]  ;;  %v3932_v19 = vld [vmem:[%s3870_s6 + $0x68] sm:$0xff] }
  0xc4   : > { %v2863_v18 = vpack.c.bf16 %v410_v14, %v406_v13  ;;  %v414_v21 = vld [vmem:[#allocation5 + $0x190] sm:$0xff]  ;;  %v427_v24 = vld [vmem:[#allocation5 + $0x1f8] sm:$0xff]  ;;  %v3937_v25 = vld [vmem:[%s3870_s6 + $0x60] sm:$0xff] }
  0xc5   : > { %2812 = vmatpush1.bf16.msra.mxu1 %v2811_v56  ;;  %v395_v56 = vld [vmem:[#allocation5 + $0xf8] sm:$0xff]  ;;  %v426_v30 = vld [vmem:[#allocation5 + $0x1f0] sm:$0xff]  ;;  %v1156_v36 = vld [vmem:[#allocation8] sm:$0xff] }
  0xc6   : > { %2814 = vmatprep.subr.bf16.mxu1 %v2813_v57  ;;  %v3905_v57 = vld [vmem:[%s3870_s6 + $0x20] sm:$0xff]  ;;  %v2853_v60 = vpack.c.bf16 %v395_v56, %v391_v55  ;;  %v3940_v26 = vld [vmem:[%s3870_s6 + $0x78] sm:$0xff]  ;;  %v1157_v33 = vld [vmem:[#allocation8 + $0x8] sm:$0xff] }
  0xc7   : > { %v431_v31 = vld [vmem:[#allocation5 + $0x218] sm:$0xff]  ;;  %v3945_v38 = vld [vmem:[%s3870_s6 + $0x70] sm:$0xff]  ;;  %v3948_v39 = vld [vmem:[%s3870_s6 + $0x88] sm:$0xff] }
  0xc8   : > { %v435_v32 = vld [vmem:[#allocation5 + $0x238] sm:$0xff]  ;;  %v430_v46 = vld [vmem:[#allocation5 + $0x210] sm:$0xff]  ;;  %v1160_v55 = vld [vmem:[#allocation8 + $0x20] sm:$0xff] }
  0xc9   : > { %2816 = vmatpush1.bf16.msra.mxu1 %v2815_v62  ;;  %v394_v62 = vld [vmem:[#allocation5 + $0xf0] sm:$0xff]  ;;  %v2873_v45 = vpack.c.bf16 %v435_v32, %v431_v31  ;;  %v439_v48 = vld [vmem:[#allocation5 + $0x258] sm:$0xff]  ;;  %v3964_v14 = vld [vmem:[%s3870_s6 + $0xa8] sm:$0xff] }
  0xca   : > { %2818 = vmatprep.subr.bf16.mxu1 %v2817_v63  ;;  %v399_v63 = vld [vmem:[#allocation5 + $0x118] sm:$0xff]  ;;  %v2855_v2 = vpack.c.bf16 %v394_v62, %v390_v61  ;;  %v434_v47 = vld [vmem:[#allocation5 + $0x230] sm:$0xff]  ;;  %v3969_v31 = vld [vmem:[%s3870_s6 + $0xa0] sm:$0xff] }
  0xcb   : > { %v1158_v37 = vld [vmem:[#allocation8 + $0x10] sm:$0xff]  ;;  %v1163_v53 = vld [vmem:[#allocation8 + $0x38] sm:$0xff]  ;;  %v2875_v61 = vpack.c.bf16 %v434_v47, %v430_v46 }
  0xcc   : > { %v1162_v56 = vld [vmem:[#allocation8 + $0x30] sm:$0xff]  ;;  %v1167_v7 = vld [vmem:[#allocation8 + $0x58] sm:$0xff] }
  0xcd   : > { %2820 = vmatpush1.bf16.msra.mxu1 %v2819_v4  ;;  %v2857_v4 = vpack.c.bf16 %v403_v0, %v399_v63  ;;  %v2911_v62 = vpack.c.bf16 %v1162_v56, %v1160_v55  ;;  %v438_v0 = vld [vmem:[#allocation5 + $0x250] sm:$0xff]  ;;  %v3972_v32 = vld [vmem:[%s3870_s6 + $0xb8] sm:$0xff] }
  0xce   : > { %2822 = vmatprep.subr.bf16.mxu1 %v2821_v5  ;;  %v398_v5 = vld [vmem:[#allocation5 + $0x110] sm:$0xff]  ;;  %v1175_v46 = vld [vmem:[#allocation8 + $0x98] sm:$0xff] }
  0xcf   : > { %v3961_v13 = vld [vmem:[%s3870_s6 + $0x90] sm:$0xff] }
  0xd1   : > { %2824 = vmatpush1.bf16.msra.mxu1 %v2823_v10  ;;  %v2859_v10 = vpack.c.bf16 %v402_v6, %v398_v5  ;;  %v451_v5 = vld [vmem:[#allocation5 + $0x2b8] sm:$0xff]  ;;  %v1165_v6 = vld [vmem:[#allocation8 + $0x48] sm:$0xff] }
  0xd2   : > { %2826 = vmatprep.subr.bf16.mxu1 %v2825_v11  ;;  %v3924_v11 = vld [vmem:[%s3870_s6 + $0x58] sm:$0xff]  ;;  %v2913_v8 = vpack.c.bf16 %v1167_v7, %v1165_v6  ;;  %v1176_v6 = vld [vmem:[#allocation8 + $0xa0] sm:$0xff] }
  0xd3   : > { %v1178_v7 = vld [vmem:[#allocation8 + $0xb0] sm:$0xff] }
  0xd5   : > { %2828 = vmatpush1.bf16.msra.mxu1 %v2827_v16  ;;  %v419_v16 = vld [vmem:[#allocation5 + $0x1b8] sm:$0xff] }
  0xd6   : > { %2830 = vmatprep.subr.bf16.mxu1 %v2829_v17  ;;  %v3929_v17 = vld [vmem:[%s3870_s6 + $0x50] sm:$0xff]  ;;  %v2865_v20 = vpack.c.bf16 %v419_v16, %v415_v15 }
  0xd9   : > { %2832 = vmatpush1.bf16.msra.mxu1 %v2831_v22  ;;  %v418_v22 = vld [vmem:[#allocation5 + $0x1b0] sm:$0xff] }
  0xda   : > { %2834 = vmatprep.subr.bf16.mxu1 %v2833_v23  ;;  %v423_v23 = vld [vmem:[#allocation5 + $0x1d8] sm:$0xff]  ;;  %v2867_v27 = vpack.c.bf16 %v418_v22, %v414_v21  ;;  %v450_v21 = vld [vmem:[#allocation5 + $0x2b0] sm:$0xff] }
  0xdb   : > { %v455_v22 = vld [vmem:[#allocation5 + $0x2d8] sm:$0xff] }
  0xdd   : > { %2836 = vmatpush1.bf16.msra.mxu1 %v2835_v28  ;;  %v2869_v28 = vpack.c.bf16 %v427_v24, %v423_v23  ;;  %v459_v23 = vld [vmem:[#allocation5 + $0x2f8] sm:$0xff]  ;;  %v1169_v24 = vld [vmem:[#allocation8 + $0x68] sm:$0xff] }
  0xde   : > { %2838 = vmatprep.subr.bf16.mxu1 %v2837_v29  ;;  %v422_v29 = vld [vmem:[#allocation5 + $0x1d0] sm:$0xff] }
  0xe1   : > { %2840 = vmatpush1.bf16.msra.mxu1 %v2839_v34  ;;  %v1159_v34 = vld [vmem:[#allocation8 + $0x18] sm:$0xff] }
  0xe2   : > { %2842 = vmatprep.subr.bf16.mxu1 %v2841_v35  ;;  %v2905_v35 = vpack.c.bf16 %v1159_v34, %v1157_v33 }
  0xe4   : > { %579 = vmatmul.mubr.f32.vlgmr.msra.gmra.mrb[0].mxu1 %v3889_v40  ;;  %2906 = vmatprep.subr.bf16.mxu0 %v2905_v35  ;;  %v2885_v35 = vpack.c.bf16 %v459_v23, %v455_v22  ;;  %v483_v22 = vld [vmem:[#allocation5 + $0x3b8] sm:$0xff]  ;;  %v1181_v23 = vld [vmem:[#allocation8 + $0xc8] sm:$0xff] }
  0xe5   : > { %2844 = vmatpush1.bf16.msra.mxu1 %v2843_v42  ;;  %584 = vmatprep.mubr.f32.mxu1 %v3892_v43  ;;  %v2871_v42 = vpack.c.bf16 %v426_v30, %v422_v29  ;;  %v1168_v29 = vld [vmem:[#allocation8 + $0x60] sm:$0xff]  ;;  %v1170_v30 = vld [vmem:[#allocation8 + $0x70] sm:$0xff] }
  0xe6   : > { %2846 = vmatprep.subr.bf16.mxu1 %v2845_v44  ;;  %v2907_v44 = vpack.c.bf16 %v1158_v37, %v1156_v36  ;;  %v2919_v34 = vpack.c.bf16 %v1170_v30, %v1168_v29  ;;  %v454_v36 = vld [vmem:[#allocation5 + $0x2d0] sm:$0xff] }
  0xe7   : > { %v458_v37 = vld [vmem:[#allocation5 + $0x2f0] sm:$0xff] }
  0xe8   : > { %585 = vmatmul.mubr.f32.gmra.mrb[2].mxu1 %v3897_v49  ;;  %2908 = vmatpush1.bf16.msra.mxu0 %v2907_v44  ;;  %v467_v44 = vld [vmem:[#allocation5 + $0x338] sm:$0xff]  ;;  %v3993_v30 = vld [vmem:[%s3870_s6 + $0xd0] sm:$0xff] }
  0xe9   : > { %590 = vmatprep.mubr.f32.mxu1 %v3900_v51  ;;  %2848 = vmatpush1.bf16.msra.mxu1 %v2847_v50  ;;  %v443_v50 = vld [vmem:[#allocation5 + $0x278] sm:$0xff] }
  0xea   : > { %2850 = vmatprep.subr.bf16.mxu1 %v2849_v52  ;;  %v1161_v52 = vld [vmem:[#allocation8 + $0x28] sm:$0xff]  ;;  %v2877_v63 = vpack.c.bf16 %v443_v50, %v439_v48  ;;  %v1172_v48 = vld [vmem:[#allocation8 + $0x80] sm:$0xff]  ;;  %v1174_v50 = vld [vmem:[#allocation8 + $0x90] sm:$0xff] }
  0xeb   : > { %v2909_v54 = vpack.c.bf16 %v1163_v53, %v1161_v52  ;;  %v3977_v52 = vld [vmem:[%s3870_s6 + $0xb0] sm:$0xff]  ;;  %v3980_v53 = vld [vmem:[%s3870_s6 + $0xc8] sm:$0xff]  ;;  %v2923_v55 = vpack.c.bf16 %v1174_v50, %v1172_v48 }
  0xec   : > { %591 = vmatmul.mubr.f32.gmra.mrb[4].mxu1 %v3905_v57  ;;  %v1182_v29 = vld [vmem:[#allocation8 + $0xd0] sm:$0xff]  ;;  %v1184_v50 = vld [vmem:[#allocation8 + $0xe0] sm:$0xff] }
  0xed   : > { %596 = vmatprep.mubr.f32.mxu1 %v3908_v59  ;;  %2852 = vmatpush1.bf16.msra.mxu1 %v2851_v58  ;;  %v3953_v58 = vld [vmem:[%s3870_s6 + $0x80] sm:$0xff] }
  0xee   : > { %2854 = vmatprep.subr.bf16.mxu1 %v2853_v60  ;;  %v3956_v60 = vld [vmem:[%s3870_s6 + $0x98] sm:$0xff]  ;;  %2910 = vmatprep.subr.bf16.mxu0 %v2909_v54  ;;  %v2887_v54 = vpack.c.bf16 %v458_v37, %v454_v36  ;;  %v478_v37 = vld [vmem:[#allocation5 + $0x390] sm:$0xff] }
  0xef   : > { %2912 = vmatpush1.bf16.msra.mxu0 %v2911_v62  ;;  %v466_v62 = vld [vmem:[#allocation5 + $0x330] sm:$0xff] }
  0xf0   : > { %597 = vmatmul.mubr.f32.gmra.mrb[6].mxu1 %v3913_v1  ;;  %2914 = vmatprep.subr.bf16.mxu0 %v2913_v8  ;;  %v3985_v8 = vld [vmem:[%s3870_s6 + $0xc0] sm:$0xff] }
  0xf1   : > { %602 = vmatprep.mubr.f32.mxu1 %v3916_v3  ;;  %2856 = vmatpush1.bf16.msra.mxu1 %v2855_v2  ;;  %v442_v2 = vld [vmem:[#allocation5 + $0x270] sm:$0xff] }
  0xf2   : > { %2858 = vmatprep.subr.bf16.mxu1 %v2857_v4  ;;  %v447_v4 = vld [vmem:[#allocation5 + $0x298] sm:$0xff]  ;;  %v2879_v15 = vpack.c.bf16 %v442_v2, %v438_v0  ;;  %v1177_v2 = vld [vmem:[#allocation8 + $0xa8] sm:$0xff] }
  0xf3   : > { %v475_v0 = vld [vmem:[#allocation5 + $0x378] sm:$0xff] }
  0xf4   : > { %603 = vmatmul.mubr.f32.gmra.mrb[8].mxu1 %v3921_v9 }
  0xf5   : > { %608 = vmatprep.mubr.f32.mxu1 %v3924_v11  ;;  %2860 = vmatpush1.bf16.msra.mxu1 %v2859_v10  ;;  %v1164_v10 = vld [vmem:[#allocation8 + $0x40] sm:$0xff] }
  0xf6   : > { %2862 = vmatprep.subr.bf16.mxu1 %v2861_v12  ;;  %v1166_v12 = vld [vmem:[#allocation8 + $0x50] sm:$0xff] }
  0xf7   : > { %v2915_v16 = vpack.c.bf16 %v1166_v12, %v1164_v10  ;;  %v3988_v10 = vld [vmem:[%s3870_s6 + $0xd8] sm:$0xff] }
  0xf8   : > { %609 = vmatmul.mubr.f32.gmra.mrb[10].mxu1 %v3929_v17 }
  0xf9   : > { %614 = vmatprep.mubr.f32.mxu1 %v3932_v19  ;;  %2864 = vmatpush1.bf16.msra.mxu1 %v2863_v18  ;;  %v2881_v18 = vpack.c.bf16 %v451_v5, %v447_v4  ;;  %v1179_v4 = vld [vmem:[#allocation8 + $0xb8] sm:$0xff] }
  0xfa   : > { %2866 = vmatprep.subr.bf16.mxu1 %v2865_v20  ;;  %v446_v20 = vld [vmem:[#allocation5 + $0x290] sm:$0xff]  ;;  %2916 = vmatpush1.bf16.msra.mxu0 %v2915_v16  ;;  %v2925_v5 = vpack.c.bf16 %v1179_v4, %v1177_v2 }
  0xfb   : > { %v2883_v33 = vpack.c.bf16 %v450_v21, %v446_v20  ;;  %v474_v20 = vld [vmem:[#allocation5 + $0x370] sm:$0xff]  ;;  %v479_v21 = vld [vmem:[#allocation5 + $0x398] sm:$0xff] }
  0xfc   : > { %615 = vmatmul.mubr.f32.gmra.mrb[12].mxu1 %v3937_v25  ;;  %v2897_v36 = vpack.c.bf16 %v483_v22, %v479_v21  ;;  %v490_v2 = vld [vmem:[#allocation5 + $0x3f0] sm:$0xff]  ;;  %v1195_v22 = vld [vmem:[#allocation8 + $0x138] sm:$0xff] }
  0xfd   : > { %620 = vmatprep.mubr.f32.mxu1 %v3940_v26  ;;  %2868 = vmatpush1.bf16.msra.mxu1 %v2867_v27  ;;  %v1171_v27 = vld [vmem:[#allocation8 + $0x78] sm:$0xff]  ;;  %v1189_v4 = vld [vmem:[#allocation8 + $0x108] sm:$0xff] }
  0xfe   : > { %2870 = vmatprep.subr.bf16.mxu1 %v2869_v28  ;;  %v2917_v28 = vpack.c.bf16 %v1171_v27, %v1169_v24  ;;  %v1183_v24 = vld [vmem:[#allocation8 + $0xd8] sm:$0xff]  ;;  %v1193_v21 = vld [vmem:[#allocation8 + $0x128] sm:$0xff] }
  0xff   : > { %v2929_v27 = vpack.c.bf16 %v1183_v24, %v1181_v23  ;;  %v2941_v23 = vpack.c.bf16 %v1195_v22, %v1193_v21  ;;  %v1192_v24 = vld [vmem:[#allocation8 + $0x120] sm:$0xff]  ;;  %v1209_v22 = vld [vmem:[#allocation8 + $0x1a8] sm:$0xff] }
 0x100   : > { %621 = vmatmul.mubr.f32.gmra.mrb[14].mxu1 %v3945_v38  ;;  %2918 = vmatprep.subr.bf16.mxu0 %v2917_v28  ;;  %v1180_v28 = vld [vmem:[#allocation8 + $0xc0] sm:$0xff] }
 0x101   : > { %626 = vmatprep.mubr.f32.mxu1 %v3948_v39  ;;  %2872 = vmatpush1.bf16.msra.mxu1 %v2871_v42  ;;  %v463_v42 = vld [vmem:[#allocation5 + $0x318] sm:$0xff]  ;;  %v4044_v21 = vld [vmem:[%s3870_s6 + $0x148] sm:$0xff] }
 0x102   : > { %2874 = vmatprep.subr.bf16.mxu1 %v2873_v45  ;;  %2920 = vmatpush1.bf16.msra.mxu0 %v2919_v34  ;;  %v1173_v45 = vld [vmem:[#allocation8 + $0x88] sm:$0xff]  ;;  %v2889_v56 = vpack.c.bf16 %v467_v44, %v463_v42  ;;  %v487_v44 = vld [vmem:[#allocation5 + $0x3d8] sm:$0xff] }
 0x103   : > { %v2921_v47 = vpack.c.bf16 %v1175_v46, %v1173_v45  ;;  %v482_v42 = vld [vmem:[#allocation5 + $0x3b0] sm:$0xff]  ;;  %v491_v45 = vld [vmem:[#allocation5 + $0x3f8] sm:$0xff] }
 0x104   : > { %627 = vmatmul.mubr.f32.gmra.mrb[16].mxu1 %v3953_v58  ;;  %v1185_v46 = vld [vmem:[#allocation8 + $0xe8] sm:$0xff] }
 0x105   : > { %632 = vmatprep.mubr.f32.mxu1 %v3956_v60  ;;  %2876 = vmatpush1.bf16.msra.mxu1 %v2875_v61  ;;  %v462_v61 = vld [vmem:[#allocation5 + $0x310] sm:$0xff] }
 0x106   : > { %2878 = vmatprep.subr.bf16.mxu1 %v2877_v63  ;;  %v471_v63 = vld [vmem:[#allocation5 + $0x358] sm:$0xff]  ;;  %2922 = vmatprep.subr.bf16.mxu0 %v2921_v47  ;;  %v2891_v12 = vpack.c.bf16 %v466_v62, %v462_v61 }
 0x107   : > { %2924 = vmatpush1.bf16.msra.mxu0 %v2923_v55  ;;  %v2893_v16 = vpack.c.bf16 %v475_v0, %v471_v63  ;;  %v1187_v47 = vld [vmem:[#allocation8 + $0xf8] sm:$0xff]  ;;  %v2901_v63 = vpack.c.bf16 %v491_v45, %v487_v44  ;;  %v486_v0 = vld [vmem:[#allocation5 + $0x3d0] sm:$0xff] }
 0x108   : > { %633 = vmatmul.mubr.f32.gmra.mrb[18].mxu1 %v3961_v13  ;;  %2926 = vmatprep.subr.bf16.mxu0 %v2925_v5  ;;  %v2933_v48 = vpack.c.bf16 %v1187_v47, %v1185_v46  ;;  %v4001_v55 = vld [vmem:[%s3870_s6 + $0xe0] sm:$0xff]  ;;  %v4004_v62 = vld [vmem:[%s3870_s6 + $0xf8] sm:$0xff]  ;;  %v4025_v45 = vld [vmem:[%s3870_s6 + $0x110] sm:$0xff] }
 0x109   : > { %638 = vmatprep.mubr.f32.mxu1 %v3964_v14  ;;  %2880 = vmatpush1.bf16.msra.mxu1 %v2879_v15  ;;  %v2927_v15 = vpack.c.bf16 %v1178_v7, %v1176_v6  ;;  %v1191_v5 = vld [vmem:[#allocation8 + $0x118] sm:$0xff]  ;;  %v1188_v7 = vld [vmem:[#allocation8 + $0x100] sm:$0xff]  ;;  %v1198_v44 = vld [vmem:[#allocation8 + $0x150] sm:$0xff] }
 0x10a   : > { %2882 = vmatprep.subr.bf16.mxu1 %v2881_v18  ;;  %v470_v18 = vld [vmem:[#allocation5 + $0x350] sm:$0xff]  ;;  %v2937_v6 = vpack.c.bf16 %v1191_v5, %v1189_v4  ;;  %v4028_v47 = vld [vmem:[%s3870_s6 + $0x128] sm:$0xff]  ;;  %v1207_v5 = vld [vmem:[#allocation8 + $0x198] sm:$0xff] }
 0x10b   : > { %2928 = vmatpush1.bf16.msra.mxu0 %v2927_v15  ;;  %v2895_v34 = vpack.c.bf16 %v474_v20, %v470_v18  ;;  %v4009_v15 = vld [vmem:[%s3870_s6 + $0xf0] sm:$0xff]  ;;  %v4012_v20 = vld [vmem:[%s3870_s6 + $0x108] sm:$0xff] }
 0x10c   : > { %639 = vmatmul.mubr.f32.gmra.mrb[20].mxu1 %v3969_v31  ;;  %2930 = vmatprep.subr.bf16.mxu0 %v2929_v27  ;;  %v1194_v27 = vld [vmem:[#allocation8 + $0x130] sm:$0xff]  ;;  %v1205_v4 = vld [vmem:[#allocation8 + $0x188] sm:$0xff] }
 0x10d   : > { %644 = vmatprep.mubr.f32.mxu1 %v3972_v32  ;;  %2884 = vmatpush1.bf16.msra.mxu1 %v2883_v33  ;;  %v3996_v33 = vld [vmem:[%s3870_s6 + $0xe8] sm:$0xff] }
 0x10e   : > { %2886 = vmatprep.subr.bf16.mxu1 %v2885_v35  ;;  %v2931_v35 = vpack.c.bf16 %v1182_v29, %v1180_v28  ;;  %v4017_v28 = vld [vmem:[%s3870_s6 + $0x100] sm:$0xff]  ;;  %v2943_v29 = vpack.c.bf16 %v1194_v27, %v1192_v24 }
 0x10f   : > { %v1208_v27 = vld [vmem:[#allocation8 + $0x1a0] sm:$0xff] }
 0x110   : > { %645 = vmatmul.mubr.f32.gmra.mrb[22].mxu1 %v3977_v52  ;;  %2932 = vmatpush1.bf16.msra.mxu0 %v2931_v35  ;;  %v1197_v35 = vld [vmem:[#allocation8 + $0x148] sm:$0xff] }
 0x111   : > { %650 = vmatprep.mubr.f32.mxu1 %v3980_v53  ;;  %2888 = vmatpush1.bf16.msra.mxu1 %v2887_v54  ;;  %v1186_v54 = vld [vmem:[#allocation8 + $0xf0] sm:$0xff] }
 0x112   : > { %2890 = vmatprep.subr.bf16.mxu1 %v2889_v56  ;;  %v2899_v56 = vpack.c.bf16 %v482_v42, %v478_v37  ;;  %v2935_v61 = vpack.c.bf16 %v1186_v54, %v1184_v50  ;;  %2934 = vmatprep.subr.bf16.mxu0 %v2933_v48  ;;  %v1196_v42 = vld [vmem:[#allocation8 + $0x140] sm:$0xff]  ;;  %v1201_v48 = vld [vmem:[#allocation8 + $0x168] sm:$0xff]  ;;  %v1203_v50 = vld [vmem:[#allocation8 + $0x178] sm:$0xff] }
 0x113   : > { %v2947_v46 = vpack.c.bf16 %v1198_v44, %v1196_v42  ;;  %v2949_v54 = vpack.c.bf16 %v1203_v50, %v1201_v48  ;;  %v1213_v42 = vld [vmem:[#allocation8 + $0x1c8] sm:$0xff]  ;;  %v1215_v44 = vld [vmem:[#allocation8 + $0x1d8] sm:$0xff]  ;;  %v1212_v48 = vld [vmem:[#allocation8 + $0x1c0] sm:$0xff] }
 0x114   : > { %651 = vmatmul.mubr.f32.gmra.mrb[24].mxu1 %v3985_v8  ;;  %2936 = vmatpush1.bf16.msra.mxu0 %v2935_v61  ;;  %v1202_v61 = vld [vmem:[#allocation8 + $0x170] sm:$0xff] }
 0x115   : > { %656 = vmatprep.mubr.f32.mxu1 %v3988_v10  ;;  %2892 = vmatpush1.bf16.msra.mxu1 %v2891_v12  ;;  %v1190_v12 = vld [vmem:[#allocation8 + $0x110] sm:$0xff] }
 0x116   : > { %2894 = vmatprep.subr.bf16.mxu1 %v2893_v16  ;;  %v2903_v16 = vpack.c.bf16 %v490_v2, %v486_v0  ;;  %v2939_v18 = vpack.c.bf16 %v1190_v12, %v1188_v7  ;;  %2938 = vmatprep.subr.bf16.mxu0 %v2937_v6  ;;  %v4036_v2 = vld [vmem:[%s3870_s6 + $0x138] sm:$0xff]  ;;  %v2953_v6 = vpack.c.bf16 %v1207_v5, %v1205_v4  ;;  %v1204_v7 = vld [vmem:[#allocation8 + $0x180] sm:$0xff] }
 0x117   : > { %v1206_v12 = vld [vmem:[#allocation8 + $0x190] sm:$0xff]  ;;  %v1219_v4 = vld [vmem:[#allocation8 + $0x1f8] sm:$0xff] }
 0x118   : > { %657 = vmatmul.mubr.f32.gmra.mrb[26].mxu1 %v3993_v30  ;;  %2940 = vmatpush1.bf16.msra.mxu0 %v2939_v18  ;;  %v2955_v18 = vpack.c.bf16 %v1206_v12, %v1204_v7  ;;  %v1214_v50 = vld [vmem:[#allocation8 + $0x1d0] sm:$0xff]  ;;  %v4065_v12 = vld [vmem:[%s3870_s6 + $0x160] sm:$0xff] }
 0x119   : > { %662 = vmatprep.mubr.f32.mxu1 %v3996_v33  ;;  %2896 = vmatpush1.bf16.msra.mxu1 %v2895_v34  ;;  %v4020_v34 = vld [vmem:[%s3870_s6 + $0x118] sm:$0xff] }
 0x11a   : > { %2898 = vmatprep.subr.bf16.mxu1 %v2897_v36  ;;  %2942 = vmatprep.subr.bf16.mxu0 %v2941_v23  ;;  %v1199_v36 = vld [vmem:[#allocation8 + $0x158] sm:$0xff]  ;;  %v1218_v7 = vld [vmem:[#allocation8 + $0x1f0] sm:$0xff] }
 0x11b   : > { %v2945_v37 = vpack.c.bf16 %v1199_v36, %v1197_v35  ;;  %v1211_v23 = vld [vmem:[#allocation8 + $0x1b8] sm:$0xff] }
 0x11c   : > { %663 = vmatmul.mubr.f32.gmra.mrb[28].mxu1 %v4001_v55  ;;  %2944 = vmatpush1.bf16.msra.mxu0 %v2943_v29  ;;  %v2957_v24 = vpack.c.bf16 %v1211_v23, %v1209_v22  ;;  %v1210_v29 = vld [vmem:[#allocation8 + $0x1b0] sm:$0xff]  ;;  %v4049_v35 = vld [vmem:[%s3870_s6 + $0x140] sm:$0xff] }
 0x11d   : > { %668 = vmatprep.mubr.f32.mxu1 %v4004_v62  ;;  %2900 = vmatpush1.bf16.msra.mxu1 %v2899_v56  ;;  %v1200_v56 = vld [vmem:[#allocation8 + $0x160] sm:$0xff]  ;;  %v2959_v36 = vpack.c.bf16 %v1210_v29, %v1208_v27  ;;  %v4068_v22 = vld [vmem:[%s3870_s6 + $0x178] sm:$0xff]  ;;  %v4073_v23 = vld [vmem:[%s3870_s6 + $0x170] sm:$0xff] }
 0x11e   : > { %2902 = vmatprep.subr.bf16.mxu1 %v2901_v63  ;;  %2946 = vmatprep.subr.bf16.mxu0 %v2945_v37  ;;  %v4033_v63 = vld [vmem:[%s3870_s6 + $0x120] sm:$0xff]  ;;  %v2951_v0 = vpack.c.bf16 %v1202_v61, %v1200_v56  ;;  %v4052_v37 = vld [vmem:[%s3870_s6 + $0x158] sm:$0xff]  ;;  %v2963_v56 = vpack.c.bf16 %v1214_v50, %v1212_v48  ;;  %v4060_v61 = vld [vmem:[%s3870_s6 + $0x168] sm:$0xff] }
 0x11f   : > { %v1221_v27 = vld [vmem:[#allocation8 + $0x208] sm:$0xff]  ;;  %v1223_v29 = vld [vmem:[#allocation8 + $0x218] sm:$0xff] }
 0x120   : > { %669 = vmatmul.mubr.f32.gmra.mrb[30].mxu1 %v4009_v15  ;;  %2948 = vmatpush1.bf16.msra.mxu0 %v2947_v46  ;;  %v2961_v46 = vpack.c.bf16 %v1215_v44, %v1213_v42  ;;  %v4081_v42 = vld [vmem:[%s3870_s6 + $0x180] sm:$0xff]  ;;  %v4084_v44 = vld [vmem:[%s3870_s6 + $0x198] sm:$0xff]  ;;  %v4092_v48 = vld [vmem:[%s3870_s6 + $0x1a8] sm:$0xff] }
 0x121   : > { %674 = vmatprep.mubr.f32.mxu1 %v4012_v20  ;;  %2904 = vmatpush1.bf16.msra.mxu1 %v2903_v16  ;;  %v4041_v16 = vld [vmem:[%s3870_s6 + $0x130] sm:$0xff]  ;;  %v4097_v50 = vld [vmem:[%s3870_s6 + $0x1a0] sm:$0xff] }
 0x122   : > { %2950 = vmatprep.subr.bf16.mxu0 %v2949_v54  ;;  %v4057_v54 = vld [vmem:[%s3870_s6 + $0x150] sm:$0xff] }
 0x124   : > { %675 = vmatmul.mubr.f32.gmra.mrb[32].mxu1 %v4017_v28  ;;  %2952 = vmatpush1.bf16.msra.mxu0 %v2951_v0  ;;  %v1217_v0 = vld [vmem:[#allocation8 + $0x1e8] sm:$0xff] }
 0x125   : > { %680 = vmatprep.mubr.f32.mxu1 %v4020_v34  ;;  %2954 = vmatprep.subr.bf16.mxu0 %v2953_v6  ;;  %v2965_v5 = vpack.c.bf16 %v1219_v4, %v1217_v0  ;;  %v1216_v6 = vld [vmem:[#allocation8 + $0x1e0] sm:$0xff]  ;;  %v4105_v0 = vld [vmem:[%s3870_s6 + $0x1b0] sm:$0xff] }
 0x126   : > { %v4108_v4 = vld [vmem:[%s3870_s6 + $0x1c8] sm:$0xff] }
 0x128   : > { %681 = vmatmul.mubr.f32.gmra.mrb[34].mxu1 %v4025_v45  ;;  %2956 = vmatpush1.bf16.msra.mxu0 %v2955_v18  ;;  %v2967_v18 = vpack.c.bf16 %v1218_v7, %v1216_v6  ;;  %v4116_v6 = vld [vmem:[%s3870_s6 + $0x1d8] sm:$0xff]  ;;  %v4121_v7 = vld [vmem:[%s3870_s6 + $0x1d0] sm:$0xff] }
 0x129   : > { %686 = vmatprep.mubr.f32.mxu1 %v4028_v47  ;;  %2958 = vmatprep.subr.bf16.mxu0 %v2957_v24  ;;  %v4076_v24 = vld [vmem:[%s3870_s6 + $0x188] sm:$0xff] }
 0x12c   : > { %687 = vmatmul.mubr.f32.gmra.mrb[36].mxu1 %v4033_v63  ;;  %2960 = vmatpush1.bf16.msra.mxu0 %v2959_v36  ;;  %v2969_v36 = vpack.c.bf16 %v1223_v29, %v1221_v27  ;;  %v4129_v27 = vld [vmem:[%s3870_s6 + $0x1e0] sm:$0xff]  ;;  %v4132_v29 = vld [vmem:[%s3870_s6 + $0x1f8] sm:$0xff] }
 0x12d   : > { %692 = vmatprep.mubr.f32.mxu1 %v4036_v2  ;;  %2962 = vmatprep.subr.bf16.mxu0 %v2961_v46  ;;  %v4089_v46 = vld [vmem:[%s3870_s6 + $0x190] sm:$0xff] }
 0x130   : > { %693 = vmatmul.mubr.f32.gmra.mrb[38].mxu1 %v4041_v16  ;;  %2964 = vmatpush1.bf16.msra.mxu0 %v2963_v56  ;;  %v4100_v56 = vld [vmem:[%s3870_s6 + $0x1b8] sm:$0xff] }
 0x131   : > { %698 = vmatprep.mubr.f32.mxu1 %v4044_v21  ;;  %2966 = vmatprep.subr.bf16.mxu0 %v2965_v5  ;;  %v4113_v5 = vld [vmem:[%s3870_s6 + $0x1c0] sm:$0xff] }
 0x134   : > { %699 = vmatmul.mubr.f32.gmra.mrb[40].mxu1 %v4049_v35  ;;  %2968 = vmatpush1.bf16.msra.mxu0 %v2967_v18  ;;  %v4124_v18 = vld [vmem:[%s3870_s6 + $0x1e8] sm:$0xff] }
 0x135   : > { %704 = vmatprep.mubr.f32.mxu1 %v4052_v37  ;;  %2970 = vmatprep.subr.bf16.mxu0 %v2969_v36  ;;  %v4137_v36 = vld [vmem:[%s3870_s6 + $0x1f0] sm:$0xff] }
 0x138   : > { %705 = vmatmul.mubr.f32.gmra.mrb[42].mxu1 %v4057_v54 }
 0x139   : > { %710 = vmatprep.mubr.f32.mxu1 %v4060_v61 }
 0x13c   : > { %711 = vmatmul.mubr.f32.gmra.mrb[44].mxu1 %v4065_v12 }
 0x13d   : > { %716 = vmatprep.mubr.f32.mxu1 %v4068_v22 }
 0x140   : > { %717 = vmatmul.mubr.f32.gmra.mrb[46].mxu1 %v4073_v23 }
 0x141   : > { %722 = vmatprep.mubr.f32.mxu1 %v4076_v24 }
 0x144   : > { %723 = vmatmul.mubr.f32.gmra.mrb[48].mxu1 %v4081_v42 }
 0x145   : > { %728 = vmatprep.mubr.f32.mxu1 %v4084_v44 }
 0x148   : > { %729 = vmatmul.mubr.f32.gmra.mrb[50].mxu1 %v4089_v46 }
 0x149   : > { %734 = vmatprep.mubr.f32.mxu1 %v4092_v48 }
 0x14c   : > { %735 = vmatmul.mubr.f32.gmra.mrb[52].mxu1 %v4097_v50 }
 0x14d   : > { %740 = vmatprep.mubr.f32.mxu1 %v4100_v56 }
 0x150   : > { %741 = vmatmul.mubr.f32.gmra.mrb[54].mxu1 %v4105_v0 }
 0x151   : > { %746 = vmatprep.mubr.f32.mxu1 %v4108_v4 }
 0x154   : > { %747 = vmatmul.mubr.f32.gmra.mrb[56].mxu1 %v4113_v5 }
 0x155   : > { %752 = vmatprep.mubr.f32.mxu1 %v4116_v6 }
 0x158   : > { %753 = vmatmul.mubr.f32.gmra.mrb[58].mxu1 %v4121_v7 }
 0x159   : > { %758 = vmatprep.mubr.f32.mxu1 %v4124_v18 }
 0x15c   : > { %759 = vmatmul.mubr.f32.gmra.mrb[60].mxu1 %v4129_v27 }
 0x15d   : > { %764 = vmatprep.mubr.f32.mxu1 %v4132_v29 }
 0x160   : > { %765 = vmatmul.mubr.f32.gmra.mrb[62].mxu1 %v4137_v36 }
 0x161   : > { %835 = vmatprep.mubr.f32.mxu1 %v3885_v41  ;;  %v494_v41 = vlaneseq }
 0x164   : > { %836 = vmatmul.mubr.f32.vlgmr.msra.gmra.mrb[64].mxu1 %v3889_v40  ;;  %v4178_v40 = vshrl.u32 %v494_v41, 7 }
 0x165   : > { %841 = vmatprep.mubr.f32.mxu1 %v3892_v43 }
 0x166   : > { %5397 = vst [vmem:[#allocation16_spill] sm:$0xff] %v4178_v40  ;;  %v4183_v43 = vsub.s32 0, %v4178_v40 }
 0x168   : > { %842 = vmatmul.mubr.f32.gmra.mrb[66].mxu1 %v3897_v49  ;;  %v4186_v49 = vld [vmem:[#allocation7] sm:$0xf] }
 0x169   : > { %847 = vmatprep.mubr.f32.mxu1 %v3900_v51  ;;  %v4189_v51 = vsub.s32 1, %v4178_v40 }
 0x16b   : > { %5398 = vst [vmem:[#allocation17_spill] sm:$0xff] %v4189_v51 }
 0x16c   : > { %848 = vmatmul.mubr.f32.gmra.mrb[68].mxu1 %v3905_v57  ;;  %v4194_v57 = vrot.slane %v4186_v49, %v4183_v43 }
 0x16d   : > { %853 = vmatprep.mubr.f32.mxu1 %v3908_v59  ;;  %v4199_v59 = vrot.slane %v4186_v49, %v4189_v51  ;;  %v3368_v51 = vld [vmem:[%s3870_s6 + $0x190] sm:$0xff] }
 0x170   : > { %854 = vmatmul.mubr.f32.gmra.mrb[70].mxu1 %v3913_v1 }
 0x171   : > { %859 = vmatprep.mubr.f32.mxu1 %v3916_v3 }
 0x174   : > { %860 = vmatmul.mubr.f32.gmra.mrb[72].mxu1 %v3921_v9 }
 0x175   : > { %865 = vmatprep.mubr.f32.mxu1 %v3924_v11  ;;  %v1220_v11 = vld [vmem:[#allocation8 + $0x200] sm:$0xff] }
 0x178   : > { %866 = vmatmul.mubr.f32.gmra.mrb[74].mxu1 %v3929_v17  ;;  %v1222_v17 = vld [vmem:[#allocation8 + $0x210] sm:$0xff] }
 0x179   : > { %871 = vmatprep.mubr.f32.mxu1 %v3932_v19 }
 0x17c   : > { %872 = vmatmul.mubr.f32.gmra.mrb[76].mxu1 %v3937_v25  ;;  %v1225_v25 = vld [vmem:[#allocation8 + $0x228] sm:$0xff] }
 0x17d   : > { %877 = vmatprep.mubr.f32.mxu1 %v3940_v26  ;;  %v1227_v26 = vld [vmem:[#allocation8 + $0x238] sm:$0xff] }
 0x180   : > { %878 = vmatmul.mubr.f32.gmra.mrb[78].mxu1 %v3945_v38 }
 0x181   : > { %883 = vmatprep.mubr.f32.mxu1 %v3948_v39 }
 0x184   : > { %884 = vmatmul.mubr.f32.gmra.mrb[80].mxu1 %v3953_v58  ;;  %v2971_v58 = vpack.c.bf16 %v1222_v17, %v1220_v11 }
 0x185   : > { %889 = vmatprep.mubr.f32.mxu1 %v3956_v60 }
 0x188   : > { %890 = vmatmul.mubr.f32.gmra.mrb[82].mxu1 %v3961_v13 }
 0x189   : > { %895 = vmatprep.mubr.f32.mxu1 %v3964_v14 }
 0x18c   : > { %896 = vmatmul.mubr.f32.gmra.mrb[84].mxu1 %v3969_v31  ;;  %v2973_v31 = vpack.c.bf16 %v1227_v26, %v1225_v25  ;;  %v1236_v26 = vld [vmem:[#allocation8 + $0x280] sm:$0xff] }
 0x18d   : > { %901 = vmatprep.mubr.f32.mxu1 %v3972_v32  ;;  %v1224_v32 = vld [vmem:[#allocation8 + $0x220] sm:$0xff] }
 0x190   : > { %902 = vmatmul.mubr.f32.gmra.mrb[86].mxu1 %v3977_v52  ;;  %v1226_v52 = vld [vmem:[#allocation8 + $0x230] sm:$0xff] }
 0x191   : > { %907 = vmatprep.mubr.f32.mxu1 %v3980_v53 }
 0x194   : > { %908 = vmatmul.mubr.f32.gmra.mrb[88].mxu1 %v3985_v8  ;;  %v1229_v8 = vld [vmem:[#allocation8 + $0x248] sm:$0xff] }
 0x195   : > { %913 = vmatprep.mubr.f32.mxu1 %v3988_v10  ;;  %v1231_v10 = vld [vmem:[#allocation8 + $0x258] sm:$0xff] }
 0x198   : > { %914 = vmatmul.mubr.f32.gmra.mrb[90].mxu1 %v3993_v30 }
 0x199   : > { %919 = vmatprep.mubr.f32.mxu1 %v3996_v33 }
 0x19c   : > { %920 = vmatmul.mubr.f32.gmra.mrb[92].mxu1 %v4001_v55  ;;  %v2975_v55 = vpack.c.bf16 %v1226_v52, %v1224_v32 }
 0x19d   : > { %925 = vmatprep.mubr.f32.mxu1 %v4004_v62 }
 0x1a0   : > { %926 = vmatmul.mubr.f32.gmra.mrb[94].mxu1 %v4009_v15 }
 0x1a1   : > { %931 = vmatprep.mubr.f32.mxu1 %v4012_v20 }
 0x1a4   : > { %932 = vmatmul.mubr.f32.gmra.mrb[96].mxu1 %v4017_v28  ;;  %v2977_v28 = vpack.c.bf16 %v1231_v10, %v1229_v8  ;;  %v1242_v8 = vld [vmem:[#allocation8 + $0x2b0] sm:$0xff] }
 0x1a5   : > { %937 = vmatprep.mubr.f32.mxu1 %v4020_v34  ;;  %v1228_v34 = vld [vmem:[#allocation8 + $0x240] sm:$0xff] }
 0x1a8   : > { %938 = vmatmul.mubr.f32.gmra.mrb[98].mxu1 %v4025_v45  ;;  %v1230_v45 = vld [vmem:[#allocation8 + $0x250] sm:$0xff] }
 0x1a9   : > { %943 = vmatprep.mubr.f32.mxu1 %v4028_v47 }
 0x1ac   : > { %944 = vmatmul.mubr.f32.gmra.mrb[100].mxu1 %v4033_v63  ;;  %v1233_v63 = vld [vmem:[#allocation8 + $0x268] sm:$0xff] }
 0x1ad   : > { %949 = vmatprep.mubr.f32.mxu1 %v4036_v2  ;;  %v1235_v2 = vld [vmem:[#allocation8 + $0x278] sm:$0xff] }
 0x1b0   : > { %950 = vmatmul.mubr.f32.gmra.mrb[102].mxu1 %v4041_v16 }
 0x1b1   : > { %955 = vmatprep.mubr.f32.mxu1 %v4044_v21 }
 0x1b4   : > { %956 = vmatmul.mubr.f32.gmra.mrb[104].mxu1 %v4049_v35  ;;  %v2979_v35 = vpack.c.bf16 %v1230_v45, %v1228_v34  ;;  %v1244_v34 = vld [vmem:[#allocation8 + $0x2c0] sm:$0xff]  ;;  %v1246_v45 = vld [vmem:[#allocation8 + $0x2d0] sm:$0xff] }
 0x1b5   : > { %961 = vmatprep.mubr.f32.mxu1 %v4052_v37 }
 0x1b7   : > { %v580_v1 = vpop.f32.mrb[0].mxu1 }
 0x1b8   : > { %v581_v3 = vadd.f32 %v580_v1, %v4194_v57  ;;  %v582_v9 = vpop.f32.mrb[1].mxu1  ;;  %962 = vmatmul.mubr.f32.gmra.mrb[106].mxu1 %v4057_v54  ;;  %v1239_v1 = vld [vmem:[#allocation8 + $0x298] sm:$0xff] }
 0x1b9   : > { %967 = vmatprep.mubr.f32.mxu1 %v4060_v61  ;;  %v583_v19 = vadd.f32 %v582_v9, %v4199_v59 }
 0x1ba   : > { %v1028_v60 = vmax.f32 %v581_v3, 0.0 }
 0x1bb   : > { %v586_v38 = vpop.f32.mrb[2].mxu1  ;;  %v1029_v39 = vmax.f32 %v583_v19, 0.0 }
 0x1bc   : > { %v587_v13 = vadd.f32 %v586_v38, %v4194_v57  ;;  %v588_v14 = vpop.f32.mrb[3].mxu1  ;;  %968 = vmatmul.mubr.f32.gmra.mrb[108].mxu1 %v4065_v12  ;;  %v2981_v12 = vpack.c.bf16 %v1235_v2, %v1233_v63  ;;  %v1238_v38 = vld [vmem:[#allocation8 + $0x290] sm:$0xff]  ;;  %v1251_v63 = vld [vmem:[#allocation8 + $0x2f8] sm:$0xff] }
 0x1bd   : > { %v589_v53 = vadd.f32 %v588_v14, %v4199_v59  ;;  %1368 = vmatprep.mubr.f32.mxu0 %v1029_v39  ;;  %973 = vmatprep.mubr.f32.mxu1 %v4068_v22  ;;  %v1232_v22 = vld [vmem:[#allocation8 + $0x260] sm:$0xff]  ;;  %v2987_v14 = vpack.c.bf16 %v1238_v38, %v1236_v26 }
 0x1be   : > { %1369 = vmatmul.mubr.f32.vlgmr.msra.gmra.mrb[0].mxu0 %v1028_v60  ;;  %v1032_v62 = vmax.f32 %v587_v13, 0.0 }
 0x1bf   : > { %v1033_v30 = vmax.f32 %v589_v53, 0.0  ;;  %v592_v33 = vpop.f32.mrb[4].mxu1  ;;  %2972 = vmatpush1.bf16.msra.mxu0 %v2971_v58  ;;  %v1243_v58 = vld [vmem:[#allocation8 + $0x2b8] sm:$0xff]  ;;  %v1240_v53 = vld [vmem:[#allocation8 + $0x2a0] sm:$0xff] }
 0x1c0   : > { %v593_v15 = vadd.f32 %v592_v33, %v4194_v57  ;;  %v594_v20 = vpop.f32.mrb[5].mxu1  ;;  %974 = vmatmul.mubr.f32.gmra.mrb[110].mxu1 %v4073_v23  ;;  %2974 = vmatprep.subr.bf16.mxu0 %v2973_v31  ;;  %v1234_v23 = vld [vmem:[#allocation8 + $0x270] sm:$0xff] }
 0x1c1   : > { %v595_v47 = vadd.f32 %v594_v20, %v4199_v59  ;;  %1374 = vmatprep.mubr.f32.mxu0 %v1033_v30  ;;  %979 = vmatprep.mubr.f32.mxu1 %v4076_v24  ;;  %v1237_v24 = vld [vmem:[#allocation8 + $0x288] sm:$0xff]  ;;  %v2983_v11 = vpack.c.bf16 %v1234_v23, %v1232_v22  ;;  %v1247_v30 = vld [vmem:[#allocation8 + $0x2d8] sm:$0xff] }
 0x1c2   : > { %1375 = vmatmul.mubr.f32.gmra.mrb[2].mxu0 %v1032_v62  ;;  %v1036_v37 = vmax.f32 %v593_v15, 0.0  ;;  %v2985_v25 = vpack.c.bf16 %v1239_v1, %v1237_v24  ;;  %v2991_v62 = vpack.c.bf16 %v1242_v8, %v1240_v53  ;;  %v1255_v23 = vld [vmem:[#allocation8 + $0x318] sm:$0xff] }
 0x1c3   : > { %v1037_v16 = vmax.f32 %v595_v47, 0.0  ;;  %v598_v21 = vpop.f32.mrb[6].mxu1  ;;  %2976 = vmatpush1.bf16.msra.mxu0 %v2975_v55 }
 0x1c4   : > { %v599_v54 = vadd.f32 %v598_v21, %v4194_v57  ;;  %v600_v61 = vpop.f32.mrb[7].mxu1  ;;  %980 = vmatmul.mubr.f32.gmra.mrb[112].mxu1 %v4081_v42  ;;  %2978 = vmatprep.subr.bf16.mxu0 %v2977_v28  ;;  %v2995_v21 = vpack.c.bf16 %v1246_v45, %v1244_v34 }
 0x1c5   : > { %v601_v41 = vadd.f32 %v600_v61, %v4199_v59  ;;  %1380 = vmatprep.mubr.f32.mxu0 %v1037_v16  ;;  %985 = vmatprep.mubr.f32.mxu1 %v4084_v44  ;;  %v1241_v44 = vld [vmem:[#allocation8 + $0x2a8] sm:$0xff]  ;;  %v1248_v61 = vld [vmem:[#allocation8 + $0x2e0] sm:$0xff] }
 0x1c6   : > { %1381 = vmatmul.mubr.f32.gmra.mrb[4].mxu0 %v1036_v37  ;;  %v1040_v17 = vmax.f32 %v599_v54, 0.0  ;;  %v2989_v52 = vpack.c.bf16 %v1243_v58, %v1241_v44 }
 0x1c7   : > { %v1041_v3 = vmax.f32 %v601_v41, 0.0  ;;  %v604_v9 = vpop.f32.mrb[8].mxu1  ;;  %2980 = vmatpush1.bf16.msra.mxu0 %v2979_v35 }
 0x1c8   : > { %v605_v19 = vadd.f32 %v604_v9, %v4194_v57  ;;  %v606_v42 = vpop.f32.mrb[9].mxu1  ;;  %986 = vmatmul.mubr.f32.gmra.mrb[114].mxu1 %v4089_v46  ;;  %2982 = vmatprep.subr.bf16.mxu0 %v2981_v12  ;;  %v1250_v12 = vld [vmem:[#allocation8 + $0x2f0] sm:$0xff] }
 0x1c9   : > { %v607_v39 = vadd.f32 %v606_v42, %v4199_v59  ;;  %1386 = vmatprep.mubr.f32.mxu0 %v1041_v3  ;;  %991 = vmatprep.mubr.f32.mxu1 %v4092_v48  ;;  %v1245_v48 = vld [vmem:[#allocation8 + $0x2c8] sm:$0xff]  ;;  %v2999_v1 = vpack.c.bf16 %v1250_v12, %v1248_v61 }
 0x1ca   : > { %1387 = vmatmul.mubr.f32.gmra.mrb[6].mxu0 %v1040_v17  ;;  %v1044_v31 = vmax.f32 %v605_v19, 0.0  ;;  %v2993_v28 = vpack.c.bf16 %v1247_v30, %v1245_v48  ;;  %v1252_v17 = vld [vmem:[#allocation8 + $0x300] sm:$0xff]  ;;  %v1254_v19 = vld [vmem:[#allocation8 + $0x310] sm:$0xff] }
 0x1cb   : > { %v1045_v60 = vmax.f32 %v607_v39, 0.0  ;;  %v610_v13 = vpop.f32.mrb[10].mxu1  ;;  %2984 = vmatpush1.bf16.msra.mxu0 %v2983_v11  ;;  %v3003_v39 = vpack.c.bf16 %v1254_v19, %v1252_v17  ;;  %v1260_v30 = vld [vmem:[#allocation8 + $0x340] sm:$0xff] }
 0x1cc   : > { %v611_v32 = vadd.f32 %v610_v13, %v4194_v57  ;;  %v612_v46 = vpop.f32.mrb[11].mxu1  ;;  %992 = vmatmul.mubr.f32.gmra.mrb[116].mxu1 %v4097_v50  ;;  %2986 = vmatprep.subr.bf16.mxu0 %v2985_v25  ;;  %v1259_v25 = vld [vmem:[#allocation8 + $0x338] sm:$0xff]  ;;  %v1256_v13 = vld [vmem:[#allocation8 + $0x320] sm:$0xff] }
 0x1cd   : > { %v613_v10 = vadd.f32 %v612_v46, %v4199_v59  ;;  %1392 = vmatprep.mubr.f32.mxu0 %v1045_v60  ;;  %997 = vmatprep.mubr.f32.mxu1 %v4100_v56  ;;  %v1249_v56 = vld [vmem:[#allocation8 + $0x2e8] sm:$0xff] }
 0x1ce   : > { %1393 = vmatmul.mubr.f32.gmra.mrb[8].mxu0 %v1044_v31  ;;  %v1048_v15 = vmax.f32 %v611_v32, 0.0  ;;  %v2997_v54 = vpack.c.bf16 %v1251_v63, %v1249_v56  ;;  %v1263_v32 = vld [vmem:[#allocation8 + $0x358] sm:$0xff]  ;;  %v1266_v56 = vld [vmem:[#allocation8 + $0x370] sm:$0xff] }
 0x1cf   : > { %v1049_v33 = vmax.f32 %v613_v10, 0.0  ;;  %v616_v55 = vpop.f32.mrb[12].mxu1  ;;  %2988 = vmatpush1.bf16.msra.mxu0 %v2987_v14  ;;  %v1258_v14 = vld [vmem:[#allocation8 + $0x330] sm:$0xff] }
 0x1d0   : > { %v617_v20 = vadd.f32 %v616_v55, %v4194_v57  ;;  %v618_v50 = vpop.f32.mrb[13].mxu1  ;;  %998 = vmatmul.mubr.f32.gmra.mrb[118].mxu1 %v4105_v0  ;;  %2990 = vmatprep.subr.bf16.mxu0 %v2989_v52  ;;  %v3007_v53 = vpack.c.bf16 %v1258_v14, %v1256_v13 }
 0x1d1   : > { %v619_v47 = vadd.f32 %v618_v50, %v4199_v59  ;;  %1398 = vmatprep.mubr.f32.mxu0 %v1049_v33  ;;  %1003 = vmatprep.mubr.f32.mxu1 %v4108_v4  ;;  %v1253_v4 = vld [vmem:[#allocation8 + $0x308] sm:$0xff]  ;;  %v1262_v33 = vld [vmem:[#allocation8 + $0x350] sm:$0xff] }
 0x1d2   : > { %1399 = vmatmul.mubr.f32.gmra.mrb[10].mxu0 %v1048_v15  ;;  %v1052_v35 = vmax.f32 %v617_v20, 0.0  ;;  %v3001_v11 = vpack.c.bf16 %v1255_v23, %v1253_v4  ;;  %v3011_v50 = vpack.c.bf16 %v1262_v33, %v1260_v30  ;;  %v1270_v4 = vld [vmem:[#allocation8 + $0x390] sm:$0xff] }
 0x1d3   : > { %v1053_v2 = vmax.f32 %v619_v47, 0.0  ;;  %v622_v16 = vpop.f32.mrb[14].mxu1  ;;  %2992 = vmatpush1.bf16.msra.mxu0 %v2991_v62  ;;  %v1267_v62 = vld [vmem:[#allocation8 + $0x378] sm:$0xff]  ;;  %v1264_v47 = vld [vmem:[#allocation8 + $0x360] sm:$0xff] }
 0x1d4   : > { %v623_v37 = vadd.f32 %v622_v16, %v4194_v57  ;;  %v624_v0 = vpop.f32.mrb[15].mxu1  ;;  %1004 = vmatmul.mubr.f32.gmra.mrb[120].mxu1 %v4113_v5  ;;  %2994 = vmatprep.subr.bf16.mxu0 %v2993_v28  ;;  %v1271_v16 = vld [vmem:[#allocation8 + $0x398] sm:$0xff] }
 0x1d5   : > { %v625_v22 = vadd.f32 %v624_v0, %v4199_v59  ;;  %1404 = vmatprep.mubr.f32.mxu0 %v1053_v2  ;;  %1009 = vmatprep.mubr.f32.mxu1 %v4116_v6  ;;  %v1257_v6 = vld [vmem:[#allocation8 + $0x328] sm:$0xff] }
 0x1d6   : > { %1405 = vmatmul.mubr.f32.gmra.mrb[12].mxu0 %v1052_v35  ;;  %v1056_v3 = vmax.f32 %v623_v37, 0.0  ;;  %v3005_v60 = vpack.c.bf16 %v1259_v25, %v1257_v6  ;;  %v1269_v2 = vld [vmem:[#allocation8 + $0x388] sm:$0xff]  ;;  %v3015_v37 = vpack.c.bf16 %v1266_v56, %v1264_v47  ;;  %v1274_v6 = vld [vmem:[#allocation8 + $0x3b0] sm:$0xff] }
 0x1d7   : > { %v1057_v41 = vmax.f32 %v625_v22, 0.0  ;;  %v628_v24 = vpop.f32.mrb[16].mxu1  ;;  %2996 = vmatpush1.bf16.msra.mxu0 %v2995_v21  ;;  %v3017_v12 = vpack.c.bf16 %v1271_v16, %v1269_v2  ;;  %v1268_v22 = vld [vmem:[#allocation8 + $0x380] sm:$0xff] }
 0x1d8   : > { %v629_v9 = vadd.f32 %v628_v24, %v4194_v57  ;;  %v630_v5 = vpop.f32.mrb[17].mxu1  ;;  %1010 = vmatmul.mubr.f32.gmra.mrb[122].mxu1 %v4121_v7  ;;  %2998 = vmatprep.subr.bf16.mxu0 %v2997_v54  ;;  %v1275_v24 = vld [vmem:[#allocation8 + $0x3b8] sm:$0xff] }
 0x1d9   : > { %v631_v42 = vadd.f32 %v630_v5, %v4199_v59  ;;  %1410 = vmatprep.mubr.f32.mxu0 %v1057_v41  ;;  %1015 = vmatprep.mubr.f32.mxu1 %v4124_v18  ;;  %v1261_v18 = vld [vmem:[#allocation8 + $0x348] sm:$0xff] }
 0x1da   : > { %1411 = vmatmul.mubr.f32.gmra.mrb[14].mxu0 %v1056_v3  ;;  %v1060_v44 = vmax.f32 %v629_v9, 0.0  ;;  %v3009_v48 = vpack.c.bf16 %v1263_v32, %v1261_v18  ;;  %v1273_v41 = vld [vmem:[#allocation8 + $0x3a8] sm:$0xff]  ;;  %v3019_v9 = vpack.c.bf16 %v1270_v4, %v1268_v22  ;;  %v1278_v18 = vld [vmem:[#allocation8 + $0x3d0] sm:$0xff] }
 0x1db   : > { %v1061_v26 = vmax.f32 %v631_v42, 0.0  ;;  %v634_v38 = vpop.f32.mrb[18].mxu1  ;;  %3000 = vmatpush1.bf16.msra.mxu0 %v2999_v1  ;;  %v3021_v19 = vpack.c.bf16 %v1275_v24, %v1273_v41  ;;  %v1272_v42 = vld [vmem:[#allocation8 + $0x3a0] sm:$0xff] }
 0x1dc   : > { %v635_v58 = vadd.f32 %v634_v38, %v4194_v57  ;;  %v636_v7 = vpop.f32.mrb[19].mxu1  ;;  %1016 = vmatmul.mubr.f32.gmra.mrb[124].mxu1 %v4129_v27  ;;  %3002 = vmatprep.subr.bf16.mxu0 %v3001_v11  ;;  %v1279_v38 = vld [vmem:[#allocation8 + $0x3d8] sm:$0xff] }
 0x1dd   : > { %v637_v31 = vadd.f32 %v636_v7, %v4199_v59  ;;  %1416 = vmatprep.mubr.f32.mxu0 %v1061_v26  ;;  %1021 = vmatprep.mubr.f32.mxu1 %v4132_v29  ;;  %v1265_v29 = vld [vmem:[#allocation8 + $0x368] sm:$0xff] }
 0x1de   : > { %1417 = vmatmul.mubr.f32.gmra.mrb[16].mxu0 %v1060_v44  ;;  %v1064_v8 = vmax.f32 %v635_v58, 0.0  ;;  %v1277_v26 = vld [vmem:[#allocation8 + $0x3c8] sm:$0xff]  ;;  %v3023_v58 = vpack.c.bf16 %v1274_v6, %v1272_v42 }
 0x1df   : > { %v1065_v46 = vmax.f32 %v637_v31, 0.0  ;;  %v640_v52 = vpop.f32.mrb[20].mxu1  ;;  %3004 = vmatpush1.bf16.msra.mxu0 %v3003_v39  ;;  %v3025_v14 = vpack.c.bf16 %v1279_v38, %v1277_v26  ;;  %v1276_v31 = vld [vmem:[#allocation8 + $0x3c0] sm:$0xff] }
 0x1e0   : > { %v641_v10 = vadd.f32 %v640_v52, %v4194_v57  ;;  %v642_v27 = vpop.f32.mrb[21].mxu1  ;;  %1022 = vmatmul.mubr.f32.gmra.mrb[126].mxu1 %v4137_v36  ;;  %3006 = vmatprep.subr.bf16.mxu0 %v3005_v60  ;;  %v3013_v36 = vpack.c.bf16 %v1267_v62, %v1265_v29  ;;  %v1283_v52 = vld [vmem:[#allocation8 + $0x3f8] sm:$0xff]  ;;  %v1282_v29 = vld [vmem:[#allocation8 + $0x3f0] sm:$0xff] }
 0x1e1   : > { %v643_v55 = vadd.f32 %v642_v27, %v4199_v59  ;;  %1422 = vmatprep.mubr.f32.mxu0 %v1065_v46  ;;  %v1281_v46 = vld [vmem:[#allocation8 + $0x3e8] sm:$0xff] }
 0x1e2   : > { %1423 = vmatmul.mubr.f32.gmra.mrb[18].mxu0 %v1064_v8  ;;  %v1068_v28 = vmax.f32 %v641_v10, 0.0  ;;  %v3027_v10 = vpack.c.bf16 %v1278_v18, %v1276_v31  ;;  %v3029_v33 = vpack.c.bf16 %v1283_v52, %v1281_v46 }
 0x1e3   : > { %v1069_v15 = vmax.f32 %v643_v55, 0.0  ;;  %v646_v20 = vpop.f32.mrb[22].mxu1  ;;  %3008 = vmatpush1.bf16.msra.mxu0 %v3007_v53  ;;  %v1280_v55 = vld [vmem:[#allocation8 + $0x3e0] sm:$0xff] }
 0x1e4   : > { %v647_v34 = vadd.f32 %v646_v20, %v4194_v57  ;;  %v648_v45 = vpop.f32.mrb[23].mxu1  ;;  %3010 = vmatprep.subr.bf16.mxu0 %v3009_v48 }
 0x1e5   : > { %v649_v63 = vadd.f32 %v648_v45, %v4199_v59  ;;  %1428 = vmatprep.mubr.f32.mxu0 %v1069_v15 }
 0x1e6   : > { %1429 = vmatmul.mubr.f32.gmra.mrb[20].mxu0 %v1068_v28  ;;  %v1072_v0 = vmax.f32 %v647_v34, 0.0 }
 0x1e7   : > { %v1073_v21 = vmax.f32 %v649_v63, 0.0  ;;  %v652_v35 = vpop.f32.mrb[24].mxu1  ;;  %3012 = vmatpush1.bf16.msra.mxu0 %v3011_v50  ;;  %v3031_v50 = vpack.c.bf16 %v1282_v29, %v1280_v55 }
 0x1e8   : > { %v653_v54 = vadd.f32 %v652_v35, %v4194_v57  ;;  %v654_v61 = vpop.f32.mrb[25].mxu1  ;;  %3014 = vmatprep.subr.bf16.mxu0 %v3013_v36 }
 0x1e9   : > { %v655_v23 = vadd.f32 %v654_v61, %v4199_v59  ;;  %1434 = vmatprep.mubr.f32.mxu0 %v1073_v21 }
 0x1ea   : > { %1435 = vmatmul.mubr.f32.gmra.mrb[22].mxu0 %v1072_v0  ;;  %v1076_v5 = vmax.f32 %v653_v54, 0.0 }
 0x1eb   : > { %v1077_v1 = vmax.f32 %v655_v23, 0.0  ;;  %v658_v3 = vpop.f32.mrb[26].mxu1  ;;  %3016 = vmatpush1.bf16.msra.mxu0 %v3015_v37 }
 0x1ec   : > { %v659_v11 = vadd.f32 %v658_v3, %v4194_v57  ;;  %v660_v17 = vpop.f32.mrb[27].mxu1  ;;  %3018 = vmatprep.subr.bf16.mxu0 %v3017_v12 }
 0x1ed   : > { %v661_v25 = vadd.f32 %v660_v17, %v4199_v59  ;;  %1440 = vmatprep.mubr.f32.mxu0 %v1077_v1 }
 0x1ee   : > { %1441 = vmatmul.mubr.f32.gmra.mrb[24].mxu0 %v1076_v5  ;;  %v1080_v7 = vmax.f32 %v659_v11, 0.0 }
 0x1ef   : > { %v1081_v39 = vmax.f32 %v661_v25, 0.0  ;;  %v664_v44 = vpop.f32.mrb[28].mxu1  ;;  %3020 = vmatpush1.bf16.msra.mxu0 %v3019_v9 }
 0x1f0   : > { %v665_v60 = vadd.f32 %v664_v44, %v4194_v57  ;;  %v666_v13 = vpop.f32.mrb[29].mxu1  ;;  %3022 = vmatprep.subr.bf16.mxu0 %v3021_v19 }
 0x1f1   : > { %v667_v32 = vadd.f32 %v666_v13, %v4199_v59  ;;  %1446 = vmatprep.mubr.f32.mxu0 %v1081_v39 }
 0x1f2   : > { %1447 = vmatmul.mubr.f32.gmra.mrb[26].mxu0 %v1080_v7  ;;  %v1084_v27 = vmax.f32 %v665_v60, 0.0 }
 0x1f3   : > { %v1085_v53 = vmax.f32 %v667_v32, 0.0  ;;  %v670_v8 = vpop.f32.mrb[30].mxu1  ;;  %3024 = vmatpush1.bf16.msra.mxu0 %v3023_v58 }
 0x1f4   : > { %v671_v48 = vadd.f32 %v670_v8, %v4194_v57  ;;  %v672_v30 = vpop.f32.mrb[31].mxu1  ;;  %3026 = vmatprep.subr.bf16.mxu0 %v3025_v14 }
 0x1f5   : > { %v673_v62 = vadd.f32 %v672_v30, %v4199_v59  ;;  %1452 = vmatprep.mubr.f32.mxu0 %v1085_v53 }
 0x1f6   : > { %1453 = vmatmul.mubr.f32.gmra.mrb[28].mxu0 %v1084_v27  ;;  %v1088_v28 = vmax.f32 %v671_v48, 0.0 }
 0x1f7   : > { %v1089_v15 = vmax.f32 %v673_v62, 0.0  ;;  %v676_v20 = vpop.f32.mrb[32].mxu1  ;;  %3028 = vmatpush1.bf16.msra.mxu0 %v3027_v10 }
 0x1f8   : > { %v677_v34 = vadd.f32 %v676_v20, %v4194_v57  ;;  %v678_v45 = vpop.f32.mrb[33].mxu1  ;;  %3030 = vmatprep.subr.bf16.mxu0 %v3029_v33 }
 0x1f9   : > { %v679_v36 = vadd.f32 %v678_v45, %v4199_v59  ;;  %1458 = vmatprep.mubr.f32.mxu0 %v1089_v15 }
 0x1fa   : > { %1459 = vmatmul.mubr.f32.gmra.mrb[30].mxu0 %v1088_v28  ;;  %v1092_v63 = vmax.f32 %v677_v34, 0.0 }
 0x1fb   : > { %v1093_v47 = vmax.f32 %v679_v36, 0.0  ;;  %v682_v56 = vpop.f32.mrb[34].mxu1  ;;  %3032 = vmatpush1.bf16.msra.mxu0 %v3031_v50 }
 0x1fc   : > { %v683_v2 = vadd.f32 %v682_v56, %v4194_v57  ;;  %v684_v16 = vpop.f32.mrb[35].mxu1 }
 0x1fd   : > { %v685_v21 = vadd.f32 %v684_v16, %v4199_v59  ;;  %1464 = vmatprep.mubr.f32.mxu0 %v1093_v47 }
 0x1fe   : > { %1465 = vmatmul.mubr.f32.gmra.mrb[32].mxu0 %v1092_v63  ;;  %v1096_v0 = vmax.f32 %v683_v2, 0.0 }
 0x1ff   : > { %v1097_v35 = vmax.f32 %v685_v21, 0.0  ;;  %v688_v37 = vpop.f32.mrb[36].mxu1 }
 0x200   : > { %v689_v54 = vadd.f32 %v688_v37, %v4194_v57  ;;  %v690_v61 = vpop.f32.mrb[37].mxu1 }
 0x201   : > { %v691_v12 = vadd.f32 %v690_v61, %v4199_v59  ;;  %1470 = vmatprep.mubr.f32.mxu0 %v1097_v35 }
 0x202   : > { %1471 = vmatmul.mubr.f32.gmra.mrb[34].mxu0 %v1096_v0  ;;  %v1100_v23 = vmax.f32 %v689_v54, 0.0 }
 0x203   : > { %v1101_v22 = vmax.f32 %v691_v12, 0.0  ;;  %v694_v4 = vpop.f32.mrb[38].mxu1 }
 0x204   : > { %v695_v41 = vadd.f32 %v694_v4, %v4194_v57  ;;  %v696_v24 = vpop.f32.mrb[39].mxu1 }
 0x205   : > { %v697_v1 = vadd.f32 %v696_v24, %v4199_v59  ;;  %1476 = vmatprep.mubr.f32.mxu0 %v1101_v22 }
 0x206   : > { %1477 = vmatmul.mubr.f32.gmra.mrb[36].mxu0 %v1100_v23  ;;  %v1104_v5 = vmax.f32 %v695_v41, 0.0 }
 0x207   : > { %v1105_v3 = vmax.f32 %v697_v1, 0.0  ;;  %v700_v9 = vpop.f32.mrb[40].mxu1 }
 0x208   : > { %v701_v11 = vadd.f32 %v700_v9, %v4194_v57  ;;  %v702_v17 = vpop.f32.mrb[41].mxu1 }
 0x209   : > { %v703_v19 = vadd.f32 %v702_v17, %v4199_v59  ;;  %1482 = vmatprep.mubr.f32.mxu0 %v1105_v3 }
 0x20a   : > { %1483 = vmatmul.mubr.f32.gmra.mrb[38].mxu0 %v1104_v5  ;;  %v1108_v25 = vmax.f32 %v701_v11, 0.0 }
 0x20b   : > { %v1109_v42 = vmax.f32 %v703_v19, 0.0  ;;  %v706_v6 = vpop.f32.mrb[42].mxu1 }
 0x20c   : > { %v707_v26 = vadd.f32 %v706_v6, %v4194_v57  ;;  %v708_v38 = vpop.f32.mrb[43].mxu1  ;;  %v4284_v6 = vsub.s32 2, %v4178_v40 }
 0x20d   : > { %v709_v39 = vadd.f32 %v708_v38, %v4199_v59  ;;  %1488 = vmatprep.mubr.f32.mxu0 %v1109_v42 }
 0x20e   : > { %1489 = vmatmul.mubr.f32.gmra.mrb[40].mxu0 %v1108_v25  ;;  %v1112_v7 = vmax.f32 %v707_v26, 0.0  ;;  %5399 = vst [vmem:[#allocation18_spill] sm:$0xff] %v4284_v6  ;;  %v508_v26 = vsub.s32 3, %v4178_v40 }
 0x20f   : > { %v1113_v44 = vmax.f32 %v709_v39, 0.0  ;;  %v712_v58 = vpop.f32.mrb[44].mxu1 }
 0x210   : > { %v713_v60 = vadd.f32 %v712_v58, %v4194_v57  ;;  %v714_v13 = vpop.f32.mrb[45].mxu1 }
 0x211   : > { %v715_v14 = vadd.f32 %v714_v13, %v4199_v59  ;;  %1494 = vmatprep.mubr.f32.mxu0 %v1113_v44 }
 0x212   : > { %1495 = vmatmul.mubr.f32.gmra.mrb[42].mxu0 %v1112_v7  ;;  %v1116_v32 = vmax.f32 %v713_v60, 0.0  ;;  %v4291_v60 = vrot.slane %v4186_v49, %v4284_v6 }
 0x213   : > { %v1117_v31 = vmax.f32 %v715_v14, 0.0  ;;  %v718_v18 = vpop.f32.mrb[46].mxu1  ;;  %v4295_v14 = vrot.slane %v4186_v49, %v508_v26 }
 0x214   : > { %v719_v46 = vadd.f32 %v718_v18, %v4194_v57  ;;  %v720_v52 = vpop.f32.mrb[47].mxu1 }
 0x215   : > { %v721_v53 = vadd.f32 %v720_v52, %v4199_v59  ;;  %1500 = vmatprep.mubr.f32.mxu0 %v1117_v31 }
 0x216   : > { %1501 = vmatmul.mubr.f32.gmra.mrb[44].mxu0 %v1116_v32  ;;  %v1120_v27 = vmax.f32 %v719_v46, 0.0 }
 0x217   : > { %v1121_v8 = vmax.f32 %v721_v53, 0.0  ;;  %v724_v10 = vpop.f32.mrb[48].mxu1 }
 0x218   : > { %v725_v48 = vadd.f32 %v724_v10, %v4194_v57  ;;  %v726_v30 = vpop.f32.mrb[49].mxu1 }
 0x219   : > { %v727_v33 = vadd.f32 %v726_v30, %v4199_v59  ;;  %1506 = vmatprep.mubr.f32.mxu0 %v1121_v8 }
 0x21a   : > { %1507 = vmatmul.mubr.f32.gmra.mrb[46].mxu0 %v1120_v27  ;;  %v1124_v62 = vmax.f32 %v725_v48, 0.0 }
 0x21b   : > { %v1125_v55 = vmax.f32 %v727_v33, 0.0  ;;  %v730_v29 = vpop.f32.mrb[50].mxu1 }
 0x21c   : > { %v731_v15 = vadd.f32 %v730_v29, %v4194_v57  ;;  %v732_v20 = vpop.f32.mrb[51].mxu1 }
 0x21d   : > { %v733_v50 = vadd.f32 %v732_v20, %v4199_v59  ;;  %1512 = vmatprep.mubr.f32.mxu0 %v1125_v55 }
 0x21e   : > { %1513 = vmatmul.mubr.f32.gmra.mrb[48].mxu0 %v1124_v62  ;;  %v1128_v45 = vmax.f32 %v731_v15, 0.0 }
 0x21f   : > { %v1129_v28 = vmax.f32 %v733_v50, 0.0  ;;  %v736_v34 = vpop.f32.mrb[52].mxu1 }
 0x220   : > { %v737_v36 = vadd.f32 %v736_v34, %v4194_v57  ;;  %v738_v47 = vpop.f32.mrb[53].mxu1 }
 0x221   : > { %v739_v56 = vadd.f32 %v738_v47, %v4199_v59  ;;  %1518 = vmatprep.mubr.f32.mxu0 %v1129_v28 }
 0x222   : > { %1519 = vmatmul.mubr.f32.gmra.mrb[50].mxu0 %v1128_v45  ;;  %v1132_v16 = vmax.f32 %v737_v36, 0.0 }
 0x223   : > { %v1133_v63 = vmax.f32 %v739_v56, 0.0  ;;  %v742_v2 = vpop.f32.mrb[54].mxu1 }
 0x224   : > { %v743_v21 = vadd.f32 %v742_v2, %v4194_v57  ;;  %v744_v35 = vpop.f32.mrb[55].mxu1 }
 0x225   : > { %v745_v37 = vadd.f32 %v744_v35, %v4199_v59  ;;  %1524 = vmatprep.mubr.f32.mxu0 %v1133_v63 }
 0x226   : > { %1525 = vmatmul.mubr.f32.gmra.mrb[52].mxu0 %v1132_v16  ;;  %v1136_v61 = vmax.f32 %v743_v21, 0.0 }
 0x227   : > { %v1137_v0 = vmax.f32 %v745_v37, 0.0  ;;  %v748_v54 = vpop.f32.mrb[56].mxu1 }
 0x228   : > { %v749_v12 = vadd.f32 %v748_v54, %v4194_v57  ;;  %v750_v22 = vpop.f32.mrb[57].mxu1 }
 0x229   : > { %v751_v4 = vadd.f32 %v750_v22, %v4199_v59  ;;  %1530 = vmatprep.mubr.f32.mxu0 %v1137_v0 }
 0x22a   : > { %1531 = vmatmul.mubr.f32.gmra.mrb[54].mxu0 %v1136_v61  ;;  %v1140_v24 = vmax.f32 %v749_v12, 0.0 }
 0x22b   : > { %v1141_v23 = vmax.f32 %v751_v4, 0.0  ;;  %v754_v41 = vpop.f32.mrb[58].mxu1 }
 0x22c   : > { %v755_v1 = vadd.f32 %v754_v41, %v4194_v57  ;;  %v756_v3 = vpop.f32.mrb[59].mxu1 }
 0x22d   : > { %v757_v9 = vadd.f32 %v756_v3, %v4199_v59  ;;  %1536 = vmatprep.mubr.f32.mxu0 %v1141_v23 }
 0x22e   : > { %1537 = vmatmul.mubr.f32.gmra.mrb[56].mxu0 %v1140_v24  ;;  %v1144_v17 = vmax.f32 %v755_v1, 0.0 }
 0x22f   : > { %v1145_v5 = vmax.f32 %v757_v9, 0.0  ;;  %v760_v11 = vpop.f32.mrb[60].mxu1 }
 0x230   : > { %v761_v19 = vadd.f32 %v760_v11, %v4194_v57  ;;  %v762_v42 = vpop.f32.mrb[61].mxu1 }
 0x231   : > { %v763_v25 = vadd.f32 %v762_v42, %v4199_v59  ;;  %1542 = vmatprep.mubr.f32.mxu0 %v1145_v5 }
 0x232   : > { %1543 = vmatmul.mubr.f32.gmra.mrb[58].mxu0 %v1144_v17  ;;  %v1148_v44 = vmax.f32 %v761_v19, 0.0 }
 0x233   : > { %v1149_v38 = vmax.f32 %v763_v25, 0.0  ;;  %v766_v39 = vpop.f32.mrb[62].mxu1 }
 0x234   : > { %v767_v58 = vadd.f32 %v766_v39, %v4194_v57  ;;  %v768_v7 = vpop.f32.mrb[63].mxu1 }
 0x235   : > { %v769_v13 = vadd.f32 %v768_v7, %v4199_v59  ;;  %1548 = vmatprep.mubr.f32.mxu0 %v1149_v38 }
 0x236   : > { %1549 = vmatmul.mubr.f32.gmra.mrb[60].mxu0 %v1148_v44  ;;  %v1152_v32 = vmax.f32 %v767_v58, 0.0 }
 0x237   : > { %v1153_v31 = vmax.f32 %v769_v13, 0.0  ;;  %v837_v18 = vpop.f32.mrb[64].mxu1 }
 0x238   : > { %v838_v46 = vadd.f32 %v837_v18, %v4291_v60  ;;  %v839_v52 = vpop.f32.mrb[65].mxu1 }
 0x239   : > { %v840_v57 = vadd.f32 %v839_v52, %v4295_v14  ;;  %1554 = vmatprep.mubr.f32.mxu0 %v1153_v31 }
 0x23a   : > { %1555 = vmatmul.mubr.f32.gmra.mrb[62].mxu0 %v1152_v32  ;;  %v1030_v10 = vmax.f32 %v838_v46, 0.0 }
 0x23b   : > { %v1031_v53 = vmax.f32 %v840_v57, 0.0  ;;  %v843_v8 = vpop.f32.mrb[66].mxu1 }
 0x23c   : > { %v844_v59 = vadd.f32 %v843_v8, %v4291_v60  ;;  %v845_v27 = vpop.f32.mrb[67].mxu1 }
 0x23d   : > { %v846_v49 = vadd.f32 %v845_v27, %v4295_v14  ;;  %1625 = vmatprep.mubr.f32.mxu0 %v1031_v53 }
 0x23e   : > { %1626 = vmatmul.mubr.f32.vlgmr.msra.gmra.mrb[0].mxu0 %v1030_v10  ;;  %v1034_v33 = vmax.f32 %v844_v59, 0.0 }
 0x23f   : > { %v1035_v48 = vmax.f32 %v846_v49, 0.0  ;;  %v849_v30 = vpop.f32.mrb[68].mxu1 }
 0x240   : > { %v850_v55 = vadd.f32 %v849_v30, %v4291_v60  ;;  %v851_v29 = vpop.f32.mrb[69].mxu1 }
 0x241   : > { %v852_v62 = vadd.f32 %v851_v29, %v4295_v14  ;;  %1631 = vmatprep.mubr.f32.mxu0 %v1035_v48 }
 0x242   : > { %1632 = vmatmul.mubr.f32.gmra.mrb[2].mxu0 %v1034_v33  ;;  %v1038_v50 = vmax.f32 %v850_v55, 0.0 }
 0x243   : > { %v1039_v15 = vmax.f32 %v852_v62, 0.0  ;;  %v855_v20 = vpop.f32.mrb[70].mxu1 }
 0x244   : > { %v856_v28 = vadd.f32 %v855_v20, %v4291_v60  ;;  %v857_v34 = vpop.f32.mrb[71].mxu1 }
 0x245   : > { %v858_v45 = vadd.f32 %v857_v34, %v4295_v14  ;;  %1637 = vmatprep.mubr.f32.mxu0 %v1039_v15 }
 0x246   : > { %1638 = vmatmul.mubr.f32.gmra.mrb[4].mxu0 %v1038_v50  ;;  %v1042_v56 = vmax.f32 %v856_v28, 0.0 }
 0x247   : > { %v1043_v36 = vmax.f32 %v858_v45, 0.0  ;;  %v861_v47 = vpop.f32.mrb[72].mxu1 }
 0x248   : > { %v862_v63 = vadd.f32 %v861_v47, %v4291_v60  ;;  %v863_v2 = vpop.f32.mrb[73].mxu1 }
 0x249   : > { %v864_v16 = vadd.f32 %v863_v2, %v4295_v14  ;;  %1643 = vmatprep.mubr.f32.mxu0 %v1043_v36 }
 0x24a   : > { %1644 = vmatmul.mubr.f32.gmra.mrb[6].mxu0 %v1042_v56  ;;  %v1046_v37 = vmax.f32 %v862_v63, 0.0 }
 0x24b   : > { %v1047_v21 = vmax.f32 %v864_v16, 0.0  ;;  %v867_v35 = vpop.f32.mrb[74].mxu1 }
 0x24c   : > { %v868_v0 = vadd.f32 %v867_v35, %v4291_v60  ;;  %v869_v54 = vpop.f32.mrb[75].mxu1 }
 0x24d   : > { %v870_v61 = vadd.f32 %v869_v54, %v4295_v14  ;;  %1649 = vmatprep.mubr.f32.mxu0 %v1047_v21 }
 0x24e   : > { %1650 = vmatmul.mubr.f32.gmra.mrb[8].mxu0 %v1046_v37  ;;  %v1050_v4 = vmax.f32 %v868_v0, 0.0 }
 0x24f   : > { %v1051_v12 = vmax.f32 %v870_v61, 0.0  ;;  %v873_v22 = vpop.f32.mrb[76].mxu1 }
 0x250   : > { %v874_v23 = vadd.f32 %v873_v22, %v4291_v60  ;;  %v875_v41 = vpop.f32.mrb[77].mxu1 }
 0x251   : > { %v876_v24 = vadd.f32 %v875_v41, %v4295_v14  ;;  %1655 = vmatprep.mubr.f32.mxu0 %v1051_v12 }
 0x252   : > { %1656 = vmatmul.mubr.f32.gmra.mrb[10].mxu0 %v1050_v4  ;;  %v1054_v9 = vmax.f32 %v874_v23, 0.0 }
 0x253   : > { %v1055_v1 = vmax.f32 %v876_v24, 0.0  ;;  %v879_v3 = vpop.f32.mrb[78].mxu1 }
 0x254   : > { %v880_v5 = vadd.f32 %v879_v3, %v4291_v60  ;;  %v881_v11 = vpop.f32.mrb[79].mxu1 }
 0x255   : > { %v882_v17 = vadd.f32 %v881_v11, %v4295_v14  ;;  %1661 = vmatprep.mubr.f32.mxu0 %v1055_v1 }
 0x256   : > { %1662 = vmatmul.mubr.f32.gmra.mrb[12].mxu0 %v1054_v9  ;;  %v1058_v25 = vmax.f32 %v880_v5, 0.0 }
 0x257   : > { %v1059_v19 = vmax.f32 %v882_v17, 0.0  ;;  %v885_v42 = vpop.f32.mrb[80].mxu1 }
 0x258   : > { %v886_v26 = vadd.f32 %v885_v42, %v4291_v60  ;;  %v887_v38 = vpop.f32.mrb[81].mxu1 }
 0x259   : > { %v888_v39 = vadd.f32 %v887_v38, %v4295_v14  ;;  %1667 = vmatprep.mubr.f32.mxu0 %v1059_v19 }
 0x25a   : > { %1668 = vmatmul.mubr.f32.gmra.mrb[14].mxu0 %v1058_v25  ;;  %v1062_v7 = vmax.f32 %v886_v26, 0.0 }
 0x25b   : > { %v1063_v44 = vmax.f32 %v888_v39, 0.0  ;;  %v891_v58 = vpop.f32.mrb[82].mxu1 }
 0x25c   : > { %v892_v13 = vadd.f32 %v891_v58, %v4291_v60  ;;  %v893_v31 = vpop.f32.mrb[83].mxu1 }
 0x25d   : > { %v894_v18 = vadd.f32 %v893_v31, %v4295_v14  ;;  %1673 = vmatprep.mubr.f32.mxu0 %v1063_v44 }
 0x25e   : > { %1674 = vmatmul.mubr.f32.gmra.mrb[16].mxu0 %v1062_v7  ;;  %v1066_v52 = vmax.f32 %v892_v13, 0.0 }
 0x25f   : > { %v1067_v32 = vmax.f32 %v894_v18, 0.0  ;;  %v897_v46 = vpop.f32.mrb[84].mxu1 }
 0x260   : > { %v898_v57 = vadd.f32 %v897_v46, %v4291_v60  ;;  %v899_v53 = vpop.f32.mrb[85].mxu1 }
 0x261   : > { %v900_v8 = vadd.f32 %v899_v53, %v4295_v14  ;;  %1679 = vmatprep.mubr.f32.mxu0 %v1067_v32 }
 0x262   : > { %1680 = vmatmul.mubr.f32.gmra.mrb[18].mxu0 %v1066_v52  ;;  %v1070_v27 = vmax.f32 %v898_v57, 0.0 }
 0x263   : > { %v1071_v10 = vmax.f32 %v900_v8, 0.0  ;;  %v903_v59 = vpop.f32.mrb[86].mxu1 }
 0x264   : > { %v904_v49 = vadd.f32 %v903_v59, %v4291_v60  ;;  %v905_v48 = vpop.f32.mrb[87].mxu1 }
 0x265   : > { %v906_v30 = vadd.f32 %v905_v48, %v4295_v14  ;;  %1685 = vmatprep.mubr.f32.mxu0 %v1071_v10 }
 0x266   : > { %1686 = vmatmul.mubr.f32.gmra.mrb[20].mxu0 %v1070_v27  ;;  %v1074_v29 = vmax.f32 %v904_v49, 0.0 }
 0x267   : > { %v1075_v33 = vmax.f32 %v906_v30, 0.0  ;;  %v909_v55 = vpop.f32.mrb[88].mxu1 }
 0x268   : > { %v910_v62 = vadd.f32 %v909_v55, %v4291_v60  ;;  %v911_v15 = vpop.f32.mrb[89].mxu1 }
 0x269   : > { %v912_v20 = vadd.f32 %v911_v15, %v4295_v14  ;;  %1691 = vmatprep.mubr.f32.mxu0 %v1075_v33 }
 0x26a   : > { %1692 = vmatmul.mubr.f32.gmra.mrb[22].mxu0 %v1074_v29  ;;  %v1078_v34 = vmax.f32 %v910_v62, 0.0 }
 0x26b   : > { %v1079_v50 = vmax.f32 %v912_v20, 0.0  ;;  %v915_v28 = vpop.f32.mrb[90].mxu1 }
 0x26c   : > { %v916_v45 = vadd.f32 %v915_v28, %v4291_v60  ;;  %v917_v36 = vpop.f32.mrb[91].mxu1 }
 0x26d   : > { %v918_v47 = vadd.f32 %v917_v36, %v4295_v14  ;;  %1697 = vmatprep.mubr.f32.mxu0 %v1079_v50 }
 0x26e   : > { %1698 = vmatmul.mubr.f32.gmra.mrb[24].mxu0 %v1078_v34  ;;  %v1082_v2 = vmax.f32 %v916_v45, 0.0 }
 0x26f   : > { %v1083_v56 = vmax.f32 %v918_v47, 0.0  ;;  %v921_v63 = vpop.f32.mrb[92].mxu1 }
 0x270   : > { %v922_v16 = vadd.f32 %v921_v63, %v4291_v60  ;;  %v923_v21 = vpop.f32.mrb[93].mxu1 }
 0x271   : > { %v924_v35 = vadd.f32 %v923_v21, %v4295_v14  ;;  %1703 = vmatprep.mubr.f32.mxu0 %v1083_v56 }
 0x272   : > { %1704 = vmatmul.mubr.f32.gmra.mrb[26].mxu0 %v1082_v2  ;;  %v1086_v54 = vmax.f32 %v922_v16, 0.0 }
 0x273   : > { %v1087_v37 = vmax.f32 %v924_v35, 0.0  ;;  %v927_v0 = vpop.f32.mrb[94].mxu1 }
 0x274   : > { %v928_v61 = vadd.f32 %v927_v0, %v4291_v60  ;;  %v929_v12 = vpop.f32.mrb[95].mxu1 }
 0x275   : > { %v930_v22 = vadd.f32 %v929_v12, %v4295_v14  ;;  %1709 = vmatprep.mubr.f32.mxu0 %v1087_v37 }
 0x276   : > { %1710 = vmatmul.mubr.f32.gmra.mrb[28].mxu0 %v1086_v54  ;;  %v1090_v41 = vmax.f32 %v928_v61, 0.0 }
 0x277   : > { %v1091_v4 = vmax.f32 %v930_v22, 0.0  ;;  %v933_v23 = vpop.f32.mrb[96].mxu1 }
 0x278   : > { %v934_v24 = vadd.f32 %v933_v23, %v4291_v60  ;;  %v935_v1 = vpop.f32.mrb[97].mxu1 }
 0x279   : > { %v936_v3 = vadd.f32 %v935_v1, %v4295_v14  ;;  %1715 = vmatprep.mubr.f32.mxu0 %v1091_v4 }
 0x27a   : > { %1716 = vmatmul.mubr.f32.gmra.mrb[30].mxu0 %v1090_v41  ;;  %v1094_v11 = vmax.f32 %v934_v24, 0.0 }
 0x27b   : > { %v1095_v9 = vmax.f32 %v936_v3, 0.0  ;;  %v939_v5 = vpop.f32.mrb[98].mxu1 }
 0x27c   : > { %v940_v17 = vadd.f32 %v939_v5, %v4291_v60  ;;  %v941_v19 = vpop.f32.mrb[99].mxu1 }
 0x27d   : > { %v942_v42 = vadd.f32 %v941_v19, %v4295_v14  ;;  %1721 = vmatprep.mubr.f32.mxu0 %v1095_v9 }
 0x27e   : > { %1722 = vmatmul.mubr.f32.gmra.mrb[32].mxu0 %v1094_v11  ;;  %v1098_v38 = vmax.f32 %v940_v17, 0.0 }
 0x27f   : > { %v1099_v25 = vmax.f32 %v942_v42, 0.0  ;;  %v945_v26 = vpop.f32.mrb[100].mxu1 }
 0x280   : > { %v946_v39 = vadd.f32 %v945_v26, %v4291_v60  ;;  %v947_v44 = vpop.f32.mrb[101].mxu1 }
 0x281   : > { %v948_v58 = vadd.f32 %v947_v44, %v4295_v14  ;;  %1727 = vmatprep.mubr.f32.mxu0 %v1099_v25 }
 0x282   : > { %1728 = vmatmul.mubr.f32.gmra.mrb[34].mxu0 %v1098_v38  ;;  %v1102_v31 = vmax.f32 %v946_v39, 0.0 }
 0x283   : > { %v1103_v7 = vmax.f32 %v948_v58, 0.0  ;;  %v951_v13 = vpop.f32.mrb[102].mxu1 }
 0x284   : > { %v952_v18 = vadd.f32 %v951_v13, %v4291_v60  ;;  %v953_v32 = vpop.f32.mrb[103].mxu1 }
 0x285   : > { %v954_v46 = vadd.f32 %v953_v32, %v4295_v14  ;;  %1733 = vmatprep.mubr.f32.mxu0 %v1103_v7 }
 0x286   : > { %1734 = vmatmul.mubr.f32.gmra.mrb[36].mxu0 %v1102_v31  ;;  %v1106_v53 = vmax.f32 %v952_v18, 0.0 }
 0x287   : > { %v1107_v52 = vmax.f32 %v954_v46, 0.0  ;;  %v957_v57 = vpop.f32.mrb[104].mxu1 }
 0x288   : > { %v958_v8 = vadd.f32 %v957_v57, %v4291_v60  ;;  %v959_v10 = vpop.f32.mrb[105].mxu1 }
 0x289   : > { %v960_v59 = vadd.f32 %v959_v10, %v4295_v14  ;;  %1739 = vmatprep.mubr.f32.mxu0 %v1107_v52 }
 0x28a   : > { %1740 = vmatmul.mubr.f32.gmra.mrb[38].mxu0 %v1106_v53  ;;  %v1110_v48 = vmax.f32 %v958_v8, 0.0 }
 0x28b   : > { %v1111_v27 = vmax.f32 %v960_v59, 0.0  ;;  %v963_v49 = vpop.f32.mrb[106].mxu1 }
 0x28c   : > { %v964_v30 = vadd.f32 %v963_v49, %v4291_v60  ;;  %v965_v33 = vpop.f32.mrb[107].mxu1 }
 0x28d   : > { %v966_v55 = vadd.f32 %v965_v33, %v4295_v14  ;;  %1745 = vmatprep.mubr.f32.mxu0 %v1111_v27 }
 0x28e   : > { %1746 = vmatmul.mubr.f32.gmra.mrb[40].mxu0 %v1110_v48  ;;  %v1114_v15 = vmax.f32 %v964_v30, 0.0 }
 0x28f   : > { %v1115_v29 = vmax.f32 %v966_v55, 0.0  ;;  %v969_v62 = vpop.f32.mrb[108].mxu1 }
 0x290   : > { %v970_v20 = vadd.f32 %v969_v62, %v4291_v60  ;;  %v971_v50 = vpop.f32.mrb[109].mxu1 }
 0x291   : > { %v972_v28 = vadd.f32 %v971_v50, %v4295_v14  ;;  %1751 = vmatprep.mubr.f32.mxu0 %v1115_v29  ;;  %v1284_v50 = vld [vmem:[#allocation10] sm:$0x77] }
 0x292   : > { %1752 = vmatmul.mubr.f32.gmra.mrb[42].mxu0 %v1114_v15  ;;  %v1118_v36 = vmax.f32 %v970_v20, 0.0 }
 0x293   : > { %v1119_v34 = vmax.f32 %v972_v28, 0.0  ;;  %v975_v45 = vpop.f32.mrb[110].mxu1  ;;  %v1292_v28 = vsub.s32 4, %v4178_v40 }
 0x294   : > { %v976_v47 = vadd.f32 %v975_v45, %v4291_v60  ;;  %v977_v56 = vpop.f32.mrb[111].mxu1 }
 0x295   : > { %v978_v63 = vadd.f32 %v977_v56, %v4295_v14  ;;  %1757 = vmatprep.mubr.f32.mxu0 %v1119_v34  ;;  %v1289_v34 = vrot.slane %v1284_v50, %v4183_v43  ;;  %v1293_v45 = vrot.slane %v1284_v50, %v1292_v28 }
 0x296   : > { %1758 = vmatmul.mubr.f32.gmra.mrb[44].mxu0 %v1118_v36  ;;  %v1122_v21 = vmax.f32 %v976_v47, 0.0 }
 0x297   : > { %v1123_v2 = vmax.f32 %v978_v63, 0.0  ;;  %v981_v16 = vpop.f32.mrb[112].mxu1 }
 0x298   : > { %v982_v35 = vadd.f32 %v981_v16, %v4291_v60  ;;  %v983_v37 = vpop.f32.mrb[113].mxu1 }
 0x299   : > { %v984_v0 = vadd.f32 %v983_v37, %v4295_v14  ;;  %1763 = vmatprep.mubr.f32.mxu0 %v1123_v2  ;;  %v3318_v2 = vld [vmem:[%s3870_s6] sm:$0xff] }
 0x29a   : > { %1764 = vmatmul.mubr.f32.gmra.mrb[46].mxu0 %v1122_v21  ;;  %v1126_v12 = vmax.f32 %v982_v35, 0.0  ;;  %v3319_v35 = vld [vmem:[%s3870_s6 + $0x8] sm:$0xff] }
 0x29b   : > { %v1127_v54 = vmax.f32 %v984_v0, 0.0  ;;  %v987_v61 = vpop.f32.mrb[114].mxu1 }
 0x29c   : > { %v988_v22 = vadd.f32 %v987_v61, %v4291_v60  ;;  %v989_v4 = vpop.f32.mrb[115].mxu1 }
 0x29d   : > { %v990_v23 = vadd.f32 %v989_v4, %v4295_v14  ;;  %1769 = vmatprep.mubr.f32.mxu0 %v1127_v54  ;;  %v3321_v4 = vld [vmem:[%s3870_s6 + $0x18] sm:$0xff] }
 0x29e   : > { %1770 = vmatmul.mubr.f32.gmra.mrb[48].mxu0 %v1126_v12  ;;  %v1130_v1 = vmax.f32 %v988_v22, 0.0  ;;  %v3320_v12 = vld [vmem:[%s3870_s6 + $0x10] sm:$0xff] }
 0x29f   : > { %v1131_v41 = vmax.f32 %v990_v23, 0.0  ;;  %v993_v24 = vpop.f32.mrb[116].mxu1 }
 0x2a0   : > { %v994_v3 = vadd.f32 %v993_v24, %v4291_v60  ;;  %v995_v9 = vpop.f32.mrb[117].mxu1 }
 0x2a1   : > { %v996_v5 = vadd.f32 %v995_v9, %v4295_v14  ;;  %1775 = vmatprep.mubr.f32.mxu0 %v1131_v41 }
 0x2a2   : > { %1776 = vmatmul.mubr.f32.gmra.mrb[50].mxu0 %v1130_v1  ;;  %v1134_v19 = vmax.f32 %v994_v3, 0.0 }
 0x2a3   : > { %v1135_v11 = vmax.f32 %v996_v5, 0.0  ;;  %v999_v17 = vpop.f32.mrb[118].mxu1  ;;  %v3322_v5 = vld [vmem:[%s3870_s6 + $0x20] sm:$0xff] }
 0x2a4   : > { %v1000_v42 = vadd.f32 %v999_v17, %v4291_v60  ;;  %v1001_v25 = vpop.f32.mrb[119].mxu1 }
 0x2a5   : > { %v1002_v26 = vadd.f32 %v1001_v25, %v4295_v14  ;;  %1781 = vmatprep.mubr.f32.mxu0 %v1135_v11 }
 0x2a6   : > { %1782 = vmatmul.mubr.f32.gmra.mrb[52].mxu0 %v1134_v19  ;;  %v1138_v44 = vmax.f32 %v1000_v42, 0.0  ;;  %v3323_v19 = vld [vmem:[%s3870_s6 + $0x28] sm:$0xff] }
 0x2a7   : > { %v1139_v38 = vmax.f32 %v1002_v26, 0.0  ;;  %v1005_v39 = vpop.f32.mrb[120].mxu1 }
 0x2a8   : > { %v1006_v58 = vadd.f32 %v1005_v39, %v4291_v60  ;;  %v1007_v7 = vpop.f32.mrb[121].mxu1 }
 0x2a9   : > { %v1008_v13 = vadd.f32 %v1007_v7, %v4295_v14  ;;  %1787 = vmatprep.mubr.f32.mxu0 %v1139_v38  ;;  %v3325_v7 = vld [vmem:[%s3870_s6 + $0x38] sm:$0xff] }
 0x2aa   : > { %1788 = vmatmul.mubr.f32.gmra.mrb[54].mxu0 %v1138_v44  ;;  %v1142_v32 = vmax.f32 %v1006_v58, 0.0  ;;  %v3324_v44 = vld [vmem:[%s3870_s6 + $0x30] sm:$0xff] }
 0x2ab   : > { %v1143_v31 = vmax.f32 %v1008_v13, 0.0  ;;  %v1011_v18 = vpop.f32.mrb[122].mxu1 }
 0x2ac   : > { %v1012_v46 = vadd.f32 %v1011_v18, %v4291_v60  ;;  %v1013_v52 = vpop.f32.mrb[123].mxu1 }
 0x2ad   : > { %v1014_v57 = vadd.f32 %v1013_v52, %v4295_v14  ;;  %1793 = vmatprep.mubr.f32.mxu0 %v1143_v31 }
 0x2ae   : > { %1794 = vmatmul.mubr.f32.gmra.mrb[56].mxu0 %v1142_v32  ;;  %v1146_v10 = vmax.f32 %v1012_v46, 0.0 }
 0x2af   : > { %v1147_v53 = vmax.f32 %v1014_v57, 0.0  ;;  %v1017_v8 = vpop.f32.mrb[124].mxu1  ;;  %v3326_v57 = vld [vmem:[%s3870_s6 + $0x40] sm:$0xff] }
 0x2b0   : > { %v1018_v59 = vadd.f32 %v1017_v8, %v4291_v60  ;;  %v1019_v27 = vpop.f32.mrb[125].mxu1  ;;  %v3327_v8 = vld [vmem:[%s3870_s6 + $0x48] sm:$0xff] }
 0x2b1   : > { %v1020_v49 = vadd.f32 %v1019_v27, %v4295_v14  ;;  %1799 = vmatprep.mubr.f32.mxu0 %v1147_v53 }
 0x2b2   : > { %1800 = vmatmul.mubr.f32.gmra.mrb[58].mxu0 %v1146_v10  ;;  %v1150_v33 = vmax.f32 %v1018_v59, 0.0 }
 0x2b3   : > { %v1151_v48 = vmax.f32 %v1020_v49, 0.0  ;;  %v1023_v30 = vpop.f32.mrb[126].mxu1 }
 0x2b4   : > { %v1024_v55 = vadd.f32 %v1023_v30, %v4291_v60  ;;  %v1025_v29 = vpop.f32.mrb[127].mxu1  ;;  %v4364_v60 = vrot.slane %v1289_v34, %v4183_v43 }
 0x2b5   : > { %v1026_v62 = vadd.f32 %v1025_v29, %v4295_v14  ;;  %1805 = vmatprep.mubr.f32.mxu0 %v1151_v48  ;;  %v4367_v14 = vrot.slane %v1293_v45, %v4183_v43  ;;  %v3329_v29 = vld [vmem:[%s3870_s6 + $0x58] sm:$0xff]  ;;  %v3330_v45 = vld [vmem:[%s3870_s6 + $0x60] sm:$0xff] }
 0x2b6   : > { %1806 = vmatmul.mubr.f32.gmra.mrb[60].mxu0 %v1150_v33  ;;  %v1154_v20 = vmax.f32 %v1024_v55, 0.0  ;;  %v3328_v33 = vld [vmem:[%s3870_s6 + $0x50] sm:$0xff] }
 0x2b7   : > { %v1155_v15 = vmax.f32 %v1026_v62, 0.0 }
 0x2b9   : > { %1811 = vmatprep.mubr.f32.mxu0 %v1155_v15 }
 0x2ba   : > { %1812 = vmatmul.mubr.f32.gmra.mrb[62].mxu0 %v1154_v20 }
 0x311   : > { %v1627_v36 = vpop.f32.mrb[0].mxu0 }
 0x312   : > { %v3033_v47 = vadd.f32 %v1627_v36, %v4364_v60  ;;  %v1629_v56 = vpop.f32.mrb[1].mxu0 }
 0x313   : > { %v3034_v63 = vadd.f32 %v1629_v56, %v4367_v14 }
 0x314   : > { %v4372_v16 = vadd.f32 %v3318_v2, %v3033_v47  ;;  %v3331_v47 = vld [vmem:[%s3870_s6 + $0x68] sm:$0xff] }
 0x315   : > { %v1633_v21 = vpop.f32.mrb[2].mxu0  ;;  %v4375_v37 = vadd.f32 %v3319_v35, %v3034_v63 }
 0x316   : > { %v3035_v0 = vadd.f32 %v1633_v21, %v4364_v60  ;;  %v1635_v54 = vpop.f32.mrb[3].mxu0 }
 0x317   : > { %v3036_v43 = vadd.f32 %v1635_v54, %v4367_v14  ;;  %v1882_v61 = vadd.f32 %v4375_v37, %v4372_v16  ;;  %v3332_v54 = vld [vmem:[%s3870_s6 + $0x70] sm:$0xff] }
 0x318   : > { %v4382_v22 = vadd.f32 %v3320_v12, %v3035_v0 }
 0x319   : > { %v4385_v23 = vadd.f32 %v3321_v4, %v3036_v43  ;;  %v1639_v41 = vpop.f32.mrb[4].mxu0  ;;  %1883 = vadd.xlane.f32.xlu0 %v1882_v61  ;;  %v3333_v61 = vld [vmem:[%s3870_s6 + $0x78] sm:$0xff] }
 0x31a   : > { %v3037_v24 = vadd.f32 %v1639_v41, %v4364_v60  ;;  %v1641_v1 = vpop.f32.mrb[5].mxu0 }
 0x31b   : > { %v3038_v3 = vadd.f32 %v1641_v1, %v4367_v14  ;;  %v1885_v9 = vadd.f32 %v4385_v23, %v4382_v22 }
 0x31c   : > { %v4392_v11 = vadd.f32 %v3322_v5, %v3037_v24 }
 0x31d   : > { %v1645_v17 = vpop.f32.mrb[6].mxu0  ;;  %1886 = vadd.xlane.f32.xlu0 %v1885_v9  ;;  %v4395_v42 = vadd.f32 %v3323_v19, %v3038_v3  ;;  %v3334_v9 = vld [vmem:[%s3870_s6 + $0x80] sm:$0xff] }
 0x31e   : > { %v3039_v25 = vadd.f32 %v1645_v17, %v4364_v60  ;;  %v1647_v26 = vpop.f32.mrb[7].mxu0  ;;  %v3335_v17 = vld [vmem:[%s3870_s6 + $0x88] sm:$0xff] }
 0x31f   : > { %v3040_v38 = vadd.f32 %v1647_v26, %v4367_v14  ;;  %v1888_v39 = vadd.f32 %v4395_v42, %v4392_v11 }
 0x320   : > { %v4402_v58 = vadd.f32 %v3324_v44, %v3039_v25 }
 0x321   : > { %v4405_v13 = vadd.f32 %v3325_v7, %v3040_v38  ;;  %v1651_v31 = vpop.f32.mrb[8].mxu0  ;;  %1889 = vadd.xlane.f32.xlu1 %v1888_v39  ;;  %v3336_v7 = vld [vmem:[%s3870_s6 + $0x90] sm:$0xff] }
 0x322   : > { %v3041_v18 = vadd.f32 %v1651_v31, %v4364_v60  ;;  %v1653_v32 = vpop.f32.mrb[9].mxu0 }
 0x323   : > { %v3042_v46 = vadd.f32 %v1653_v32, %v4367_v14  ;;  %v1891_v52 = vadd.f32 %v4405_v13, %v4402_v58 }
 0x324   : > { %v4412_v53 = vadd.f32 %v3326_v57, %v3041_v18  ;;  %v3337_v18 = vld [vmem:[%s3870_s6 + $0x98] sm:$0xff] }
 0x325   : > { %v4415_v10 = vadd.f32 %v3327_v8, %v3042_v46  ;;  %v1657_v59 = vpop.f32.mrb[10].mxu0  ;;  %1892 = vadd.xlane.f32.xlu1 %v1891_v52 }
 0x326   : > { %v3043_v27 = vadd.f32 %v1657_v59, %v4364_v60  ;;  %v1659_v49 = vpop.f32.mrb[11].mxu0 }
 0x327   : > { %v3044_v48 = vadd.f32 %v1659_v49, %v4367_v14  ;;  %v1894_v30 = vadd.f32 %v4415_v10, %v4412_v53 }
 0x328   : > { %v4422_v55 = vadd.f32 %v3328_v33, %v3043_v27  ;;  %v3338_v27 = vld [vmem:[%s3870_s6 + $0xa0] sm:$0xff] }
 0x329   : > { %v4425_v62 = vadd.f32 %v3329_v29, %v3044_v48  ;;  %v1663_v15 = vpop.f32.mrb[12].mxu0  ;;  %1895 = vadd.xlane.f32.xlu0 %v1894_v30  ;;  %v3339_v48 = vld [vmem:[%s3870_s6 + $0xa8] sm:$0xff] }
 0x32a   : > { %v3045_v20 = vadd.f32 %v1663_v15, %v4364_v60  ;;  %v1665_v50 = vpop.f32.mrb[13].mxu0 }
 0x32b   : > { %v3046_v28 = vadd.f32 %v1665_v50, %v4367_v14  ;;  %v1897_v34 = vadd.f32 %v4425_v62, %v4422_v55 }
 0x32c   : > { %v4432_v36 = vadd.f32 %v3330_v45, %v3045_v20  ;;  %v3341_v45 = vld [vmem:[%s3870_s6 + $0xb8] sm:$0xff] }
 0x32d   : > { %v4435_v56 = vadd.f32 %v3331_v47, %v3046_v28  ;;  %v1669_v63 = vpop.f32.mrb[14].mxu0  ;;  %1898 = vadd.xlane.f32.xlu1 %v1897_v34  ;;  %v3340_v28 = vld [vmem:[%s3870_s6 + $0xb0] sm:$0xff] }
 0x32e   : > { %v3047_v2 = vadd.f32 %v1669_v63, %v4364_v60  ;;  %v1671_v21 = vpop.f32.mrb[15].mxu0 }
 0x32f   : > { %v3048_v35 = vadd.f32 %v1671_v21, %v4367_v14  ;;  %v1900_v0 = vadd.f32 %v4435_v56, %v4432_v36 }
 0x330   : > { %v4442_v43 = vadd.f32 %v3332_v54, %v3047_v2  ;;  %v3342_v54 = vld [vmem:[%s3870_s6 + $0xc0] sm:$0xff] }
 0x331   : > { %v4445_v12 = vadd.f32 %v3333_v61, %v3048_v35  ;;  %v1675_v4 = vpop.f32.mrb[16].mxu0  ;;  %1901 = vadd.xlane.f32.xlu0 %v1900_v0 }
 0x332   : > { %v3049_v41 = vadd.f32 %v1675_v4, %v4364_v60  ;;  %v1677_v24 = vpop.f32.mrb[17].mxu0  ;;  %v3343_v4 = vld [vmem:[%s3870_s6 + $0xc8] sm:$0xff] }
 0x333   : > { %v3050_v1 = vadd.f32 %v1677_v24, %v4367_v14  ;;  %v1903_v3 = vadd.f32 %v4445_v12, %v4442_v43 }
 0x334   : > { %v4452_v5 = vadd.f32 %v3334_v9, %v3049_v41 }
 0x335   : > { %v4455_v19 = vadd.f32 %v3335_v17, %v3050_v1  ;;  %v1681_v25 = vpop.f32.mrb[18].mxu0  ;;  %1904 = vadd.xlane.f32.xlu1 %v1903_v3 }
 0x336   : > { %v3051_v26 = vadd.f32 %v1681_v25, %v4364_v60  ;;  %v1683_v38 = vpop.f32.mrb[19].mxu0  ;;  %v3344_v25 = vld [vmem:[%s3870_s6 + $0xd0] sm:$0xff] }
 0x337   : > { %v3052_v39 = vadd.f32 %v1683_v38, %v4367_v14  ;;  %v1906_v44 = vadd.f32 %v4455_v19, %v4452_v5  ;;  %v3345_v38 = vld [vmem:[%s3870_s6 + $0xd8] sm:$0xff] }
 0x338   : > { %v4462_v31 = vadd.f32 %v3336_v7, %v3051_v26 }
 0x339   : > { %v4465_v32 = vadd.f32 %v3337_v18, %v3052_v39  ;;  %v1687_v46 = vpop.f32.mrb[20].mxu0  ;;  %1907 = vadd.xlane.f32.xlu0 %v1906_v44 }
 0x33a   : > { %v3053_v52 = vadd.f32 %v1687_v46, %v4364_v60  ;;  %v1689_v57 = vpop.f32.mrb[21].mxu0 }
 0x33b   : > { %v3054_v8 = vadd.f32 %v1689_v57, %v4367_v14  ;;  %v1909_v59 = vadd.f32 %v4465_v32, %v4462_v31  ;;  %v3346_v57 = vld [vmem:[%s3870_s6 + $0xe0] sm:$0xff] }
 0x33c   : > { %v4472_v49 = vadd.f32 %v3338_v27, %v3053_v52 }
 0x33d   : > { %v4475_v30 = vadd.f32 %v3339_v48, %v3054_v8  ;;  %v1693_v33 = vpop.f32.mrb[22].mxu0  ;;  %1910 = vadd.xlane.f32.xlu1 %v1909_v59  ;;  %v3347_v59 = vld [vmem:[%s3870_s6 + $0xe8] sm:$0xff] }
 0x33e   : > { %v3055_v29 = vadd.f32 %v1693_v33, %v4364_v60  ;;  %v1695_v15 = vpop.f32.mrb[23].mxu0 }
 0x33f   : > { %v3056_v20 = vadd.f32 %v1695_v15, %v4367_v14  ;;  %v1912_v50 = vadd.f32 %v4475_v30, %v4472_v49 }
 0x340   : > { %v4482_v34 = vadd.f32 %v3340_v28, %v3055_v29 }
 0x341   : > { %v4485_v47 = vadd.f32 %v3341_v45, %v3056_v20  ;;  %v1699_v63 = vpop.f32.mrb[24].mxu0  ;;  %1913 = vadd.xlane.f32.xlu0 %v1912_v50  ;;  %v3348_v50 = vld [vmem:[%s3870_s6 + $0xf0] sm:$0xff]  ;;  %v3349_v45 = vld [vmem:[%s3870_s6 + $0xf8] sm:$0xff] }
 0x342   : > { %v3057_v2 = vadd.f32 %v1699_v63, %v4364_v60  ;;  %v1701_v21 = vpop.f32.mrb[25].mxu0 }
 0x343   : > { %v3058_v35 = vadd.f32 %v1701_v21, %v4367_v14  ;;  %v1915_v0 = vadd.f32 %v4485_v47, %v4482_v34 }
 0x344   : > { %v4492_v61 = vadd.f32 %v3342_v54, %v3057_v2 }
 0x345   : > { %v4495_v41 = vadd.f32 %v3343_v4, %v3058_v35  ;;  %v1705_v24 = vpop.f32.mrb[26].mxu0  ;;  %1916 = vadd.xlane.f32.xlu1 %v1915_v0  ;;  %v3350_v4 = vld [vmem:[%s3870_s6 + $0x100] sm:$0xff] }
 0x346   : > { %v3059_v1 = vadd.f32 %v1705_v24, %v4364_v60  ;;  %v1707_v3 = vpop.f32.mrb[27].mxu0 }
 0x347   : > { %v3060_v9 = vadd.f32 %v1707_v3, %v4367_v14  ;;  %v1918_v17 = vadd.f32 %v4495_v41, %v4492_v61 }
 0x348   : > { %v4502_v26 = vadd.f32 %v3344_v25, %v3059_v1  ;;  %v3351_v1 = vld [vmem:[%s3870_s6 + $0x108] sm:$0xff] }
 0x349   : > { %v4505_v39 = vadd.f32 %v3345_v38, %v3060_v9  ;;  %v1711_v44 = vpop.f32.mrb[28].mxu0  ;;  %1919 = vadd.xlane.f32.xlu0 %v1918_v17 }
 0x34a   : > { %v3061_v7 = vadd.f32 %v1711_v44, %v4364_v60  ;;  %v1713_v18 = vpop.f32.mrb[29].mxu0 }
 0x34b   : > { %v3062_v46 = vadd.f32 %v1713_v18, %v4367_v14  ;;  %v1921_v52 = vadd.f32 %v4505_v39, %v4502_v26 }
 0x34c   : > { %v4512_v8 = vadd.f32 %v3346_v57, %v3061_v7  ;;  %v3352_v7 = vld [vmem:[%s3870_s6 + $0x110] sm:$0xff] }
 0x34d   : > { %v4515_v27 = vadd.f32 %v3347_v59, %v3062_v46  ;;  %v1717_v48 = vpop.f32.mrb[30].mxu0  ;;  %1922 = vadd.xlane.f32.xlu1 %v1921_v52  ;;  %v3353_v46 = vld [vmem:[%s3870_s6 + $0x118] sm:$0xff] }
 0x34e   : > { %v3063_v33 = vadd.f32 %v1717_v48, %v4364_v60  ;;  %v1719_v29 = vpop.f32.mrb[31].mxu0 }
 0x34f   : > { %v3064_v15 = vadd.f32 %v1719_v29, %v4367_v14  ;;  %v1924_v20 = vadd.f32 %v4515_v27, %v4512_v8 }
 0x350   : > { %v4522_v28 = vadd.f32 %v3348_v50, %v3063_v33  ;;  %v3355_v50 = vld [vmem:[%s3870_s6 + $0x128] sm:$0xff] }
 0x351   : > { %v4525_v63 = vadd.f32 %v3349_v45, %v3064_v15  ;;  %v1723_v2 = vpop.f32.mrb[32].mxu0  ;;  %1925 = vadd.xlane.f32.xlu0 %v1924_v20  ;;  %v3354_v15 = vld [vmem:[%s3870_s6 + $0x120] sm:$0xff] }
 0x352   : > { %v3065_v21 = vadd.f32 %v1723_v2, %v4364_v60  ;;  %v1725_v35 = vpop.f32.mrb[33].mxu0 }
 0x353   : > { %v3066_v0 = vadd.f32 %v1725_v35, %v4367_v14  ;;  %v1927_v54 = vadd.f32 %v4525_v63, %v4522_v28 }
 0x354   : > { %v4532_v24 = vadd.f32 %v3350_v4, %v3065_v21  ;;  %v3356_v4 = vld [vmem:[%s3870_s6 + $0x130] sm:$0xff] }
 0x355   : > { %v4535_v3 = vadd.f32 %v3351_v1, %v3066_v0  ;;  %v1729_v9 = vpop.f32.mrb[34].mxu0  ;;  %1928 = vadd.xlane.f32.xlu1 %v1927_v54 }
 0x356   : > { %v3067_v17 = vadd.f32 %v1729_v9, %v4364_v60  ;;  %v1731_v25 = vpop.f32.mrb[35].mxu0  ;;  %v3357_v9 = vld [vmem:[%s3870_s6 + $0x138] sm:$0xff] }
 0x357   : > { %v3068_v38 = vadd.f32 %v1731_v25, %v4367_v14  ;;  %v1930_v44 = vadd.f32 %v4535_v3, %v4532_v24 }
 0x358   : > { %v4542_v18 = vadd.f32 %v3352_v7, %v3067_v17 }
 0x359   : > { %v4545_v52 = vadd.f32 %v3353_v46, %v3068_v38  ;;  %v1735_v57 = vpop.f32.mrb[36].mxu0  ;;  %1931 = vadd.xlane.f32.xlu0 %v1930_v44 }
 0x35a   : > { %v3069_v59 = vadd.f32 %v1735_v57, %v4364_v60  ;;  %v1737_v48 = vpop.f32.mrb[37].mxu0  ;;  %v3358_v57 = vld [vmem:[%s3870_s6 + $0x140] sm:$0xff] }
 0x35b   : > { %v3070_v33 = vadd.f32 %v1737_v48, %v4367_v14  ;;  %v1933_v29 = vadd.f32 %v4545_v52, %v4542_v18  ;;  %v3359_v48 = vld [vmem:[%s3870_s6 + $0x148] sm:$0xff] }
 0x35c   : > { %v4552_v20 = vadd.f32 %v3354_v15, %v3069_v59 }
 0x35d   : > { %v4555_v45 = vadd.f32 %v3355_v50, %v3070_v33  ;;  %v1741_v2 = vpop.f32.mrb[38].mxu0  ;;  %1934 = vadd.xlane.f32.xlu1 %v1933_v29 }
 0x35e   : > { %v3071_v21 = vadd.f32 %v1741_v2, %v4364_v60  ;;  %v1743_v35 = vpop.f32.mrb[39].mxu0 }
 0x35f   : > { %v3072_v0 = vadd.f32 %v1743_v35, %v4367_v14  ;;  %v1936_v54 = vadd.f32 %v4555_v45, %v4552_v20  ;;  %v3360_v35 = vld [vmem:[%s3870_s6 + $0x150] sm:$0xff] }
 0x360   : > { %v4562_v1 = vadd.f32 %v3356_v4, %v3071_v21 }
 0x361   : > { %v4565_v17 = vadd.f32 %v3357_v9, %v3072_v0  ;;  %v1747_v25 = vpop.f32.mrb[40].mxu0  ;;  %1937 = vadd.xlane.f32.xlu0 %v1936_v54  ;;  %v3361_v54 = vld [vmem:[%s3870_s6 + $0x158] sm:$0xff] }
 0x362   : > { %v3073_v38 = vadd.f32 %v1747_v25, %v4364_v60  ;;  %v1749_v44 = vpop.f32.mrb[41].mxu0 }
 0x363   : > { %v3074_v7 = vadd.f32 %v1749_v44, %v4367_v14  ;;  %v1939_v46 = vadd.f32 %v4565_v17, %v4562_v1 }
 0x364   : > { %v4572_v59 = vadd.f32 %v3358_v57, %v3073_v38 }
 0x365   : > { %v4575_v33 = vadd.f32 %v3359_v48, %v3074_v7  ;;  %v1753_v29 = vpop.f32.mrb[42].mxu0  ;;  %1940 = vadd.xlane.f32.xlu1 %v1939_v46  ;;  %v3362_v46 = vld [vmem:[%s3870_s6 + $0x160] sm:$0xff]  ;;  %v3363_v48 = vld [vmem:[%s3870_s6 + $0x168] sm:$0xff] }
 0x366   : > { %v3075_v15 = vadd.f32 %v1753_v29, %v4364_v60  ;;  %v1755_v50 = vpop.f32.mrb[43].mxu0 }
 0x367   : > { %v3076_v2 = vadd.f32 %v1755_v50, %v4367_v14  ;;  %v1942_v21 = vadd.f32 %v4575_v33, %v4572_v59 }
 0x368   : > { %v4582_v0 = vadd.f32 %v3360_v35, %v3075_v15 }
 0x369   : > { %v4585_v4 = vadd.f32 %v3361_v54, %v3076_v2  ;;  %v1759_v9 = vpop.f32.mrb[44].mxu0  ;;  %1943 = vadd.xlane.f32.xlu0 %v1942_v21  ;;  %v3364_v54 = vld [vmem:[%s3870_s6 + $0x170] sm:$0xff] }
 0x36a   : > { %v3077_v25 = vadd.f32 %v1759_v9, %v4364_v60  ;;  %v1761_v38 = vpop.f32.mrb[45].mxu0 }
 0x36b   : > { %v3078_v44 = vadd.f32 %v1761_v38, %v4367_v14  ;;  %v1945_v7 = vadd.f32 %v4585_v4, %v4582_v0 }
 0x36c   : > { %v4592_v57 = vadd.f32 %v3362_v46, %v3077_v25  ;;  %v3365_v25 = vld [vmem:[%s3870_s6 + $0x178] sm:$0xff] }
 0x36d   : > { %v4595_v29 = vadd.f32 %v3363_v48, %v3078_v44  ;;  %v1765_v15 = vpop.f32.mrb[46].mxu0  ;;  %1946 = vadd.xlane.f32.xlu1 %v1945_v7 }
 0x36e   : > { %v3079_v50 = vadd.f32 %v1765_v15, %v4364_v60  ;;  %v1767_v2 = vpop.f32.mrb[47].mxu0 }
 0x36f   : > { %v3080_v21 = vadd.f32 %v1767_v2, %v4367_v14  ;;  %v1948_v35 = vadd.f32 %v4595_v29, %v4592_v57  ;;  %v3366_v2 = vld [vmem:[%s3870_s6 + $0x180] sm:$0xff] }
 0x370   : > { %v4602_v9 = vadd.f32 %v3364_v54, %v3079_v50  ;;  %v3367_v50 = vld [vmem:[%s3870_s6 + $0x188] sm:$0xff] }
 0x371   : > { %v4605_v38 = vadd.f32 %v3365_v25, %v3080_v21  ;;  %v1771_v44 = vpop.f32.mrb[48].mxu0  ;;  %1949 = vadd.xlane.f32.xlu0 %v1948_v35 }
 0x372   : > { %5400 = vst [vmem:[#allocation19_spill] sm:$0xff] %v4602_v9  ;;  %v3081_v7 = vadd.f32 %v1771_v44, %v4364_v60  ;;  %v1773_v46 = vpop.f32.mrb[49].mxu0 }
 0x373   : > { %5401 = vst [vmem:[#allocation20_spill] sm:$0xff] %v4605_v38  ;;  %v3082_v48 = vadd.f32 %v1773_v46, %v4367_v14  ;;  %v1951_v15 = vadd.f32 %v4605_v38, %v4602_v9  ;;  %v3370_v38 = vld [vmem:[%s3870_s6 + $0x1a0] sm:$0xff] }
 0x374   : > { %v4612_v6 = vadd.f32 %v3366_v2, %v3081_v7  ;;  %v3369_v7 = vld [vmem:[%s3870_s6 + $0x198] sm:$0xff] }
 0x375   : > { %v4615_v54 = vadd.f32 %v3367_v50, %v3082_v48  ;;  %v1777_v21 = vpop.f32.mrb[50].mxu0  ;;  %1952 = vadd.xlane.f32.xlu1 %v1951_v15 }
 0x376   : > { %5402 = vst [vmem:[#allocation21_spill] sm:$0xff] %v4612_v6  ;;  %v3083_v35 = vadd.f32 %v1777_v21, %v4364_v60  ;;  %v1779_v25 = vpop.f32.mrb[51].mxu0 }
 0x377   : > { %5403 = vst [vmem:[#allocation22_spill] sm:$0xff] %v4615_v54  ;;  %v3084_v44 = vadd.f32 %v1779_v25, %v4367_v14  ;;  %v1954_v46 = vadd.f32 %v4615_v54, %v4612_v6  ;;  %v3372_v6 = vld [vmem:[%s3870_s6 + $0x1b0] sm:$0xff] }
 0x378   : > { %v4622_v40 = vadd.f32 %v3368_v51, %v3083_v35  ;;  %v3371_v51 = vld [vmem:[%s3870_s6 + $0x1a8] sm:$0xff] }
 0x379   : > { %v4625_v2 = vadd.f32 %v3369_v7, %v3084_v44  ;;  %v1783_v48 = vpop.f32.mrb[52].mxu0  ;;  %1955 = vadd.xlane.f32.xlu0 %v1954_v46 }
 0x37a   : > { %5404 = vst [vmem:[#allocation23_spill] sm:$0xff] %v4622_v40  ;;  %v3085_v15 = vadd.f32 %v1783_v48, %v4364_v60  ;;  %v1785_v50 = vpop.f32.mrb[53].mxu0 }
 0x37b   : > { %5405 = vst [vmem:[#allocation24_spill] sm:$0xff] %v4625_v2  ;;  %v3086_v21 = vadd.f32 %v1785_v50, %v4367_v14  ;;  %v1957_v25 = vadd.f32 %v4625_v2, %v4622_v40  ;;  %v3374_v40 = vld [vmem:[%s3870_s6 + $0x1c0] sm:$0xff] }
 0x37c   : > { %v4632_v54 = vadd.f32 %v3370_v38, %v3085_v15  ;;  %v3373_v38 = vld [vmem:[%s3870_s6 + $0x1b8] sm:$0xff] }
 0x37d   : > { %v4635_v35 = vadd.f32 %v3371_v51, %v3086_v21  ;;  %v1789_v44 = vpop.f32.mrb[54].mxu0  ;;  %1958 = vadd.xlane.f32.xlu1 %v1957_v25 }
 0x37e   : > { %5406 = vst [vmem:[#allocation25_spill] sm:$0xff] %v4632_v54  ;;  %v3087_v46 = vadd.f32 %v1789_v44, %v4364_v60  ;;  %v1791_v7 = vpop.f32.mrb[55].mxu0 }
 0x37f   : > { %5407 = vst [vmem:[#allocation26_spill] sm:$0xff] %v4635_v35  ;;  %v3088_v48 = vadd.f32 %v1791_v7, %v4367_v14  ;;  %v1960_v50 = vadd.f32 %v4635_v35, %v4632_v54  ;;  %v3376_v54 = vld [vmem:[%s3870_s6 + $0x1d0] sm:$0xff] }
 0x380   : > { %v4642_v2 = vadd.f32 %v3372_v6, %v3087_v46  ;;  %v3375_v6 = vld [vmem:[%s3870_s6 + $0x1c8] sm:$0xff] }
 0x381   : > { %v4645_v15 = vadd.f32 %v3373_v38, %v3088_v48  ;;  %v1795_v21 = vpop.f32.mrb[56].mxu0  ;;  %1961 = vadd.xlane.f32.xlu0 %v1960_v50 }
 0x382   : > { %5408 = vst [vmem:[#allocation27_spill] sm:$0xff] %v4642_v2  ;;  %v3089_v25 = vadd.f32 %v1795_v21, %v4364_v60  ;;  %v1797_v51 = vpop.f32.mrb[57].mxu0 }
 0x383   : > { %5409 = vst [vmem:[#allocation28_spill] sm:$0xff] %v4645_v15  ;;  %v3090_v44 = vadd.f32 %v1797_v51, %v4367_v14  ;;  %v1963_v7 = vadd.f32 %v4645_v15, %v4642_v2  ;;  %v3378_v2 = vld [vmem:[%s3870_s6 + $0x1e0] sm:$0xff] }
 0x384   : > { %v4652_v35 = vadd.f32 %v3374_v40, %v3089_v25  ;;  %v3377_v40 = vld [vmem:[%s3870_s6 + $0x1d8] sm:$0xff] }
 0x385   : > { %v4655_v46 = vadd.f32 %v3375_v6, %v3090_v44  ;;  %v1801_v48 = vpop.f32.mrb[58].mxu0  ;;  %1964 = vadd.xlane.f32.xlu1 %v1963_v7 }
 0x386   : > { %5410 = vst [vmem:[#allocation29_spill] sm:$0xff] %v4652_v35  ;;  %v3091_v50 = vadd.f32 %v1801_v48, %v4364_v60  ;;  %v1803_v38 = vpop.f32.mrb[59].mxu0 }
 0x387   : > { %5411 = vst [vmem:[#allocation30_spill] sm:$0xff] %v4655_v46  ;;  %v3092_v21 = vadd.f32 %v1803_v38, %v4367_v14  ;;  %v1966_v51 = vadd.f32 %v4655_v46, %v4652_v35 }
 0x388   : > { %v4662_v15 = vadd.f32 %v3376_v54, %v3091_v50  ;;  %v3379_v54 = vld [vmem:[%s3870_s6 + $0x1e8] sm:$0xff] }
 0x389   : > { %v4665_v25 = vadd.f32 %v3377_v40, %v3092_v21  ;;  %v1807_v44 = vpop.f32.mrb[60].mxu0  ;;  %1967 = vadd.xlane.f32.xlu0 %v1966_v51 }
 0x38a   : > { %5412 = vst [vmem:[#allocation31_spill] sm:$0xff] %v4662_v15  ;;  %v3093_v7 = vadd.f32 %v1807_v44, %v4364_v60  ;;  %v1809_v6 = vpop.f32.mrb[61].mxu0 }
 0x38b   : > { %5413 = vst [vmem:[#allocation32_spill] sm:$0xff] %v4665_v25  ;;  %v3094_v48 = vadd.f32 %v1809_v6, %v4367_v14  ;;  %v1969_v38 = vadd.f32 %v4665_v25, %v4662_v15  ;;  %v3380_v6 = vld [vmem:[%s3870_s6 + $0x1f0] sm:$0xff]  ;;  %v3381_v25 = vld [vmem:[%s3870_s6 + $0x1f8] sm:$0xff] }
 0x38c   : > { %v4672_v46 = vadd.f32 %v3378_v2, %v3093_v7 }
 0x38d   : > { %v4675_v50 = vadd.f32 %v3379_v54, %v3094_v48  ;;  %v1813_v21 = vpop.f32.mrb[62].mxu0  ;;  %1970 = vadd.xlane.f32.xlu1 %v1969_v38 }
 0x38e   : > { %v3095_v40 = vadd.f32 %v1813_v21, %v4364_v60  ;;  %v1815_v51 = vpop.f32.mrb[63].mxu0 }
 0x38f   : > { %v3096_v44 = vadd.f32 %v1815_v51, %v4367_v14  ;;  %v1972_v35 = vadd.f32 %v4675_v50, %v4672_v46 }
 0x390   : > { %v4682_v9 = vadd.f32 %v3380_v6, %v3095_v40 }
 0x391   : > { %v4685_v15 = vadd.f32 %v3381_v25, %v3096_v44  ;;  %1973 = vadd.xlane.f32.xlu0 %v1972_v35 }
 0x393   : > { %v1975_v2 = vadd.f32 %v4685_v15, %v4682_v9 }
 0x395   : > { %1976 = vadd.xlane.f32.xlu1 %v1975_v2 }
 0x3a6   : > { %v1884_v7 = vpop.xlane.xlu0 %1883 }
 0x3a7   : > { %v1979_v48 = vmul.f32 0.00390625, %v1884_v7 }
 0x3a9   : > { %v4690_v60 = vsub.f32 %v4372_v16, %v1979_v48  ;;  %v4693_v14 = vsub.f32 %v4375_v37, %v1979_v48 }
 0x3aa   : > { %v1887_v38 = vpop.xlane.xlu0 %1886 }
 0x3ab   : > { %v1980_v54 = vmul.f32 0.00390625, %v1887_v38  ;;  %v2075_v21 = vmul.f32 %v4690_v60, %v4690_v60  ;;  %v2076_v35 = vmul.f32 %v4693_v14, %v4693_v14 }
 0x3ad   : > { %v4700_v25 = vsub.f32 %v4382_v22, %v1980_v54  ;;  %v4703_v40 = vsub.f32 %v4385_v23, %v1980_v54  ;;  %v2139_v51 = vadd.f32 %v2076_v35, %v2075_v21 }
 0x3ae   : > { %v1890_v16 = vpop.xlane.xlu1 %1889 }
 0x3af   : > { %v1981_v44 = vmul.f32 0.00390625, %v1890_v16  ;;  %2140 = vadd.xlane.f32.xlu0 %v2139_v51  ;;  %v2077_v37 = vmul.f32 %v4700_v25, %v4700_v25  ;;  %v2078_v6 = vmul.f32 %v4703_v40, %v4703_v40 }
 0x3b1   : > { %v4710_v2 = vsub.f32 %v4392_v11, %v1981_v44  ;;  %v4713_v7 = vsub.f32 %v4395_v42, %v1981_v44  ;;  %v2142_v22 = vadd.f32 %v2078_v6, %v2077_v37 }
 0x3b2   : > { %v1893_v48 = vpop.xlane.xlu1 %1892 }
 0x3b3   : > { %v1982_v23 = vmul.f32 0.00390625, %v1893_v48  ;;  %2143 = vadd.xlane.f32.xlu1 %v2142_v22  ;;  %v2079_v38 = vmul.f32 %v4710_v2, %v4710_v2  ;;  %v2080_v54 = vmul.f32 %v4713_v7, %v4713_v7 }
 0x3b5   : > { %v4720_v21 = vsub.f32 %v4402_v58, %v1982_v23  ;;  %v4723_v35 = vsub.f32 %v4405_v13, %v1982_v23  ;;  %v2145_v11 = vadd.f32 %v2080_v54, %v2079_v38 }
 0x3b6   : > { %v1896_v51 = vpop.xlane.xlu0 %1895 }
 0x3b7   : > { %v1983_v42 = vmul.f32 0.00390625, %v1896_v51  ;;  %2146 = vadd.xlane.f32.xlu0 %v2145_v11  ;;  %v2081_v16 = vmul.f32 %v4720_v21, %v4720_v21  ;;  %v2082_v44 = vmul.f32 %v4723_v35, %v4723_v35 }
 0x3b9   : > { %v4730_v37 = vsub.f32 %v4412_v53, %v1983_v42  ;;  %v4733_v6 = vsub.f32 %v4415_v10, %v1983_v42  ;;  %v2148_v58 = vadd.f32 %v2082_v44, %v2081_v16 }
 0x3ba   : > { %v1899_v22 = vpop.xlane.xlu1 %1898 }
 0x3bb   : > { %v1984_v13 = vmul.f32 0.00390625, %v1899_v22  ;;  %2149 = vadd.xlane.f32.xlu1 %v2148_v58  ;;  %v2083_v48 = vmul.f32 %v4730_v37, %v4730_v37  ;;  %v2084_v23 = vmul.f32 %v4733_v6, %v4733_v6 }
 0x3bd   : > { %v4740_v38 = vsub.f32 %v4422_v55, %v1984_v13  ;;  %v4743_v54 = vsub.f32 %v4425_v62, %v1984_v13  ;;  %v2151_v53 = vadd.f32 %v2084_v23, %v2083_v48 }
 0x3be   : > { %v1902_v11 = vpop.xlane.xlu0 %1901 }
 0x3bf   : > { %v1985_v10 = vmul.f32 0.00390625, %v1902_v11  ;;  %2152 = vadd.xlane.f32.xlu0 %v2151_v53  ;;  %v2085_v51 = vmul.f32 %v4740_v38, %v4740_v38  ;;  %v2086_v42 = vmul.f32 %v4743_v54, %v4743_v54 }
 0x3c1   : > { %v4750_v16 = vsub.f32 %v4432_v36, %v1985_v10  ;;  %v4753_v44 = vsub.f32 %v4435_v56, %v1985_v10  ;;  %v2154_v55 = vadd.f32 %v2086_v42, %v2085_v51 }
 0x3c2   : > { %v1905_v58 = vpop.xlane.xlu1 %1904 }
 0x3c3   : > { %v1986_v62 = vmul.f32 0.00390625, %v1905_v58  ;;  %2155 = vadd.xlane.f32.xlu1 %v2154_v55  ;;  %v2087_v22 = vmul.f32 %v4750_v16, %v4750_v16  ;;  %v2088_v13 = vmul.f32 %v4753_v44, %v4753_v44 }
 0x3c5   : > { %v4760_v48 = vsub.f32 %v4442_v43, %v1986_v62  ;;  %v4763_v23 = vsub.f32 %v4445_v12, %v1986_v62  ;;  %v2157_v36 = vadd.f32 %v2088_v13, %v2087_v22 }
 0x3c6   : > { %v1908_v53 = vpop.xlane.xlu0 %1907 }
 0x3c7   : > { %v1987_v56 = vmul.f32 0.00390625, %v1908_v53  ;;  %2158 = vadd.xlane.f32.xlu0 %v2157_v36  ;;  %v2089_v11 = vmul.f32 %v4760_v48, %v4760_v48  ;;  %v2090_v10 = vmul.f32 %v4763_v23, %v4763_v23 }
 0x3c9   : > { %v4770_v51 = vsub.f32 %v4452_v5, %v1987_v56  ;;  %v4773_v42 = vsub.f32 %v4455_v19, %v1987_v56  ;;  %v2160_v43 = vadd.f32 %v2090_v10, %v2089_v11 }
 0x3ca   : > { %v1911_v55 = vpop.xlane.xlu1 %1910 }
 0x3cb   : > { %v1988_v12 = vmul.f32 0.00390625, %v1911_v55  ;;  %2161 = vadd.xlane.f32.xlu1 %v2160_v43  ;;  %v2091_v58 = vmul.f32 %v4770_v51, %v4770_v51  ;;  %v2092_v62 = vmul.f32 %v4773_v42, %v4773_v42 }
 0x3cd   : > { %v4780_v22 = vsub.f32 %v4462_v31, %v1988_v12  ;;  %v4783_v13 = vsub.f32 %v4465_v32, %v1988_v12  ;;  %v2163_v5 = vadd.f32 %v2092_v62, %v2091_v58 }
 0x3ce   : > { %v1914_v36 = vpop.xlane.xlu0 %1913 }
 0x3cf   : > { %v1989_v19 = vmul.f32 0.00390625, %v1914_v36  ;;  %2164 = vadd.xlane.f32.xlu0 %v2163_v5  ;;  %v2093_v53 = vmul.f32 %v4780_v22, %v4780_v22  ;;  %v2094_v56 = vmul.f32 %v4783_v13, %v4783_v13 }
 0x3d1   : > { %v4790_v11 = vsub.f32 %v4472_v49, %v1989_v19  ;;  %v4793_v10 = vsub.f32 %v4475_v30, %v1989_v19  ;;  %v2166_v31 = vadd.f32 %v2094_v56, %v2093_v53 }
 0x3d2   : > { %v1917_v43 = vpop.xlane.xlu1 %1916 }
 0x3d3   : > { %v1990_v32 = vmul.f32 0.00390625, %v1917_v43  ;;  %2167 = vadd.xlane.f32.xlu1 %v2166_v31  ;;  %v2095_v55 = vmul.f32 %v4790_v11, %v4790_v11  ;;  %v2096_v12 = vmul.f32 %v4793_v10, %v4793_v10 }
 0x3d5   : > { %v4800_v58 = vsub.f32 %v4482_v34, %v1990_v32  ;;  %v4803_v62 = vsub.f32 %v4485_v47, %v1990_v32  ;;  %v2169_v49 = vadd.f32 %v2096_v12, %v2095_v55 }
 0x3d6   : > { %v1920_v5 = vpop.xlane.xlu0 %1919 }
 0x3d7   : > { %v1991_v30 = vmul.f32 0.00390625, %v1920_v5  ;;  %2170 = vadd.xlane.f32.xlu0 %v2169_v49  ;;  %v2097_v36 = vmul.f32 %v4800_v58, %v4800_v58  ;;  %v2098_v19 = vmul.f32 %v4803_v62, %v4803_v62 }
 0x3d9   : > { %v4810_v53 = vsub.f32 %v4492_v61, %v1991_v30  ;;  %v4813_v56 = vsub.f32 %v4495_v41, %v1991_v30  ;;  %v2172_v34 = vadd.f32 %v2098_v19, %v2097_v36 }
 0x3da   : > { %v1923_v31 = vpop.xlane.xlu1 %1922 }
 0x3db   : > { %v1992_v47 = vmul.f32 0.00390625, %v1923_v31  ;;  %2173 = vadd.xlane.f32.xlu1 %v2172_v34  ;;  %v2099_v43 = vmul.f32 %v4810_v53, %v4810_v53  ;;  %v2100_v32 = vmul.f32 %v4813_v56, %v4813_v56 }
 0x3dd   : > { %v4820_v55 = vsub.f32 %v4502_v26, %v1992_v47  ;;  %v4823_v12 = vsub.f32 %v4505_v39, %v1992_v47  ;;  %v2175_v61 = vadd.f32 %v2100_v32, %v2099_v43 }
 0x3de   : > { %v1926_v49 = vpop.xlane.xlu0 %1925 }
 0x3df   : > { %v1993_v41 = vmul.f32 0.00390625, %v1926_v49  ;;  %2176 = vadd.xlane.f32.xlu0 %v2175_v61  ;;  %v2101_v5 = vmul.f32 %v4820_v55, %v4820_v55  ;;  %v2102_v30 = vmul.f32 %v4823_v12, %v4823_v12 }
 0x3e1   : > { %v4830_v36 = vsub.f32 %v4512_v8, %v1993_v41  ;;  %v4833_v19 = vsub.f32 %v4515_v27, %v1993_v41  ;;  %v2178_v26 = vadd.f32 %v2102_v30, %v2101_v5 }
 0x3e2   : > { %v1929_v34 = vpop.xlane.xlu1 %1928 }
 0x3e3   : > { %v1994_v39 = vmul.f32 0.00390625, %v1929_v34  ;;  %2179 = vadd.xlane.f32.xlu1 %v2178_v26  ;;  %v2103_v31 = vmul.f32 %v4830_v36, %v4830_v36  ;;  %v2104_v47 = vmul.f32 %v4833_v19, %v4833_v19 }
 0x3e5   : > { %v4840_v43 = vsub.f32 %v4522_v28, %v1994_v39  ;;  %v4843_v32 = vsub.f32 %v4525_v63, %v1994_v39  ;;  %v2181_v8 = vadd.f32 %v2104_v47, %v2103_v31 }
 0x3e6   : > { %v1932_v61 = vpop.xlane.xlu0 %1931 }
 0x3e7   : > { %v1995_v27 = vmul.f32 0.00390625, %v1932_v61  ;;  %2182 = vadd.xlane.f32.xlu0 %v2181_v8  ;;  %v2105_v49 = vmul.f32 %v4840_v43, %v4840_v43  ;;  %v2106_v41 = vmul.f32 %v4843_v32, %v4843_v32 }
 0x3e9   : > { %v4850_v5 = vsub.f32 %v4532_v24, %v1995_v27  ;;  %v4853_v30 = vsub.f32 %v4535_v3, %v1995_v27  ;;  %v2184_v28 = vadd.f32 %v2106_v41, %v2105_v49 }
 0x3ea   : > { %v1935_v26 = vpop.xlane.xlu1 %1934 }
 0x3eb   : > { %v1996_v63 = vmul.f32 0.00390625, %v1935_v26  ;;  %2185 = vadd.xlane.f32.xlu1 %v2184_v28  ;;  %v2107_v34 = vmul.f32 %v4850_v5, %v4850_v5  ;;  %v2108_v39 = vmul.f32 %v4853_v30, %v4853_v30 }
 0x3ed   : > { %v4860_v31 = vsub.f32 %v4542_v18, %v1996_v63  ;;  %v4863_v47 = vsub.f32 %v4545_v52, %v1996_v63  ;;  %v2187_v24 = vadd.f32 %v2108_v39, %v2107_v34 }
 0x3ee   : > { %v1938_v8 = vpop.xlane.xlu0 %1937 }
 0x3ef   : > { %v1997_v3 = vmul.f32 0.00390625, %v1938_v8  ;;  %2188 = vadd.xlane.f32.xlu0 %v2187_v24  ;;  %v2109_v61 = vmul.f32 %v4860_v31, %v4860_v31  ;;  %v2110_v27 = vmul.f32 %v4863_v47, %v4863_v47 }
 0x3f1   : > { %v4870_v49 = vsub.f32 %v4552_v20, %v1997_v3  ;;  %v4873_v41 = vsub.f32 %v4555_v45, %v1997_v3  ;;  %v2190_v18 = vadd.f32 %v2110_v27, %v2109_v61 }
 0x3f2   : > { %v1941_v28 = vpop.xlane.xlu1 %1940 }
 0x3f3   : > { %v1998_v52 = vmul.f32 0.00390625, %v1941_v28  ;;  %2191 = vadd.xlane.f32.xlu1 %v2190_v18  ;;  %v2111_v26 = vmul.f32 %v4870_v49, %v4870_v49  ;;  %v2112_v63 = vmul.f32 %v4873_v41, %v4873_v41 }
 0x3f5   : > { %v4880_v34 = vsub.f32 %v4562_v1, %v1998_v52  ;;  %v4883_v39 = vsub.f32 %v4565_v17, %v1998_v52  ;;  %v2193_v20 = vadd.f32 %v2112_v63, %v2111_v26 }
 0x3f6   : > { %v1944_v24 = vpop.xlane.xlu0 %1943 }
 0x3f7   : > { %v1999_v45 = vmul.f32 0.00390625, %v1944_v24  ;;  %2194 = vadd.xlane.f32.xlu0 %v2193_v20  ;;  %v2113_v8 = vmul.f32 %v4880_v34, %v4880_v34  ;;  %v2114_v3 = vmul.f32 %v4883_v39, %v4883_v39 }
 0x3f9   : > { %v4890_v61 = vsub.f32 %v4572_v59, %v1999_v45  ;;  %v4893_v27 = vsub.f32 %v4575_v33, %v1999_v45  ;;  %v2196_v1 = vadd.f32 %v2114_v3, %v2113_v8 }
 0x3fa   : > { %v1947_v18 = vpop.xlane.xlu1 %1946 }
 0x3fb   : > { %v2000_v17 = vmul.f32 0.00390625, %v1947_v18  ;;  %2197 = vadd.xlane.f32.xlu1 %v2196_v1  ;;  %v2115_v28 = vmul.f32 %v4890_v61, %v4890_v61  ;;  %v2116_v52 = vmul.f32 %v4893_v27, %v4893_v27 }
 0x3fd   : > { %v4900_v26 = vsub.f32 %v4582_v0, %v2000_v17  ;;  %v4903_v63 = vsub.f32 %v4585_v4, %v2000_v17  ;;  %v2199_v59 = vadd.f32 %v2116_v52, %v2115_v28  ;;  %v5417_v28 = vld [vmem:[#allocation19_spill] sm:$0xff] }
 0x3fe   : > { %v1950_v20 = vpop.xlane.xlu0 %1949 }
 0x3ff   : > { %5414 = vst [vmem:[#allocation33_spill] sm:$0xff] %v4903_v63  ;;  %v2001_v33 = vmul.f32 0.00390625, %v1950_v20  ;;  %2200 = vadd.xlane.f32.xlu0 %v2199_v59  ;;  %v2117_v24 = vmul.f32 %v4900_v26, %v4900_v26  ;;  %v2118_v45 = vmul.f32 %v4903_v63, %v4903_v63  ;;  %v5419_v59 = vld [vmem:[#allocation20_spill] sm:$0xff] }
 0x401   : > { %v4910_v8 = vsub.f32 %v4592_v57, %v2001_v33  ;;  %v4913_v3 = vsub.f32 %v4595_v29, %v2001_v33  ;;  %v2202_v0 = vadd.f32 %v2118_v45, %v2117_v24  ;;  %v5421_v45 = vld [vmem:[#allocation21_spill] sm:$0xff] }
 0x402   : > { %v1953_v1 = vpop.xlane.xlu1 %1952 }
 0x403   : > { %5415 = vst [vmem:[#allocation34_spill] sm:$0xff] %v4910_v8  ;;  %5416 = vst [vmem:[#allocation35_spill] sm:$0xff] %v4913_v3  ;;  %v2002_v4 = vmul.f32 0.00390625, %v1953_v1  ;;  %2203 = vadd.xlane.f32.xlu1 %v2202_v0  ;;  %v2119_v18 = vmul.f32 %v4910_v8, %v4910_v8  ;;  %v2120_v17 = vmul.f32 %v4913_v3, %v4913_v3  ;;  %v5423_v1 = vld [vmem:[#allocation22_spill] sm:$0xff] }
 0x405   : > { %v4920_v52 = vsub.f32 %v5417_v28, %v2002_v4  ;;  %v4923_v20 = vsub.f32 %v5419_v59, %v2002_v4  ;;  %v2205_v57 = vadd.f32 %v2120_v17, %v2119_v18  ;;  %v5425_v17 = vld [vmem:[#allocation23_spill] sm:$0xff] }
 0x406   : > { %v1956_v63 = vpop.xlane.xlu0 %1955 }
 0x407   : > { %5418 = vst [vmem:[#allocation19_spill] sm:$0xff] %v4920_v52  ;;  %5420 = vst [vmem:[#allocation20_spill] sm:$0xff] %v4923_v20  ;;  %v2003_v29 = vmul.f32 0.00390625, %v1956_v63  ;;  %2206 = vadd.xlane.f32.xlu0 %v2205_v57  ;;  %v2121_v33 = vmul.f32 %v4920_v52, %v4920_v52  ;;  %v2122_v24 = vmul.f32 %v4923_v20, %v4923_v20  ;;  %v5427_v57 = vld [vmem:[#allocation24_spill] sm:$0xff] }
 0x409   : > { %v4930_v0 = vsub.f32 %v5421_v45, %v2003_v29  ;;  %v4933_v3 = vsub.f32 %v5423_v1, %v2003_v29  ;;  %v2208_v28 = vadd.f32 %v2122_v24, %v2121_v33  ;;  %v5429_v24 = vld [vmem:[#allocation25_spill] sm:$0xff] }
 0x40a   : > { %v1959_v8 = vpop.xlane.xlu1 %1958 }
 0x40b   : > { %5422 = vst [vmem:[#allocation21_spill] sm:$0xff] %v4930_v0  ;;  %5424 = vst [vmem:[#allocation22_spill] sm:$0xff] %v4933_v3  ;;  %v2004_v4 = vmul.f32 0.00390625, %v1959_v8  ;;  %2209 = vadd.xlane.f32.xlu1 %v2208_v28  ;;  %v2123_v63 = vmul.f32 %v4930_v0, %v4930_v0  ;;  %v2124_v18 = vmul.f32 %v4933_v3, %v4933_v3  ;;  %v5431_v28 = vld [vmem:[#allocation26_spill] sm:$0xff] }
 0x40d   : > { %v4940_v59 = vsub.f32 %v5425_v17, %v2004_v4  ;;  %v4943_v20 = vsub.f32 %v5427_v57, %v2004_v4  ;;  %v2211_v45 = vadd.f32 %v2124_v18, %v2123_v63  ;;  %v5433_v18 = vld [vmem:[#allocation27_spill] sm:$0xff] }
 0x40e   : > { %v1962_v52 = vpop.xlane.xlu0 %1961 }
 0x40f   : > { %5426 = vst [vmem:[#allocation23_spill] sm:$0xff] %v4940_v59  ;;  %5428 = vst [vmem:[#allocation24_spill] sm:$0xff] %v4943_v20  ;;  %v2005_v29 = vmul.f32 0.00390625, %v1962_v52  ;;  %2212 = vadd.xlane.f32.xlu0 %v2211_v45  ;;  %v2125_v8 = vmul.f32 %v4940_v59, %v4940_v59  ;;  %v2126_v33 = vmul.f32 %v4943_v20, %v4943_v20  ;;  %v5435_v45 = vld [vmem:[#allocation28_spill] sm:$0xff] }
 0x411   : > { %v4950_v1 = vsub.f32 %v5429_v24, %v2005_v29  ;;  %v4953_v3 = vsub.f32 %v5431_v28, %v2005_v29  ;;  %v2214_v17 = vadd.f32 %v2126_v33, %v2125_v8  ;;  %v5437_v33 = vld [vmem:[#allocation29_spill] sm:$0xff] }
 0x412   : > { %v1965_v0 = vpop.xlane.xlu1 %1964 }
 0x413   : > { %5430 = vst [vmem:[#allocation25_spill] sm:$0xff] %v4950_v1  ;;  %5432 = vst [vmem:[#allocation26_spill] sm:$0xff] %v4953_v3  ;;  %v2006_v4 = vmul.f32 0.00390625, %v1965_v0  ;;  %2215 = vadd.xlane.f32.xlu1 %v2214_v17  ;;  %v2127_v52 = vmul.f32 %v4950_v1, %v4950_v1  ;;  %v2128_v63 = vmul.f32 %v4953_v3, %v4953_v3  ;;  %v5438_v17 = vld [vmem:[#allocation30_spill] sm:$0xff] }
 0x415   : > { %v4960_v57 = vsub.f32 %v5433_v18, %v2006_v4  ;;  %v4963_v20 = vsub.f32 %v5435_v45, %v2006_v4  ;;  %v2217_v24 = vadd.f32 %v2128_v63, %v2127_v52  ;;  %v5439_v63 = vld [vmem:[#allocation31_spill] sm:$0xff] }
 0x416   : > { %v1968_v59 = vpop.xlane.xlu0 %1967 }
 0x417   : > { %5434 = vst [vmem:[#allocation27_spill] sm:$0xff] %v4960_v57  ;;  %5436 = vst [vmem:[#allocation28_spill] sm:$0xff] %v4963_v20  ;;  %v2007_v29 = vmul.f32 0.00390625, %v1968_v59  ;;  %2218 = vadd.xlane.f32.xlu0 %v2217_v24  ;;  %v2129_v0 = vmul.f32 %v4960_v57, %v4960_v57  ;;  %v2130_v8 = vmul.f32 %v4963_v20, %v4963_v20  ;;  %v5440_v24 = vld [vmem:[#allocation32_spill] sm:$0xff] }
 0x419   : > { %v4970_v28 = vsub.f32 %v5437_v33, %v2007_v29  ;;  %v4973_v3 = vsub.f32 %v5438_v17, %v2007_v29  ;;  %v2220_v18 = vadd.f32 %v2130_v8, %v2129_v0 }
 0x41a   : > { %v1971_v1 = vpop.xlane.xlu1 %1970 }
 0x41b   : > { %v2008_v4 = vmul.f32 0.00390625, %v1971_v1  ;;  %2221 = vadd.xlane.f32.xlu1 %v2220_v18  ;;  %v2131_v59 = vmul.f32 %v4970_v28, %v4970_v28  ;;  %v2132_v52 = vmul.f32 %v4973_v3, %v4973_v3 }
 0x41d   : > { %v4980_v45 = vsub.f32 %v5439_v63, %v2008_v4  ;;  %v4983_v20 = vsub.f32 %v5440_v24, %v2008_v4  ;;  %v2223_v33 = vadd.f32 %v2132_v52, %v2131_v59 }
 0x41e   : > { %v1974_v57 = vpop.xlane.xlu0 %1973 }
 0x41f   : > { %5441 = vst [vmem:[#allocation29_spill] sm:$0xff] %v4983_v20  ;;  %v2009_v29 = vmul.f32 0.00390625, %v1974_v57  ;;  %2224 = vadd.xlane.f32.xlu0 %v2223_v33  ;;  %v2133_v1 = vmul.f32 %v4980_v45, %v4980_v45  ;;  %v2134_v0 = vmul.f32 %v4983_v20, %v4983_v20 }
 0x421   : > { %v4990_v8 = vsub.f32 %v4672_v46, %v2009_v29  ;;  %v4993_v17 = vsub.f32 %v4675_v50, %v2009_v29  ;;  %v2226_v18 = vadd.f32 %v2134_v0, %v2133_v1 }
 0x422   : > { %v1977_v63 = vpop.xlane.xlu1 %1976 }
 0x423   : > { %5442 = vst [vmem:[#allocation30_spill] sm:$0xff] %v4990_v8  ;;  %5443 = vst [vmem:[#allocation31_spill] sm:$0xff] %v4993_v17  ;;  %v2010_v4 = vmul.f32 0.00390625, %v1977_v63  ;;  %2227 = vadd.xlane.f32.xlu1 %v2226_v18  ;;  %v2135_v57 = vmul.f32 %v4990_v8, %v4990_v8  ;;  %v2136_v59 = vmul.f32 %v4993_v17, %v4993_v17  ;;  %v5446_v17 = vld [vmem:[#allocation16_spill] sm:$0xff] }
 0x424   : > { %v2401_v8 = vsub.s32 5, %v5446_v17 }
 0x425   : > { %v5000_v52 = vsub.f32 %v4682_v9, %v2010_v4  ;;  %v5003_v24 = vsub.f32 %v4685_v15, %v2010_v4  ;;  %v2229_v46 = vadd.f32 %v2136_v59, %v2135_v57  ;;  %v2483_v4 = vsub.s32 6, %v5446_v17 }
 0x427   : > { %5444 = vst [vmem:[#allocation32_spill] sm:$0xff] %v5000_v52  ;;  %5445 = vst [vmem:[#allocation36_spill] sm:$0xff] %v5003_v24  ;;  %2230 = vadd.xlane.f32.xlu0 %v2229_v46  ;;  %v2137_v50 = vmul.f32 %v5000_v52, %v5000_v52  ;;  %v2138_v33 = vmul.f32 %v5003_v24, %v5003_v24  ;;  %v3382_v46 = vld [vmem:[#allocation10] sm:$0x77]  ;;  %v5447_v52 = vld [vmem:[#allocation17_spill] sm:$0xff] }
 0x428   : > { %v2398_v20 = vrot.slane %v3382_v46, %v5447_v52  ;;  %v2402_v24 = vrot.slane %v3382_v46, %v2401_v8 }
 0x429   : > { %v2232_v29 = vadd.f32 %v2138_v33, %v2137_v50  ;;  %v5448_v33 = vld [vmem:[#allocation18_spill] sm:$0xff] }
 0x42b   : > { %2233 = vadd.xlane.f32.xlu1 %v2232_v29  ;;  %v2480_v29 = vrot.slane %v3382_v46, %v5448_v33 }
 0x43c   : > { %v2141_v1 = vpop.xlane.xlu0 %2140 }
 0x43d   : > { %v2235_v0 = vmul.f32 0.00390625, %v2141_v1  ;;  %v2484_v1 = vrot.slane %v3382_v46, %v2483_v4 }
 0x43f   : > { %v2267_v18 = vadd.f32 1e-05, %v2235_v0  ;;  %v5023_v8 = vrot.slane %v2484_v1, %v5448_v33 }
 0x440   : > { %v2144_v63 = vpop.xlane.xlu1 %2143 }
 0x441   : > { %3254 = vrsqrt.f32 %v2267_v18  ;;  %v2236_v9 = vmul.f32 0.00390625, %v2144_v63  ;;  %v5014_v63 = vrot.slane %v2398_v20, %v5447_v52 }
 0x443   : > { %v2268_v15 = vadd.f32 1e-05, %v2236_v9  ;;  %v5017_v9 = vrot.slane %v2402_v24, %v5447_v52 }
 0x444   : > { %v2147_v57 = vpop.xlane.xlu0 %2146 }
 0x445   : > { %3256 = vrsqrt.f32 %v2268_v15  ;;  %v2237_v59 = vmul.f32 0.00390625, %v2147_v57  ;;  %v5020_v57 = vrot.slane %v2480_v29, %v5448_v33 }
 0x447   : > { %v2269_v50 = vadd.f32 1e-05, %v2237_v59 }
 0x448   : > { %v2150_v0 = vpop.xlane.xlu1 %2149 }
 0x449   : > { %3258 = vrsqrt.f32 %v2269_v50  ;;  %v2238_v18 = vmul.f32 0.00390625, %v2150_v0 }
 0x44b   : > { %v3255_v17 = vpop.eup %3254  ;;  %v2270_v15 = vadd.f32 1e-05, %v2238_v18 }
 0x44c   : > { %v2331_v59 = vmul.f32 %v3255_v17, %v4690_v60  ;;  %v2332_v4 = vmul.f32 %v3255_v17, %v4693_v14  ;;  %v2153_v46 = vpop.xlane.xlu0 %2152 }
 0x44d   : > { %3260 = vrsqrt.f32 %v2270_v15  ;;  %v2239_v20 = vmul.f32 0.00390625, %v2153_v46 }
 0x44e   : > { %v2413_v50 = vmul.f32 %v5014_v63, %v2331_v59  ;;  %v2414_v52 = vmul.f32 %v5017_v9, %v2332_v4 }
 0x44f   : > { %v3257_v24 = vpop.eup %3256  ;;  %v2271_v0 = vadd.f32 1e-05, %v2239_v20 }
 0x450   : > { %v2495_v29 = vadd.f32 %v5020_v57, %v2413_v50  ;;  %v2496_v18 = vadd.f32 %v5023_v8, %v2414_v52  ;;  %v2333_v33 = vmul.f32 %v3257_v24, %v4700_v25  ;;  %v2334_v60 = vmul.f32 %v3257_v24, %v4703_v40  ;;  %v2156_v1 = vpop.xlane.xlu1 %2155 }
 0x451   : > { %3262 = vrsqrt.f32 %v2271_v0  ;;  %v2240_v14 = vmul.f32 0.00390625, %v2156_v1 }
 0x452   : > { %2559 = vst [vmem:[%s5035_s24] sm:$0xff] %v2495_v29  ;;  %2560 = vst [vmem:[%s5035_s24 + $0x8] sm:$0xff] %v2496_v18  ;;  %v2415_v17 = vmul.f32 %v5014_v63, %v2333_v33  ;;  %v2416_v15 = vmul.f32 %v5017_v9, %v2334_v60 }
 0x453   : > { %v3259_v59 = vpop.eup %3258  ;;  %v2272_v25 = vadd.f32 1e-05, %v2240_v14 }
 0x454   : > { %v2497_v40 = vadd.f32 %v5020_v57, %v2415_v17  ;;  %v2498_v4 = vadd.f32 %v5023_v8, %v2416_v15  ;;  %v2335_v46 = vmul.f32 %v3259_v59, %v4710_v2  ;;  %v2336_v20 = vmul.f32 %v3259_v59, %v4713_v7  ;;  %v2159_v50 = vpop.xlane.xlu0 %2158 }
 0x455   : > { %3264 = vrsqrt.f32 %v2272_v25  ;;  %v2241_v52 = vmul.f32 0.00390625, %v2159_v50 }
 0x456   : > { %2561 = vst [vmem:[%s5035_s24 + $0x10] sm:$0xff] %v2497_v40  ;;  %2562 = vst [vmem:[%s5035_s24 + $0x18] sm:$0xff] %v2498_v4  ;;  %v2417_v24 = vmul.f32 %v5014_v63, %v2335_v46  ;;  %v2418_v0 = vmul.f32 %v5017_v9, %v2336_v20 }
 0x457   : > { %v3261_v29 = vpop.eup %3260  ;;  %v2273_v18 = vadd.f32 1e-05, %v2241_v52 }
 0x458   : > { %v2499_v33 = vadd.f32 %v5020_v57, %v2417_v24  ;;  %v2500_v60 = vadd.f32 %v5023_v8, %v2418_v0  ;;  %v2337_v2 = vmul.f32 %v3261_v29, %v4720_v21  ;;  %v2338_v7 = vmul.f32 %v3261_v29, %v4723_v35  ;;  %v2162_v1 = vpop.xlane.xlu1 %2161 }
 0x459   : > { %3266 = vrsqrt.f32 %v2273_v18  ;;  %v2242_v14 = vmul.f32 0.00390625, %v2162_v1 }
 0x45a   : > { %2563 = vst [vmem:[%s5035_s24 + $0x20] sm:$0xff] %v2499_v33  ;;  %2564 = vst [vmem:[%s5035_s24 + $0x28] sm:$0xff] %v2500_v60  ;;  %v2419_v17 = vmul.f32 %v5014_v63, %v2337_v2  ;;  %v2420_v15 = vmul.f32 %v5017_v9, %v2338_v7 }
 0x45b   : > { %v3263_v59 = vpop.eup %3262  ;;  %v2274_v25 = vadd.f32 1e-05, %v2242_v14 }
 0x45c   : > { %v2501_v40 = vadd.f32 %v5020_v57, %v2419_v17  ;;  %v2502_v4 = vadd.f32 %v5023_v8, %v2420_v15  ;;  %v2339_v21 = vmul.f32 %v3263_v59, %v4730_v37  ;;  %v2340_v35 = vmul.f32 %v3263_v59, %v4733_v6  ;;  %v2165_v46 = vpop.xlane.xlu0 %2164 }
 0x45d   : > { %3268 = vrsqrt.f32 %v2274_v25  ;;  %v2243_v20 = vmul.f32 0.00390625, %v2165_v46 }
 0x45e   : > { %2565 = vst [vmem:[%s5035_s24 + $0x30] sm:$0xff] %v2501_v40  ;;  %2566 = vst [vmem:[%s5035_s24 + $0x38] sm:$0xff] %v2502_v4  ;;  %v2421_v50 = vmul.f32 %v5014_v63, %v2339_v21  ;;  %v2422_v52 = vmul.f32 %v5017_v9, %v2340_v35 }
 0x45f   : > { %v3265_v24 = vpop.eup %3264  ;;  %v2275_v0 = vadd.f32 1e-05, %v2243_v20 }
 0x460   : > { %v2503_v29 = vadd.f32 %v5020_v57, %v2421_v50  ;;  %v2504_v18 = vadd.f32 %v5023_v8, %v2422_v52  ;;  %v2341_v37 = vmul.f32 %v3265_v24, %v4740_v38  ;;  %v2342_v6 = vmul.f32 %v3265_v24, %v4743_v54  ;;  %v2168_v33 = vpop.xlane.xlu1 %2167 }
 0x461   : > { %3270 = vrsqrt.f32 %v2275_v0  ;;  %v2244_v60 = vmul.f32 0.00390625, %v2168_v33 }
 0x462   : > { %2567 = vst [vmem:[%s5035_s24 + $0x40] sm:$0xff] %v2503_v29  ;;  %2568 = vst [vmem:[%s5035_s24 + $0x48] sm:$0xff] %v2504_v18  ;;  %v2423_v2 = vmul.f32 %v5014_v63, %v2341_v37  ;;  %v2424_v7 = vmul.f32 %v5017_v9, %v2342_v6 }
 0x463   : > { %v3267_v1 = vpop.eup %3266  ;;  %v2276_v14 = vadd.f32 1e-05, %v2244_v60 }
 0x464   : > { %v2505_v17 = vadd.f32 %v5020_v57, %v2423_v2  ;;  %v2506_v15 = vadd.f32 %v5023_v8, %v2424_v7  ;;  %v2343_v38 = vmul.f32 %v3267_v1, %v4750_v16  ;;  %v2344_v54 = vmul.f32 %v3267_v1, %v4753_v44  ;;  %v2171_v59 = vpop.xlane.xlu0 %2170 }
 0x465   : > { %3272 = vrsqrt.f32 %v2276_v14  ;;  %v2245_v25 = vmul.f32 0.00390625, %v2171_v59 }
 0x466   : > { %2569 = vst [vmem:[%s5035_s24 + $0x50] sm:$0xff] %v2505_v17  ;;  %2570 = vst [vmem:[%s5035_s24 + $0x58] sm:$0xff] %v2506_v15  ;;  %v2425_v40 = vmul.f32 %v5014_v63, %v2343_v38  ;;  %v2426_v4 = vmul.f32 %v5017_v9, %v2344_v54 }
 0x467   : > { %v3269_v21 = vpop.eup %3268  ;;  %v2277_v35 = vadd.f32 1e-05, %v2245_v25 }
 0x468   : > { %v2507_v46 = vadd.f32 %v5020_v57, %v2425_v40  ;;  %v2508_v20 = vadd.f32 %v5023_v8, %v2426_v4  ;;  %v2345_v16 = vmul.f32 %v3269_v21, %v4760_v48  ;;  %v2346_v44 = vmul.f32 %v3269_v21, %v4763_v23  ;;  %v2174_v50 = vpop.xlane.xlu1 %2173 }
 0x469   : > { %3274 = vrsqrt.f32 %v2277_v35  ;;  %v2246_v52 = vmul.f32 0.00390625, %v2174_v50 }
 0x46a   : > { %2571 = vst [vmem:[%s5035_s24 + $0x60] sm:$0xff] %v2507_v46  ;;  %2572 = vst [vmem:[%s5035_s24 + $0x68] sm:$0xff] %v2508_v20  ;;  %v2427_v24 = vmul.f32 %v5014_v63, %v2345_v16  ;;  %v2428_v0 = vmul.f32 %v5017_v9, %v2346_v44 }
 0x46b   : > { %v3271_v29 = vpop.eup %3270  ;;  %v2278_v18 = vadd.f32 1e-05, %v2246_v52 }
 0x46c   : > { %v2509_v37 = vadd.f32 %v5020_v57, %v2427_v24  ;;  %v2510_v6 = vadd.f32 %v5023_v8, %v2428_v0  ;;  %v2347_v48 = vmul.f32 %v3271_v29, %v4770_v51  ;;  %v2348_v23 = vmul.f32 %v3271_v29, %v4773_v42  ;;  %v2177_v33 = vpop.xlane.xlu0 %2176 }
 0x46d   : > { %3276 = vrsqrt.f32 %v2278_v18  ;;  %v2247_v60 = vmul.f32 0.00390625, %v2177_v33 }
 0x46e   : > { %2573 = vst [vmem:[%s5035_s24 + $0x70] sm:$0xff] %v2509_v37  ;;  %2574 = vst [vmem:[%s5035_s24 + $0x78] sm:$0xff] %v2510_v6  ;;  %v2429_v2 = vmul.f32 %v5014_v63, %v2347_v48  ;;  %v2430_v7 = vmul.f32 %v5017_v9, %v2348_v23 }
 0x46f   : > { %v3273_v1 = vpop.eup %3272  ;;  %v2279_v14 = vadd.f32 1e-05, %v2247_v60 }
 0x470   : > { %v2511_v17 = vadd.f32 %v5020_v57, %v2429_v2  ;;  %v2512_v15 = vadd.f32 %v5023_v8, %v2430_v7  ;;  %v2349_v51 = vmul.f32 %v3273_v1, %v4780_v22  ;;  %v2350_v42 = vmul.f32 %v3273_v1, %v4783_v13  ;;  %v2180_v38 = vpop.xlane.xlu1 %2179 }
 0x471   : > { %3278 = vrsqrt.f32 %v2279_v14  ;;  %v2248_v54 = vmul.f32 0.00390625, %v2180_v38 }
 0x472   : > { %2575 = vst [vmem:[%s5035_s24 + $0x80] sm:$0xff] %v2511_v17  ;;  %2576 = vst [vmem:[%s5035_s24 + $0x88] sm:$0xff] %v2512_v15  ;;  %v2431_v59 = vmul.f32 %v5014_v63, %v2349_v51  ;;  %v2432_v25 = vmul.f32 %v5017_v9, %v2350_v42 }
 0x473   : > { %v3275_v40 = vpop.eup %3274  ;;  %v2280_v4 = vadd.f32 1e-05, %v2248_v54 }
 0x474   : > { %v2513_v21 = vadd.f32 %v5020_v57, %v2431_v59  ;;  %v2514_v35 = vadd.f32 %v5023_v8, %v2432_v25  ;;  %v2351_v22 = vmul.f32 %v3275_v40, %v4790_v11  ;;  %v2352_v13 = vmul.f32 %v3275_v40, %v4793_v10  ;;  %v2183_v46 = vpop.xlane.xlu0 %2182 }
 0x475   : > { %3280 = vrsqrt.f32 %v2280_v4  ;;  %v2249_v20 = vmul.f32 0.00390625, %v2183_v46 }
 0x476   : > { %2577 = vst [vmem:[%s5035_s24 + $0x90] sm:$0xff] %v2513_v21  ;;  %2578 = vst [vmem:[%s5035_s24 + $0x98] sm:$0xff] %v2514_v35  ;;  %v2433_v16 = vmul.f32 %v5014_v63, %v2351_v22  ;;  %v2434_v44 = vmul.f32 %v5017_v9, %v2352_v13 }
 0x477   : > { %v3277_v50 = vpop.eup %3276  ;;  %v2281_v52 = vadd.f32 1e-05, %v2249_v20 }
 0x478   : > { %v2515_v24 = vadd.f32 %v5020_v57, %v2433_v16  ;;  %v2516_v0 = vadd.f32 %v5023_v8, %v2434_v44  ;;  %v2353_v11 = vmul.f32 %v3277_v50, %v4800_v58  ;;  %v2354_v10 = vmul.f32 %v3277_v50, %v4803_v62  ;;  %v2186_v29 = vpop.xlane.xlu1 %2185 }
 0x479   : > { %3282 = vrsqrt.f32 %v2281_v52  ;;  %v2250_v18 = vmul.f32 0.00390625, %v2186_v29 }
 0x47a   : > { %2579 = vst [vmem:[%s5035_s24 + $0xa0] sm:$0xff] %v2515_v24  ;;  %2580 = vst [vmem:[%s5035_s24 + $0xa8] sm:$0xff] %v2516_v0  ;;  %v2435_v37 = vmul.f32 %v5014_v63, %v2353_v11  ;;  %v2436_v6 = vmul.f32 %v5017_v9, %v2354_v10 }
 0x47b   : > { %v3279_v48 = vpop.eup %3278  ;;  %v2282_v23 = vadd.f32 1e-05, %v2250_v18 }
 0x47c   : > { %v2517_v33 = vadd.f32 %v5020_v57, %v2435_v37  ;;  %v2518_v60 = vadd.f32 %v5023_v8, %v2436_v6  ;;  %v2355_v58 = vmul.f32 %v3279_v48, %v4810_v53  ;;  %v2356_v62 = vmul.f32 %v3279_v48, %v4813_v56  ;;  %v2189_v2 = vpop.xlane.xlu0 %2188 }
 0x47d   : > { %3284 = vrsqrt.f32 %v2282_v23  ;;  %v2251_v7 = vmul.f32 0.00390625, %v2189_v2 }
 0x47e   : > { %2581 = vst [vmem:[%s5035_s24 + $0xb0] sm:$0xff] %v2517_v33  ;;  %2582 = vst [vmem:[%s5035_s24 + $0xb8] sm:$0xff] %v2518_v60  ;;  %v2437_v1 = vmul.f32 %v5014_v63, %v2355_v58  ;;  %v2438_v14 = vmul.f32 %v5017_v9, %v2356_v62 }
 0x47f   : > { %v3281_v17 = vpop.eup %3280  ;;  %v2283_v15 = vadd.f32 1e-05, %v2251_v7 }
 0x480   : > { %v2519_v51 = vadd.f32 %v5020_v57, %v2437_v1  ;;  %v2520_v42 = vadd.f32 %v5023_v8, %v2438_v14  ;;  %v2357_v53 = vmul.f32 %v3281_v17, %v4820_v55  ;;  %v2358_v56 = vmul.f32 %v3281_v17, %v4823_v12  ;;  %v2192_v38 = vpop.xlane.xlu1 %2191 }
 0x481   : > { %3286 = vrsqrt.f32 %v2283_v15  ;;  %v2252_v54 = vmul.f32 0.00390625, %v2192_v38 }
 0x482   : > { %2583 = vst [vmem:[%s5035_s24 + $0xc0] sm:$0xff] %v2519_v51  ;;  %2584 = vst [vmem:[%s5035_s24 + $0xc8] sm:$0xff] %v2520_v42  ;;  %v2439_v59 = vmul.f32 %v5014_v63, %v2357_v53  ;;  %v2440_v25 = vmul.f32 %v5017_v9, %v2358_v56 }
 0x483   : > { %v3283_v40 = vpop.eup %3282  ;;  %v2284_v4 = vadd.f32 1e-05, %v2252_v54 }
 0x484   : > { %v2521_v21 = vadd.f32 %v5020_v57, %v2439_v59  ;;  %v2522_v35 = vadd.f32 %v5023_v8, %v2440_v25  ;;  %v2359_v55 = vmul.f32 %v3283_v40, %v4830_v36  ;;  %v2360_v12 = vmul.f32 %v3283_v40, %v4833_v19  ;;  %v2195_v22 = vpop.xlane.xlu0 %2194 }
 0x485   : > { %3288 = vrsqrt.f32 %v2284_v4  ;;  %v2253_v13 = vmul.f32 0.00390625, %v2195_v22 }
 0x486   : > { %2585 = vst [vmem:[%s5035_s24 + $0xd0] sm:$0xff] %v2521_v21  ;;  %2586 = vst [vmem:[%s5035_s24 + $0xd8] sm:$0xff] %v2522_v35  ;;  %v2441_v46 = vmul.f32 %v5014_v63, %v2359_v55  ;;  %v2442_v20 = vmul.f32 %v5017_v9, %v2360_v12 }
 0x487   : > { %v3285_v16 = vpop.eup %3284  ;;  %v2285_v44 = vadd.f32 1e-05, %v2253_v13 }
 0x488   : > { %v2523_v50 = vadd.f32 %v5020_v57, %v2441_v46  ;;  %v2524_v52 = vadd.f32 %v5023_v8, %v2442_v20  ;;  %v2361_v36 = vmul.f32 %v3285_v16, %v4840_v43  ;;  %v2362_v19 = vmul.f32 %v3285_v16, %v4843_v32  ;;  %v2198_v24 = vpop.xlane.xlu1 %2197 }
 0x489   : > { %3290 = vrsqrt.f32 %v2285_v44  ;;  %v2254_v0 = vmul.f32 0.00390625, %v2198_v24 }
 0x48a   : > { %2587 = vst [vmem:[%s5035_s24 + $0xe0] sm:$0xff] %v2523_v50  ;;  %2588 = vst [vmem:[%s5035_s24 + $0xe8] sm:$0xff] %v2524_v52  ;;  %v2443_v11 = vmul.f32 %v5014_v63, %v2361_v36  ;;  %v2444_v10 = vmul.f32 %v5017_v9, %v2362_v19 }
 0x48b   : > { %v3287_v29 = vpop.eup %3286  ;;  %v2286_v18 = vadd.f32 1e-05, %v2254_v0 }
 0x48c   : > { %v2525_v37 = vadd.f32 %v5020_v57, %v2443_v11  ;;  %v2526_v6 = vadd.f32 %v5023_v8, %v2444_v10  ;;  %v2363_v43 = vmul.f32 %v3287_v29, %v4850_v5  ;;  %v2364_v32 = vmul.f32 %v3287_v29, %v4853_v30  ;;  %v2201_v48 = vpop.xlane.xlu0 %2200 }
 0x48d   : > { %3292 = vrsqrt.f32 %v2286_v18  ;;  %v2255_v23 = vmul.f32 0.00390625, %v2201_v48 }
 0x48e   : > { %2589 = vst [vmem:[%s5035_s24 + $0xf0] sm:$0xff] %v2525_v37  ;;  %2590 = vst [vmem:[%s5035_s24 + $0xf8] sm:$0xff] %v2526_v6  ;;  %v2445_v33 = vmul.f32 %v5014_v63, %v2363_v43  ;;  %v2446_v60 = vmul.f32 %v5017_v9, %v2364_v32 }
 0x48f   : > { %v3289_v58 = vpop.eup %3288  ;;  %v2287_v62 = vadd.f32 1e-05, %v2255_v23 }
 0x490   : > { %v2527_v2 = vadd.f32 %v5020_v57, %v2445_v33  ;;  %v2528_v7 = vadd.f32 %v5023_v8, %v2446_v60  ;;  %v2365_v5 = vmul.f32 %v3289_v58, %v4860_v31  ;;  %v2366_v30 = vmul.f32 %v3289_v58, %v4863_v47  ;;  %v2204_v1 = vpop.xlane.xlu1 %2203  ;;  %v5451_v58 = vld [vmem:[#allocation35_spill] sm:$0xff] }
 0x491   : > { %3294 = vrsqrt.f32 %v2287_v62  ;;  %v2256_v14 = vmul.f32 0.00390625, %v2204_v1 }
 0x492   : > { %2591 = vst [vmem:[%s5035_s24 + $0x100] sm:$0xff] %v2527_v2  ;;  %2592 = vst [vmem:[%s5035_s24 + $0x108] sm:$0xff] %v2528_v7  ;;  %v2447_v17 = vmul.f32 %v5014_v63, %v2365_v5  ;;  %v2448_v15 = vmul.f32 %v5017_v9, %v2366_v30 }
 0x493   : > { %v3291_v51 = vpop.eup %3290  ;;  %v2288_v42 = vadd.f32 1e-05, %v2256_v14 }
 0x494   : > { %v2529_v53 = vadd.f32 %v5020_v57, %v2447_v17  ;;  %v2530_v56 = vadd.f32 %v5023_v8, %v2448_v15  ;;  %v2367_v31 = vmul.f32 %v3291_v51, %v4870_v49  ;;  %v2368_v47 = vmul.f32 %v3291_v51, %v4873_v41  ;;  %v2207_v38 = vpop.xlane.xlu0 %2206  ;;  %v5452_v51 = vld [vmem:[#allocation19_spill] sm:$0xff] }
 0x495   : > { %3296 = vrsqrt.f32 %v2288_v42  ;;  %v2257_v54 = vmul.f32 0.00390625, %v2207_v38 }
 0x496   : > { %2593 = vst [vmem:[%s5035_s24 + $0x110] sm:$0xff] %v2529_v53  ;;  %2594 = vst [vmem:[%s5035_s24 + $0x118] sm:$0xff] %v2530_v56  ;;  %v2449_v59 = vmul.f32 %v5014_v63, %v2367_v31  ;;  %v2450_v25 = vmul.f32 %v5017_v9, %v2368_v47  ;;  %v5453_v53 = vld [vmem:[#allocation20_spill] sm:$0xff] }
 0x497   : > { %v3293_v40 = vpop.eup %3292  ;;  %v2289_v4 = vadd.f32 1e-05, %v2257_v54 }
 0x498   : > { %v2531_v21 = vadd.f32 %v5020_v57, %v2449_v59  ;;  %v2532_v35 = vadd.f32 %v5023_v8, %v2450_v25  ;;  %v2369_v49 = vmul.f32 %v3293_v40, %v4880_v34  ;;  %v2370_v41 = vmul.f32 %v3293_v40, %v4883_v39  ;;  %v2210_v55 = vpop.xlane.xlu1 %2209 }
 0x499   : > { %3298 = vrsqrt.f32 %v2289_v4  ;;  %v2258_v12 = vmul.f32 0.00390625, %v2210_v55 }
 0x49a   : > { %2595 = vst [vmem:[%s5035_s24 + $0x120] sm:$0xff] %v2531_v21  ;;  %2596 = vst [vmem:[%s5035_s24 + $0x128] sm:$0xff] %v2532_v35  ;;  %v2451_v22 = vmul.f32 %v5014_v63, %v2369_v49  ;;  %v2452_v13 = vmul.f32 %v5017_v9, %v2370_v41  ;;  %v5454_v21 = vld [vmem:[#allocation21_spill] sm:$0xff]  ;;  %v5455_v49 = vld [vmem:[#allocation22_spill] sm:$0xff] }
 0x49b   : > { %v3295_v46 = vpop.eup %3294  ;;  %v2290_v20 = vadd.f32 1e-05, %v2258_v12 }
 0x49c   : > { %v2533_v16 = vadd.f32 %v5020_v57, %v2451_v22  ;;  %v2534_v44 = vadd.f32 %v5023_v8, %v2452_v13  ;;  %v2371_v34 = vmul.f32 %v3295_v46, %v4890_v61  ;;  %v2372_v39 = vmul.f32 %v3295_v46, %v4893_v27  ;;  %v2213_v50 = vpop.xlane.xlu0 %2212  ;;  %v5449_v27 = vld [vmem:[#allocation33_spill] sm:$0xff] }
 0x49d   : > { %3300 = vrsqrt.f32 %v2290_v20  ;;  %v2259_v52 = vmul.f32 0.00390625, %v2213_v50  ;;  %v5457_v50 = vld [vmem:[#allocation24_spill] sm:$0xff] }
 0x49e   : > { %2597 = vst [vmem:[%s5035_s24 + $0x130] sm:$0xff] %v2533_v16  ;;  %2598 = vst [vmem:[%s5035_s24 + $0x138] sm:$0xff] %v2534_v44  ;;  %v2453_v36 = vmul.f32 %v5014_v63, %v2371_v34  ;;  %v2454_v19 = vmul.f32 %v5017_v9, %v2372_v39  ;;  %v5456_v34 = vld [vmem:[#allocation23_spill] sm:$0xff] }
 0x49f   : > { %v3297_v24 = vpop.eup %3296  ;;  %v2291_v0 = vadd.f32 1e-05, %v2259_v52 }
 0x4a0   : > { %v2535_v11 = vadd.f32 %v5020_v57, %v2453_v36  ;;  %v2536_v10 = vadd.f32 %v5023_v8, %v2454_v19  ;;  %v2373_v61 = vmul.f32 %v3297_v24, %v4900_v26  ;;  %v2374_v29 = vmul.f32 %v3297_v24, %v5449_v27  ;;  %v2216_v18 = vpop.xlane.xlu1 %2215  ;;  %v5450_v26 = vld [vmem:[#allocation34_spill] sm:$0xff] }
 0x4a1   : > { %3302 = vrsqrt.f32 %v2291_v0  ;;  %v2260_v37 = vmul.f32 0.00390625, %v2216_v18 }
 0x4a2   : > { %2599 = vst [vmem:[%s5035_s24 + $0x140] sm:$0xff] %v2535_v11  ;;  %2600 = vst [vmem:[%s5035_s24 + $0x148] sm:$0xff] %v2536_v10  ;;  %v2455_v6 = vmul.f32 %v5014_v63, %v2373_v61  ;;  %v2456_v43 = vmul.f32 %v5017_v9, %v2374_v29  ;;  %v5458_v29 = vld [vmem:[#allocation25_spill] sm:$0xff] }
 0x4a3   : > { %v3299_v32 = vpop.eup %3298  ;;  %v2292_v48 = vadd.f32 1e-05, %v2260_v37  ;;  %v5459_v37 = vld [vmem:[#allocation26_spill] sm:$0xff] }
 0x4a4   : > { %v2537_v23 = vadd.f32 %v5020_v57, %v2455_v6  ;;  %v2538_v33 = vadd.f32 %v5023_v8, %v2456_v43  ;;  %v2375_v60 = vmul.f32 %v3299_v32, %v5450_v26  ;;  %v2376_v62 = vmul.f32 %v3299_v32, %v5451_v58  ;;  %v2219_v2 = vpop.xlane.xlu0 %2218 }
 0x4a5   : > { %3304 = vrsqrt.f32 %v2292_v48  ;;  %v2261_v7 = vmul.f32 0.00390625, %v2219_v2 }
 0x4a6   : > { %2601 = vst [vmem:[%s5035_s24 + $0x150] sm:$0xff] %v2537_v23  ;;  %2602 = vst [vmem:[%s5035_s24 + $0x158] sm:$0xff] %v2538_v33  ;;  %v2457_v5 = vmul.f32 %v5014_v63, %v2375_v60  ;;  %v2458_v30 = vmul.f32 %v5017_v9, %v2376_v62  ;;  %v5460_v62 = vld [vmem:[#allocation27_spill] sm:$0xff] }
 0x4a7   : > { %v3301_v1 = vpop.eup %3300  ;;  %v2293_v14 = vadd.f32 1e-05, %v2261_v7  ;;  %v5461_v7 = vld [vmem:[#allocation28_spill] sm:$0xff] }
 0x4a8   : > { %v2539_v17 = vadd.f32 %v5020_v57, %v2457_v5  ;;  %v2540_v15 = vadd.f32 %v5023_v8, %v2458_v30  ;;  %v2377_v42 = vmul.f32 %v3301_v1, %v5452_v51  ;;  %v2378_v56 = vmul.f32 %v3301_v1, %v5453_v53  ;;  %v2222_v31 = vpop.xlane.xlu1 %2221 }
 0x4a9   : > { %3306 = vrsqrt.f32 %v2293_v14  ;;  %v2262_v47 = vmul.f32 0.00390625, %v2222_v31 }
 0x4aa   : > { %2603 = vst [vmem:[%s5035_s24 + $0x160] sm:$0xff] %v2539_v17  ;;  %2604 = vst [vmem:[%s5035_s24 + $0x168] sm:$0xff] %v2540_v15  ;;  %v2459_v38 = vmul.f32 %v5014_v63, %v2377_v42  ;;  %v2460_v54 = vmul.f32 %v5017_v9, %v2378_v56 }
 0x4ab   : > { %v3303_v59 = vpop.eup %3302  ;;  %v2294_v25 = vadd.f32 1e-05, %v2262_v47 }
 0x4ac   : > { %v2541_v40 = vadd.f32 %v5020_v57, %v2459_v38  ;;  %v2542_v4 = vadd.f32 %v5023_v8, %v2460_v54  ;;  %v2379_v35 = vmul.f32 %v3303_v59, %v5454_v21  ;;  %v2380_v41 = vmul.f32 %v3303_v59, %v5455_v49  ;;  %v2225_v55 = vpop.xlane.xlu0 %2224 }
 0x4ad   : > { %3308 = vrsqrt.f32 %v2294_v25  ;;  %v2263_v12 = vmul.f32 0.00390625, %v2225_v55  ;;  %v5463_v55 = vld [vmem:[#allocation30_spill] sm:$0xff] }
 0x4ae   : > { %2605 = vst [vmem:[%s5035_s24 + $0x170] sm:$0xff] %v2541_v40  ;;  %2606 = vst [vmem:[%s5035_s24 + $0x178] sm:$0xff] %v2542_v4  ;;  %v2461_v22 = vmul.f32 %v5014_v63, %v2379_v35  ;;  %v2462_v13 = vmul.f32 %v5017_v9, %v2380_v41  ;;  %v5462_v4 = vld [vmem:[#allocation29_spill] sm:$0xff] }
 0x4af   : > { %v3305_v46 = vpop.eup %3304  ;;  %v2295_v20 = vadd.f32 1e-05, %v2263_v12 }
 0x4b0   : > { %v2543_v16 = vadd.f32 %v5020_v57, %v2461_v22  ;;  %v2544_v44 = vadd.f32 %v5023_v8, %v2462_v13  ;;  %v2381_v39 = vmul.f32 %v3305_v46, %v5456_v34  ;;  %v2382_v52 = vmul.f32 %v3305_v46, %v5457_v50  ;;  %v2228_v36 = vpop.xlane.xlu1 %2227  ;;  %v5465_v34 = vld [vmem:[#allocation32_spill] sm:$0xff] }
 0x4b1   : > { %3310 = vrsqrt.f32 %v2295_v20  ;;  %v2264_v19 = vmul.f32 0.00390625, %v2228_v36  ;;  %v5466_v50 = vld [vmem:[#allocation36_spill] sm:$0xff] }
 0x4b2   : > { %2607 = vst [vmem:[%s5035_s24 + $0x180] sm:$0xff] %v2543_v16  ;;  %2608 = vst [vmem:[%s5035_s24 + $0x188] sm:$0xff] %v2544_v44  ;;  %v2463_v24 = vmul.f32 %v5014_v63, %v2381_v39  ;;  %v2464_v0 = vmul.f32 %v5017_v9, %v2382_v52 }
 0x4b3   : > { %v3307_v11 = vpop.eup %3306  ;;  %v2296_v10 = vadd.f32 1e-05, %v2264_v19 }
 0x4b4   : > { %v2545_v61 = vadd.f32 %v5020_v57, %v2463_v24  ;;  %v2546_v27 = vadd.f32 %v5023_v8, %v2464_v0  ;;  %v2383_v18 = vmul.f32 %v3307_v11, %v5458_v29  ;;  %v2384_v6 = vmul.f32 %v3307_v11, %v5459_v37  ;;  %v2231_v43 = vpop.xlane.xlu0 %2230 }
 0x4b5   : > { %3312 = vrsqrt.f32 %v2296_v10  ;;  %v2265_v32 = vmul.f32 0.00390625, %v2231_v43 }
 0x4b6   : > { %2609 = vst [vmem:[%s5035_s24 + $0x190] sm:$0xff] %v2545_v61  ;;  %2610 = vst [vmem:[%s5035_s24 + $0x198] sm:$0xff] %v2546_v27  ;;  %v2465_v48 = vmul.f32 %v5014_v63, %v2383_v18  ;;  %v2466_v23 = vmul.f32 %v5017_v9, %v2384_v6 }
 0x4b7   : > { %v3309_v33 = vpop.eup %3308  ;;  %v2297_v26 = vadd.f32 1e-05, %v2265_v32 }
 0x4b8   : > { %v2547_v60 = vadd.f32 %v5020_v57, %v2465_v48  ;;  %v2548_v58 = vadd.f32 %v5023_v8, %v2466_v23  ;;  %v2385_v2 = vmul.f32 %v3309_v33, %v5460_v62  ;;  %v2386_v5 = vmul.f32 %v3309_v33, %v5461_v7  ;;  %v2234_v30 = vpop.xlane.xlu1 %2233 }
 0x4b9   : > { %3314 = vrsqrt.f32 %v2297_v26  ;;  %v2266_v1 = vmul.f32 0.00390625, %v2234_v30 }
 0x4ba   : > { %2611 = vst [vmem:[%s5035_s24 + $0x1a0] sm:$0xff] %v2547_v60  ;;  %2612 = vst [vmem:[%s5035_s24 + $0x1a8] sm:$0xff] %v2548_v58  ;;  %v2467_v14 = vmul.f32 %v5014_v63, %v2385_v2  ;;  %v2468_v17 = vmul.f32 %v5017_v9, %v2386_v5 }
 0x4bb   : > { %v3311_v15 = vpop.eup %3310  ;;  %v2298_v51 = vadd.f32 1e-05, %v2266_v1 }
 0x4bc   : > { %v2549_v42 = vadd.f32 %v5020_v57, %v2467_v14  ;;  %v2550_v53 = vadd.f32 %v5023_v8, %v2468_v17  ;;  %v2387_v56 = vmul.f32 %v3311_v15, %v4970_v28  ;;  %v2388_v31 = vmul.f32 %v3311_v15, %v4973_v3 }
 0x4bd   : > { %3316 = vrsqrt.f32 %v2298_v51 }
 0x4be   : > { %2613 = vst [vmem:[%s5035_s24 + $0x1b0] sm:$0xff] %v2549_v42  ;;  %2614 = vst [vmem:[%s5035_s24 + $0x1b8] sm:$0xff] %v2550_v53  ;;  %v2469_v47 = vmul.f32 %v5014_v63, %v2387_v56  ;;  %v2470_v38 = vmul.f32 %v5017_v9, %v2388_v31 }
 0x4bf   : > { %v3313_v54 = vpop.eup %3312 }
 0x4c0   : > { %v2551_v59 = vadd.f32 %v5020_v57, %v2469_v47  ;;  %v2552_v25 = vadd.f32 %v5023_v8, %v2470_v38  ;;  %v2389_v40 = vmul.f32 %v3313_v54, %v4980_v45  ;;  %v2390_v28 = vmul.f32 %v3313_v54, %v5462_v4  ;;  %v5464_v45 = vld [vmem:[#allocation31_spill] sm:$0xff] }
 0x4c2   : > { %2615 = vst [vmem:[%s5035_s24 + $0x1c0] sm:$0xff] %v2551_v59  ;;  %2616 = vst [vmem:[%s5035_s24 + $0x1c8] sm:$0xff] %v2552_v25  ;;  %v2471_v3 = vmul.f32 %v5014_v63, %v2389_v40  ;;  %v2472_v21 = vmul.f32 %v5017_v9, %v2390_v28 }
 0x4c3   : > { %v3315_v35 = vpop.eup %3314 }
 0x4c4   : > { %v2553_v49 = vadd.f32 %v5020_v57, %v2471_v3  ;;  %v2554_v41 = vadd.f32 %v5023_v8, %v2472_v21  ;;  %v2391_v12 = vmul.f32 %v3315_v35, %v5463_v55  ;;  %v2392_v22 = vmul.f32 %v3315_v35, %v5464_v45 }
 0x4c6   : > { %2617 = vst [vmem:[%s5035_s24 + $0x1d0] sm:$0xff] %v2553_v49  ;;  %2618 = vst [vmem:[%s5035_s24 + $0x1d8] sm:$0xff] %v2554_v41  ;;  %v2473_v13 = vmul.f32 %v5014_v63, %v2391_v12  ;;  %v2474_v46 = vmul.f32 %v5017_v9, %v2392_v22 }
 0x4c7   : > { %v3317_v20 = vpop.eup %3316 }
 0x4c8   : > { %v2555_v16 = vadd.f32 %v5020_v57, %v2473_v13  ;;  %v2556_v44 = vadd.f32 %v5023_v8, %v2474_v46  ;;  %v2393_v39 = vmul.f32 %v3317_v20, %v5465_v34  ;;  %v2394_v52 = vmul.f32 %v3317_v20, %v5466_v50 }
 0x4ca   : > { %2619 = vst [vmem:[%s5035_s24 + $0x1e0] sm:$0xff] %v2555_v16  ;;  %2620 = vst [vmem:[%s5035_s24 + $0x1e8] sm:$0xff] %v2556_v44  ;;  %v2475_v36 = vmul.f32 %v5014_v63, %v2393_v39  ;;  %v2476_v19 = vmul.f32 %v5017_v9, %v2394_v52 }
 0x4cc   : > { %v2557_v24 = vadd.f32 %v5020_v57, %v2475_v36  ;;  %v2558_v0 = vadd.f32 %v5023_v8, %v2476_v19 }
 0x4ce   : > { %2621 = vst [vmem:[%s5035_s24 + $0x1f0] sm:$0xff] %v2557_v24  ;;  %2622 = vst [vmem:[%s5035_s24 + $0x1f8] sm:$0xff] %v2558_v0 }
 0x4cf   : > { %3538 = shalt.err (!%p3535_p13)
}
 0x4d0   : > { %s3539_s17 = scalar_lea.hbm %s5286_s27, 8192  ;;  %s3543_s10 = scalar_lea.hbm %s5341_s5, 16384 }
 0x4d1   : > { %p3540_p9 = scmp.ne.s32.totalorder %s5286_s27, %s3539_s17  ;;  %p3544_p6 = scmp.lt.u32.totalorder %s5286_s27, %s5341_s5 }
 0x4d2   : > { %p3545_p10 = scmp.lt.u32.totalorder %s3543_s10, %s3539_s17  ;;  %p3547_p4 = scmp.lt.u32.totalorder %s3539_s17, %s5286_s27 }
 0x4d3   : > { %p3541_p0 = pnand %p3540_p9, %p3812_p8 }
 0x4d4   : > { %p3546_p3 = por %p3545_p10, %p3544_p6 }
 0x4d5   : > { %p3542_p11 = pneg %p3541_p0 }
 0x4d6   : > { %p3548_p5 = por %p3547_p4, %p3546_p3 }
 0x4d8   : > { %p3549_p7 = pnand %p3548_p5, %p3542_p11 }
 0x4da   : > { %3552 = shalt.err (!%p3549_p7)
}
 0x4db   : > { %s3611_s26 = smov 256   ;;  %s3612_s15 = smov 16  }
 0x4dc   : > { %3179 = dma.vmem_to_hbm [thread:$0]  (%p3812_p8), %s5288_s14, 8192, %s5286_s27, %s2624_s22, %s3611_s26, %s3611_s26, %s3612_s15  }
 0x4dd PF: > { %s2653_s13 = sand.u32 1, %s3587_s18   ;;  %p5467_p12 = scmp.ne.s32.totalorder %s5384_s25, 0 }
 0x4de   : > { %p5468_p2 = scmp.ge.s32.totalorder %s3599_s21, 2  ;;  %s2654_s16 = scalar_lea.sflag [#allocation4], %s2653_s13 }
 0x4e0   : > { %p3199_p1 = pnand %p5468_p2, %p5467_p12 }
 0x4e2   : > { %3582 = dma.done.wait (!%p3199_p1), %s2654_s16, 8192  }
 0x4e3   : > { %3584 = vsyncadd (!%p3199_p1), %s2654_s16, 4294959104  ;;  %p20_p13 = scmp.ge.s32.totalorder %s3799_s12, 4   ;;  %s5469_s18 = smov %s3591_s19 }
 0x4e4   : > { %s5470_s19 = smov %s3595_s20  ;;  %s5471_s20 = smov %s3808_s23 }
 0x4e5   : > { %s5472_s21 = smov %s3799_s12  ;;  %22 = sbr.rel (!%p20_p13) target bundleno = 7 (0x7), region = 101 }
 0x4ec   :  { %2659 = vsyncpa [#allocation3], 1 }
 0x4ed   :  { %2661 = vsyncpa [#allocation3 + $0x1], 1 }
 0x4ee   :  { %2662 = vsyncpa [#allocation6], 1 }
 0x4ef   :  { %2663 = vsyncpa [#allocation9], 1 }
 0x4f0   :  { %2664 = vsyncpa [#allocation4], 1 }
 0x4f1   :  { %2666 = vsyncpa [#allocation4 + $0x1], 1 }

</bundles_post_ra>
